<compile_context>
chip_gen: v7x
topology: tpu7x:2x2x1
jax: 0.10.0
libtpu: 0.0.40
codegen_flags: <defaults>
</compile_context>

<pallas_src>
import functools
import numpy as np

import jax
import jax.numpy as jnp
from jax.experimental import pallas as pl
from jax.experimental.pallas import tpu as pltpu


def _round_up(x, m):
    return ((x + m - 1) // m) * m


# ----------------------------- Pallas kernels ------------------------------ #

def _convt_bn_relu_kernel(x_ref, w_ref, gamma_ref, beta_ref, rm_ref, bm_ref,
                          mask_ref, o_ref, s1_ref, s2_ref, scale_ref, shift_ref,
                          *, deltas, lbase):
    """Fused sub-pixel ConvTranspose + train-mode BatchNorm + ReLU.

    Grid = (channel_tiles, sweep, m_tiles).  Sweep 0 accumulates per-column batch
    statistics into VMEM scratch; sweep 1 recomputes the conv and applies the
    normalization.  Conv = sum over static taps of a shifted-row matmul (fused
    im2col: no patch materialization in HBM).
    """
    sweep = pl.program_id(1)
    mtile = pl.program_id(2)

    acc = jnp.zeros((lbase, o_ref.shape[-1]), jnp.float32)
    for t, d in enumerate(deltas):
        acc = acc + jnp.dot(x_ref[d:d + lbase, :], w_ref[t],
                            preferred_element_type=jnp.float32)

    @pl.when(jnp.logical_and(sweep == 0, mtile == 0))
    def _():
        s1_ref[...] = jnp.zeros_like(s1_ref)
        s2_ref[...] = jnp.zeros_like(s2_ref)

    @pl.when(sweep == 0)
    def _():
        m = mask_ref[...]                             # (lbase, 1); junk / pad rows -> 0
        am = acc * m
        s1_ref[...] += jnp.sum(am, axis=0, keepdims=True)
        s2_ref[...] += jnp.sum(am * acc, axis=0, keepdims=True)

    @pl.when(jnp.logical_and(sweep == 1, mtile == 0))
    def _():
        # Pool per-(channel, phase) column stats over each channel's 4 phase columns:
        # reduce (TN,CP) then broadcast (CP,TN); bm carries the 1/count factor.
        ch1 = jnp.dot(s1_ref[...], rm_ref[...], preferred_element_type=jnp.float32)
        ch2 = jnp.dot(s2_ref[...], rm_ref[...], preferred_element_type=jnp.float32)
        mean = jnp.dot(ch1, bm_ref[...], preferred_element_type=jnp.float32)
        ex2 = jnp.dot(ch2, bm_ref[...], preferred_element_type=jnp.float32)
        var = jnp.maximum(ex2 - mean * mean, 0.0)     # single-pass variance, clamped
        inv = jax.lax.rsqrt(var + 1e-5)
        scale_ref[...] = inv * gamma_ref[...]
        shift_ref[...] = beta_ref[...] - mean * inv * gamma_ref[...]

    @pl.when(sweep == 1)
    def _():
        y = acc * scale_ref[...] + shift_ref[...]
        o_ref[...] = jnp.maximum(y, 0.0).astype(o_ref.dtype)


def _convt_tanh_kernel(x_ref, w_ref, o_ref, *, deltas, lbase):
    """Fused sub-pixel ConvTranspose + Tanh (final layer, no BN)."""
    acc = jnp.zeros((lbase, o_ref.shape[-1]), jnp.float32)
    for t, d in enumerate(deltas):
        acc = acc + jnp.dot(x_ref[d:d + lbase, :], w_ref[t],
                            preferred_element_type=jnp.float32)
    o_ref[...] = jnp.tanh(acc).astype(o_ref.dtype)


# --------------------------- pallas_call wrappers --------------------------- #

def _vmem_limit(*byte_counts):
    # Sized to the double-buffered blocks with headroom, clamped below v7x's 64 MiB.
    need = 4 * sum(int(b) for b in byte_counts)
    return int(min(max(need, 32 * 1024 * 1024), 56 * 1024 * 1024))


def _call_convt_bn_relu(xflat, w_taps, gcol, bcol, rm, bm, mask, *,
                        lbase, tail, tn, deltas, out_dtype):
    lin = lbase + tail
    total, cin = xflat.shape
    mt = total // lin
    ntaps, _, npad = w_taps.shape
    ct = npad // tn
    cp = rm.shape[1]
    out_bytes = np.dtype(out_dtype).itemsize

    kern = functools.partial(_convt_bn_relu_kernel, deltas=deltas, lbase=lbase)
    limit = _vmem_limit(lin * cin * xflat.dtype.itemsize,
                        ntaps * cin * tn * w_taps.dtype.itemsize,
                        lbase * tn * out_bytes,
                        2 * tn * cp * 4, lbase * 4, 8 * tn * 4)
    return pl.pallas_call(
        kern,
        grid=(ct, 2, mt),
        in_specs=[
            pl.BlockSpec((lin, cin), lambda c, s, m: (m, 0)),
            pl.BlockSpec((ntaps, cin, tn), lambda c, s, m: (0, 0, c)),
            pl.BlockSpec((1, tn), lambda c, s, m: (0, c)),
            pl.BlockSpec((1, tn), lambda c, s, m: (0, c)),
            pl.BlockSpec((tn, cp), lambda c, s, m: (0, 0)),
            pl.BlockSpec((cp, tn), lambda c, s, m: (0, 0)),
            pl.BlockSpec((lbase, 1), lambda c, s, m: (m, 0)),
        ],
        # Sweep 0 parks on block (0, c) (never written there), so no early flush;
        # sweep 1 walks the m tiles and writes each block exactly once.
        out_specs=pl.BlockSpec((lbase, tn), lambda c, s, m: (m * s, c)),
        out_shape=jax.ShapeDtypeStruct((mt * lbase, npad), out_dtype),
        scratch_shapes=[pltpu.VMEM((1, tn), jnp.float32) for _ in range(4)],
        compiler_params=pltpu.CompilerParams(
            dimension_semantics=("parallel", "arbitrary", "arbitrary"),
            vmem_limit_bytes=limit),
    )(xflat, w_taps, gcol, bcol, rm, bm, mask)


def _call_convt_tanh(xflat, w_taps, *, lbase, tail, deltas, out_dtype):
    lin = lbase + tail
    total, cin = xflat.shape
    mt = total // lin
    ntaps, _, npad = w_taps.shape

    kern = functools.partial(_convt_tanh_kernel, deltas=deltas, lbase=lbase)
    limit = _vmem_limit(lin * cin * xflat.dtype.itemsize,
                        ntaps * cin * npad * w_taps.dtype.itemsize,
                        lbase * npad * np.dtype(out_dtype).itemsize)
    return pl.pallas_call(
        kern,
        grid=(mt,),
        in_specs=[pl.BlockSpec((lin, cin), lambda m: (m, 0)),
                  pl.BlockSpec((ntaps, cin, npad), lambda m: (0, 0, 0))],
        out_specs=pl.BlockSpec((lbase, npad), lambda m: (m, 0)),
        out_shape=jax.ShapeDtypeStruct((mt * lbase, npad), out_dtype),
        compiler_params=pltpu.CompilerParams(
            dimension_semantics=("parallel",),
            vmem_limit_bytes=limit),
    )(xflat, w_taps)


# ---------------------- weight / layout preparation (XLA) ------------------- #
# Phase (sub-pixel) decomposition of ConvTranspose2d(k=4, s=2, p=1):
#   output (2a+r, 2b+c) = sum over taps (dy, dx) of x[a+dy, b+dx] @ W[:, :, kh, kw]
# with kh = r + 1 - 2*dy (valid kh in [0,4)), likewise kw from (c, dx).
# Columns are channel-major / phase-minor:  col = ch*4 + (2r + c).

_KH_OF = {(0, -1): 3, (0, 0): 1, (1, 0): 2, (1, 1): 0}   # (output parity, dy) -> kernel tap


def _pad_cols(w2d, npad):
    pad = npad - w2d.shape[1]
    if pad > 0:
        w2d = jnp.concatenate([w2d, jnp.zeros((w2d.shape[0], pad), w2d.dtype)], axis=1)
    return w2d


def _tap_weights_k4s2p1(w, npad):
    # w: (Cin, Cout, 4, 4) -> (9, Cin, npad); taps ordered (dy, dx) row-major.
    cin, cout = w.shape[0], w.shape[1]
    zero = jnp.zeros((cin, cout), w.dtype)
    taps = []
    for dy in (-1, 0, 1):
        for dx in (-1, 0, 1):
            phases = []
            for r in (0, 1):
                for c in (0, 1):
                    if (r, dy) in _KH_OF and (c, dx) in _KH_OF:
                        phases.append(w[:, :, _KH_OF[(r, dy)], _KH_OF[(c, dx)]])
                    else:
                        phases.append(zero)
            taps.append(_pad_cols(jnp.stack(phases, axis=-1).reshape(cin, cout * 4), npad))
    return jnp.stack(taps, axis=0)


def _tap_weights_k2s2p1(w, npad):
    # ConvTranspose2d(k=2, s=2, p=1): out(2a+r, 2b+c) = x[a+r, b+c] @ w[:, :, 1-r, 1-c].
    cin, cout = w.shape[0], w.shape[1]
    zero = jnp.zeros((cin, cout), w.dtype)
    taps = []
    for ty in (0, 1):
        for tx in (0, 1):
            phases = []
            for r in (0, 1):
                for c in (0, 1):
                    phases.append(w[:, :, 1 - r, 1 - c] if (ty, tx) == (r, c) else zero)
            taps.append(_pad_cols(jnp.stack(phases, axis=-1).reshape(cin, cout * 4), npad))
    return jnp.stack(taps, axis=0)


def _per_column(v, cout, npad):
    col = jnp.repeat(v.astype(jnp.float32), 4)               # channel-major, phase-minor
    return jnp.pad(col, (0, npad - 4 * cout)).reshape(1, npad)


def _pool_mats(tn, cp, count):
    # Reduce (TN, CP) + broadcast (CP, TN) replace the old O(Npad^2) pool matrix.
    ch = np.arange(tn) // 4
    rm = np.zeros((tn, cp), np.float32)
    rm[np.arange(tn), ch] = 1.0
    bm = np.zeros((cp, tn), np.float32)
    bm[ch, np.arange(tn)] = 1.0 / float(count)
    return jnp.asarray(rm), jnp.asarray(bm)


def _stats_mask(n_imgs, n_true, hp, wp, ah, aw):
    # 1.0 on valid anchor rows of real images; 0.0 on halo/junk rows and batch padding.
    pos = ((np.arange(hp)[:, None] < ah) & (np.arange(wp)[None, :] < aw)).astype(np.float32)
    img = (np.arange(n_imgs) < n_true).astype(np.float32)
    m = (img[:, None] * pos.reshape(-1)[None, :]).reshape(n_imgs * hp * wp, 1)
    return jnp.asarray(m)


def _assemble(out2d, n_imgs, hp, wp, ah, aw, cout):
    # (n_imgs*hp*wp, >=4*cout) flattened phase output -> interleaved (n_imgs, 2ah, 2aw, cout).
    y = out2d.reshape(n_imgs, hp, wp, -1)[:, :ah, :aw, :4 * cout]
    y = y.reshape(n_imgs, ah, aw, cout, 2, 2)                # (..., ch, r, c)
    y = jnp.transpose(y, (0, 1, 4, 2, 5, 3))                 # (img, a, r, b, c, ch)
    return y.reshape(n_imgs, 2 * ah, 2 * aw, cout)


def _pick_nb(n_true, simg):
    # Images per m-tile: even, targets >=512-row tiles (>=256 sublane blocks), capped by batch.
    nb = max(2, _round_up(-(-512 // simg), 2))
    return min(nb, _round_up(n_true, 2))


# ------------------------------- layer drivers ------------------------------ #

def _middle_layer(h, w, gamma, beta, n_true, mxu_dtype):
    cin, cout = w.shape[0], w.shape[1]
    _, H, W, _ = h.shape
    hp, wp, ah, aw = H + 2, W + 2, H, W
    simg = hp * wp
    nb = _pick_nb(n_true, simg)
    n_imgs = _round_up(n_true, nb)
    mt = n_imgs // nb
    lbase = nb * simg
    tail = _round_up(2 * wp + 2, 8)                          # max tap shift, sublane-aligned
    npad = _round_up(4 * cout, 128)
    tn = 256 if npad % 256 == 0 else 128                     # fill 256-wide MXU on v6e/v7x
    deltas = tuple((dy + 1) * wp + (dx + 1) for dy in (-1, 0, 1) for dx in (-1, 0, 1))

    hpad = jnp.pad(h, ((0, n_imgs - n_true), (1, 1), (1, 1), (0, 0)))
    flat = hpad.reshape(mt, lbase, cin)
    flat = jnp.pad(flat, ((0, 0), (0, tail), (0, 0))).reshape(mt * (lbase + tail), cin)

    rm, bm = _pool_mats(tn, 128, n_true * 4 * ah * aw)       # count = N * OH * OW
    out2d = _call_convt_bn_relu(
        flat.astype(mxu_dtype), _tap_weights_k4s2p1(w, npad).astype(mxu_dtype),
        _per_column(gamma, cout, npad), _per_column(beta, cout, npad),
        rm, bm, _stats_mask(n_imgs, n_true, hp, wp, ah, aw),
        lbase=lbase, tail=tail, tn=tn, deltas=deltas, out_dtype=mxu_dtype)
    return _assemble(out2d, n_imgs, hp, wp, ah, aw, cout)[:n_true]


def _final_layer(h, w, n_true, mxu_dtype):
    cin, nc = w.shape[0], w.shape[1]
    _, H, W, _ = h.shape
    ah, aw = H - 1, W - 1
    simg = H * W
    nb = _pick_nb(n_true, simg)
    n_imgs = _round_up(n_true, nb)
    mt = n_imgs // nb
    lbase = nb * simg
    tail = _round_up(W + 1, 8)
    npad = _round_up(4 * nc, 128)
    deltas = tuple(ty * W + tx for ty in (0, 1) for tx in (0, 1))

    hpad = jnp.pad(h, ((0, n_imgs - n_true), (0, 0), (0, 0), (0, 0)))
    flat = hpad.reshape(mt, lbase, cin)
    flat = jnp.pad(flat, ((0, 0), (0, tail), (0, 0))).reshape(mt * (lbase + tail), cin)

    out2d = _call_convt_tanh(flat.astype(mxu_dtype),
                             _tap_weights_k2s2p1(w, npad).astype(mxu_dtype),
                             lbase=lbase, tail=tail, deltas=deltas, out_dtype=mxu_dtype)
    return _assemble(out2d, n_imgs, H, W, ah, aw, nc)[:n_true]


@functools.partial(jax.jit, static_argnames=("mxu_dtype",))
def dcgan_g_forward(x_nchw, params, mxu_dtype=jnp.bfloat16):
    n, z = x_nchw.shape[0], x_nchw.shape[1]
    w0, w1, w2, w3 = params["w0"], params["w1"], params["w2"], params["w3"]

    # Layer 0: ConvT(z->C0, k4 s1 p0) on a 1x1 input == (N,Z)x(Z,16*C0) matmul.
    # Per perf review it is MXU-starved / launch-overhead bound as a dedicated kernel,
    # so it stays in XLA (fused with its BN + ReLU) and feeds the Pallas layers.
    x2d = x_nchw.reshape(n, z).astype(jnp.float32)
    h0 = jnp.einsum("nz,zchw->nhwc", x2d, w0.astype(jnp.float32))      # (N, 4, 4, C0)
    mu = jnp.mean(h0, axis=(0, 1, 2))
    var = jnp.mean(jnp.square(h0 - mu), axis=(0, 1, 2))
    h = jnp.maximum((h0 - mu) * jax.lax.rsqrt(var + 1e-5) * params["g0"] + params["b0"], 0.0)

    h = _middle_layer(h.astype(mxu_dtype), w1, params["g1"], params["b1"], n, mxu_dtype)
    h = _middle_layer(h, w2, params["g2"], params["b2"], n, mxu_dtype)
    y = _final_layer(h, w3, n, mxu_dtype)                              # (N, 30, 30, NC)
    return jnp.transpose(y, (0, 3, 1, 2)).astype(jnp.float32)          # NHWC -> NCHW


# --------------------------- pure-JAX reference ----------------------------- #

def _conv_transpose_ref(x_nhwc, w_t, stride, pad):
    cin, cout, kh, kw = w_t.shape
    w_hwio = jnp.transpose(w_t[:, :, ::-1, ::-1], (2, 3, 0, 1))
    q = kh - 1 - pad
    return jax.lax.conv_general_dilated(
        x_nhwc, w_hwio, window_strides=(1, 1),
        padding=[(q, q), (q, q)], lhs_dilation=(stride, stride),
        dimension_numbers=("NHWC", "HWIO", "NHWC"))


def _bn_relu_ref(x_nhwc, gamma, beta):
    mean = jnp.mean(x_nhwc, axis=(0, 1, 2), keepdims=True)
    var = jnp.mean((x_nhwc - mean) ** 2, axis=(0, 1, 2), keepdims=True)
    y = (x_nhwc - mean) * jax.lax.rsqrt(var + 1e-5) * gamma + beta
    return jnp.maximum(y, 0.0)


def dcgan_g_ref(x_nchw, params):
    x = jnp.transpose(x_nchw, (0, 2, 3, 1)).astype(jnp.float32)
    h = _conv_transpose_ref(x, params["w0"], 1, 0)
    h = _bn_relu_ref(h, params["g0"], params["b0"])
    h = _conv_transpose_ref(h, params["w1"], 2, 1)
    h = _bn_relu_ref(h, params["g1"], params["b1"])
    h = _conv_transpose_ref(h, params["w2"], 2, 1)
    h = _bn_relu_ref(h, params["g2"], params["b2"])
    h = _conv_transpose_ref(h, params["w3"], 2, 1)
    h = jnp.tanh(h)
    return jnp.transpose(h, (0, 3, 1, 2))


# ----------------------------------- main ----------------------------------- #

if __name__ == "__main__":
    # Small synthetic config: image_size=32 -> mult=4, z_size=8, G_h_size=8, n_colors=3.
    N, Z, GH, NC = 2, 8, 8, 3

    key = jax.random.PRNGKey(0)
    k0, k1, k2, k3, kx = jax.random.split(key, 5)
    params = {
        # ConvTranspose2d weights, PyTorch layout (Cin, Cout, KH, KW), bias=False.
        "w0": 0.05 * jax.random.normal(k0, (Z, GH * 4, 4, 4), jnp.float32),
        "w1": 0.05 * jax.random.normal(k1, (GH * 4, GH * 2, 4, 4), jnp.float32),
        "w2": 0.05 * jax.random.normal(k2, (GH * 2, GH, 4, 4), jnp.float32),
        "w3": 0.05 * jax.random.normal(k3, (GH, NC, 2, 2), jnp.float32),
        # BatchNorm affine params at PyTorch init (weight=1, bias=0).
        "g0": jnp.ones((GH * 4,), jnp.float32), "b0": jnp.zeros((GH * 4,), jnp.float32),
        "g1": jnp.ones((GH * 2,), jnp.float32), "b1": jnp.zeros((GH * 2,), jnp.float32),
        "g2": jnp.ones((GH,), jnp.float32),     "b2": jnp.zeros((GH,), jnp.float32),
    }

    x = jax.random.normal(kx, (N, Z, 1, 1), jnp.float32)   # latent, NCHW

    ref = jax.block_until_ready(dcgan_g_ref(x, params))

    # f32 path: validates the fused / phase-decomposed / two-sweep BN structure tightly.
    out_f32 = jax.block_until_ready(dcgan_g_forward(x, params, mxu_dtype=jnp.float32))
    assert out_f32.shape == (N, NC, 30, 30), out_f32.shape
    np.testing.assert_allclose(np.asarray(out_f32), np.asarray(ref), atol=2e-2, rtol=0)

    # bf16 path (fast path on all TPU generations): bf16 MXU inputs, bf16 activation
    # storage, f32 accumulation / BN math.
    out_bf16 = jax.block_until_ready(dcgan_g_forward(x, params, mxu_dtype=jnp.bfloat16))
    assert out_bf16.shape == (N, NC, 30, 30), out_bf16.shape
    np.testing.assert_allclose(np.asarray(out_bf16), np.asarray(ref), atol=6e-2, rtol=0)

    # TODO(synk): torch.nn.parallel.data_parallel multi-GPU dispatch branch is
    # device-placement glue with no Pallas equivalent; single-device path implemented.
    print("KERNEL_OK")
</pallas_src>

<mosaic_0001>
module attributes {stable_mosaic.version = 11 : i64} {
  func.func @_convt_bn_relu_kernel(%arg0: i32, %arg1: i32, %arg2: i32, %arg3: memref<88x32xf32, #tpu.memory_space<vmem>>, %arg4: memref<9x32x128xf32, #tpu.memory_space<vmem>>, %arg5: memref<1x128xf32, #tpu.memory_space<vmem>>, %arg6: memref<1x128xf32, #tpu.memory_space<vmem>>, %arg7: memref<128x128xf32, #tpu.memory_space<vmem>>, %arg8: memref<128x128xf32, #tpu.memory_space<vmem>>, %arg9: memref<72x1xf32, #tpu.memory_space<vmem>>, %arg10: memref<72x128xf32, #tpu.memory_space<vmem>>, %arg11: memref<1x128xf32, #tpu.memory_space<vmem>>, %arg12: memref<1x128xf32, #tpu.memory_space<vmem>>, %arg13: memref<1x128xf32, #tpu.memory_space<vmem>>, %arg14: memref<1x128xf32, #tpu.memory_space<vmem>>) attributes {dimension_semantics = [#tpu.dimension_semantics<parallel>, #tpu.dimension_semantics<arbitrary>, #tpu.dimension_semantics<arbitrary>], iteration_bounds = array<i64: 1, 2, 1>, scalar_prefetch = 0 : i64, scratch_operands = 4 : i64, tpu.core_type = #tpu.core_type<tc>, window_params = [{transform_indices = @transform_0, window_bounds = array<i64: 88, 32>}, {transform_indices = @transform_1, window_bounds = array<i64: 9, 32, 128>}, {transform_indices = @transform_2, window_bounds = array<i64: 1, 128>}, {transform_indices = @transform_3, window_bounds = array<i64: 1, 128>}, {pipeline_mode = #tpu.pipeline_mode<synchronous>, transform_indices = @transform_4, window_bounds = array<i64: 128, 128>}, {pipeline_mode = #tpu.pipeline_mode<synchronous>, transform_indices = @transform_5, window_bounds = array<i64: 128, 128>}, {transform_indices = @transform_6, window_bounds = array<i64: 72, 1>}, {transform_indices = @transform_7, window_bounds = array<i64: 72, 128>}]} {
    %cst = arith.constant 0.000000e+00 : f32
    %0 = vector.broadcast %cst : f32 to vector<72x128xf32>
    %c0 = arith.constant 0 : index
    %c0_0 = arith.constant 0 : index
    %1 = vector.load %arg3[%c0, %c0_0] : memref<88x32xf32, #tpu.memory_space<vmem>>, vector<72x32xf32>
    %c0_1 = arith.constant 0 : index
    %c0_2 = arith.constant 0 : index
    %c0_3 = arith.constant 0 : index
    %2 = vector.load %arg4[%c0_1, %c0_2, %c0_3] : memref<9x32x128xf32, #tpu.memory_space<vmem>>, vector<1x32x128xf32>
    %3 = vector.shape_cast %2 : vector<1x32x128xf32> to vector<32x128xf32>
    %cst_4 = arith.constant dense<0.000000e+00> : vector<72x128xf32>
    %4 = tpu.matmul %1, %3, %cst_4 {dimension_numbers = #tpu.dot_dimension_numbers<[1], [0], [0], [1], [0, 0, 1, 1], [], []>} : vector<72x32xf32>, vector<32x128xf32>, vector<72x128xf32> -> vector<72x128xf32>
    %5 = arith.addf %0, %4 : vector<72x128xf32>
    %c1 = arith.constant 1 : index
    %c0_5 = arith.constant 0 : index
    %6 = vector.load %arg3[%c1, %c0_5] : memref<88x32xf32, #tpu.memory_space<vmem>>, vector<72x32xf32>
    %c1_6 = arith.constant 1 : index
    %c0_7 = arith.constant 0 : index
    %c0_8 = arith.constant 0 : index
    %7 = vector.load %arg4[%c1_6, %c0_7, %c0_8] : memref<9x32x128xf32, #tpu.memory_space<vmem>>, vector<1x32x128xf32>
    %8 = vector.shape_cast %7 : vector<1x32x128xf32> to vector<32x128xf32>
    %cst_9 = arith.constant dense<0.000000e+00> : vector<72x128xf32>
    %9 = tpu.matmul %6, %8, %cst_9 {dimension_numbers = #tpu.dot_dimension_numbers<[1], [0], [0], [1], [0, 0, 1, 1], [], []>} : vector<72x32xf32>, vector<32x128xf32>, vector<72x128xf32> -> vector<72x128xf32>
    %10 = arith.addf %5, %9 : vector<72x128xf32>
    %c2 = arith.constant 2 : index
    %c0_10 = arith.constant 0 : index
    %11 = vector.load %arg3[%c2, %c0_10] : memref<88x32xf32, #tpu.memory_space<vmem>>, vector<72x32xf32>
    %c2_11 = arith.constant 2 : index
    %c0_12 = arith.constant 0 : index
    %c0_13 = arith.constant 0 : index
    %12 = vector.load %arg4[%c2_11, %c0_12, %c0_13] : memref<9x32x128xf32, #tpu.memory_space<vmem>>, vector<1x32x128xf32>
    %13 = vector.shape_cast %12 : vector<1x32x128xf32> to vector<32x128xf32>
    %cst_14 = arith.constant dense<0.000000e+00> : vector<72x128xf32>
    %14 = tpu.matmul %11, %13, %cst_14 {dimension_numbers = #tpu.dot_dimension_numbers<[1], [0], [0], [1], [0, 0, 1, 1], [], []>} : vector<72x32xf32>, vector<32x128xf32>, vector<72x128xf32> -> vector<72x128xf32>
    %15 = arith.addf %10, %14 : vector<72x128xf32>
    %c6 = arith.constant 6 : index
    %c0_15 = arith.constant 0 : index
    %16 = vector.load %arg3[%c6, %c0_15] : memref<88x32xf32, #tpu.memory_space<vmem>>, vector<72x32xf32>
    %c3 = arith.constant 3 : index
    %c0_16 = arith.constant 0 : index
    %c0_17 = arith.constant 0 : index
    %17 = vector.load %arg4[%c3, %c0_16, %c0_17] : memref<9x32x128xf32, #tpu.memory_space<vmem>>, vector<1x32x128xf32>
    %18 = vector.shape_cast %17 : vector<1x32x128xf32> to vector<32x128xf32>
    %cst_18 = arith.constant dense<0.000000e+00> : vector<72x128xf32>
    %19 = tpu.matmul %16, %18, %cst_18 {dimension_numbers = #tpu.dot_dimension_numbers<[1], [0], [0], [1], [0, 0, 1, 1], [], []>} : vector<72x32xf32>, vector<32x128xf32>, vector<72x128xf32> -> vector<72x128xf32>
    %20 = arith.addf %15, %19 : vector<72x128xf32>
    %c7 = arith.constant 7 : index
    %c0_19 = arith.constant 0 : index
    %21 = vector.load %arg3[%c7, %c0_19] : memref<88x32xf32, #tpu.memory_space<vmem>>, vector<72x32xf32>
    %c4 = arith.constant 4 : index
    %c0_20 = arith.constant 0 : index
    %c0_21 = arith.constant 0 : index
    %22 = vector.load %arg4[%c4, %c0_20, %c0_21] : memref<9x32x128xf32, #tpu.memory_space<vmem>>, vector<1x32x128xf32>
    %23 = vector.shape_cast %22 : vector<1x32x128xf32> to vector<32x128xf32>
    %cst_22 = arith.constant dense<0.000000e+00> : vector<72x128xf32>
    %24 = tpu.matmul %21, %23, %cst_22 {dimension_numbers = #tpu.dot_dimension_numbers<[1], [0], [0], [1], [0, 0, 1, 1], [], []>} : vector<72x32xf32>, vector<32x128xf32>, vector<72x128xf32> -> vector<72x128xf32>
    %25 = arith.addf %20, %24 : vector<72x128xf32>
    %c8 = arith.constant 8 : index
    %c0_23 = arith.constant 0 : index
    %26 = vector.load %arg3[%c8, %c0_23] : memref<88x32xf32, #tpu.memory_space<vmem>>, vector<72x32xf32>
    %c5 = arith.constant 5 : index
    %c0_24 = arith.constant 0 : index
    %c0_25 = arith.constant 0 : index
    %27 = vector.load %arg4[%c5, %c0_24, %c0_25] : memref<9x32x128xf32, #tpu.memory_space<vmem>>, vector<1x32x128xf32>
    %28 = vector.shape_cast %27 : vector<1x32x128xf32> to vector<32x128xf32>
    %cst_26 = arith.constant dense<0.000000e+00> : vector<72x128xf32>
    %29 = tpu.matmul %26, %28, %cst_26 {dimension_numbers = #tpu.dot_dimension_numbers<[1], [0], [0], [1], [0, 0, 1, 1], [], []>} : vector<72x32xf32>, vector<32x128xf32>, vector<72x128xf32> -> vector<72x128xf32>
    %30 = arith.addf %25, %29 : vector<72x128xf32>
    %c12 = arith.constant 12 : index
    %c0_27 = arith.constant 0 : index
    %31 = vector.load %arg3[%c12, %c0_27] : memref<88x32xf32, #tpu.memory_space<vmem>>, vector<72x32xf32>
    %c6_28 = arith.constant 6 : index
    %c0_29 = arith.constant 0 : index
    %c0_30 = arith.constant 0 : index
    %32 = vector.load %arg4[%c6_28, %c0_29, %c0_30] : memref<9x32x128xf32, #tpu.memory_space<vmem>>, vector<1x32x128xf32>
    %33 = vector.shape_cast %32 : vector<1x32x128xf32> to vector<32x128xf32>
    %cst_31 = arith.constant dense<0.000000e+00> : vector<72x128xf32>
    %34 = tpu.matmul %31, %33, %cst_31 {dimension_numbers = #tpu.dot_dimension_numbers<[1], [0], [0], [1], [0, 0, 1, 1], [], []>} : vector<72x32xf32>, vector<32x128xf32>, vector<72x128xf32> -> vector<72x128xf32>
    %35 = arith.addf %30, %34 : vector<72x128xf32>
    %c13 = arith.constant 13 : index
    %c0_32 = arith.constant 0 : index
    %36 = vector.load %arg3[%c13, %c0_32] : memref<88x32xf32, #tpu.memory_space<vmem>>, vector<72x32xf32>
    %c7_33 = arith.constant 7 : index
    %c0_34 = arith.constant 0 : index
    %c0_35 = arith.constant 0 : index
    %37 = vector.load %arg4[%c7_33, %c0_34, %c0_35] : memref<9x32x128xf32, #tpu.memory_space<vmem>>, vector<1x32x128xf32>
    %38 = vector.shape_cast %37 : vector<1x32x128xf32> to vector<32x128xf32>
    %cst_36 = arith.constant dense<0.000000e+00> : vector<72x128xf32>
    %39 = tpu.matmul %36, %38, %cst_36 {dimension_numbers = #tpu.dot_dimension_numbers<[1], [0], [0], [1], [0, 0, 1, 1], [], []>} : vector<72x32xf32>, vector<32x128xf32>, vector<72x128xf32> -> vector<72x128xf32>
    %40 = arith.addf %35, %39 : vector<72x128xf32>
    %c14 = arith.constant 14 : index
    %c0_37 = arith.constant 0 : index
    %41 = vector.load %arg3[%c14, %c0_37] : memref<88x32xf32, #tpu.memory_space<vmem>>, vector<72x32xf32>
    %c8_38 = arith.constant 8 : index
    %c0_39 = arith.constant 0 : index
    %c0_40 = arith.constant 0 : index
    %42 = vector.load %arg4[%c8_38, %c0_39, %c0_40] : memref<9x32x128xf32, #tpu.memory_space<vmem>>, vector<1x32x128xf32>
    %43 = vector.shape_cast %42 : vector<1x32x128xf32> to vector<32x128xf32>
    %cst_41 = arith.constant dense<0.000000e+00> : vector<72x128xf32>
    %44 = tpu.matmul %41, %43, %cst_41 {dimension_numbers = #tpu.dot_dimension_numbers<[1], [0], [0], [1], [0, 0, 1, 1], [], []>} : vector<72x32xf32>, vector<32x128xf32>, vector<72x128xf32> -> vector<72x128xf32>
    %45 = arith.addf %40, %44 : vector<72x128xf32>
    %c0_i32 = arith.constant 0 : i32
    %46 = arith.cmpi eq, %arg1, %c0_i32 : i32
    %c0_i32_42 = arith.constant 0 : i32
    %47 = arith.cmpi eq, %arg2, %c0_i32_42 : i32
    %48 = arith.andi %46, %47 : i1
    %49 = arith.extui %48 : i1 to i32
    %c0_i32_43 = arith.constant 0 : i32
    %50 = arith.cmpi ne, %49, %c0_i32_43 : i32
    scf.if %50 {
      %cst_50 = arith.constant 0.000000e+00 : f32
      %62 = vector.broadcast %cst_50 : f32 to vector<1x128xf32>
      %c0_51 = arith.constant 0 : index
      %c0_52 = arith.constant 0 : index
      %63 = vector.load %arg11[%c0_51, %c0_52] : memref<1x128xf32, #tpu.memory_space<vmem>>, vector<1x128xf32>
      tpu.vector_store %arg11[%c0_51, %c0_52], %62 {strides = array<i32>} : memref<1x128xf32, #tpu.memory_space<vmem>>, vector<1x128xf32>,
      %cst_53 = arith.constant 0.000000e+00 : f32
      %64 = vector.broadcast %cst_53 : f32 to vector<1x128xf32>
      %c0_54 = arith.constant 0 : index
      %c0_55 = arith.constant 0 : index
      %65 = vector.load %arg12[%c0_54, %c0_55] : memref<1x128xf32, #tpu.memory_space<vmem>>, vector<1x128xf32>
      tpu.vector_store %arg12[%c0_54, %c0_55], %64 {strides = array<i32>} : memref<1x128xf32, #tpu.memory_space<vmem>>, vector<1x128xf32>,
    } else {
    }
    %c0_i32_44 = arith.constant 0 : i32
    %51 = arith.cmpi eq, %arg1, %c0_i32_44 : i32
    %52 = arith.extui %51 : i1 to i32
    %c0_i32_45 = arith.constant 0 : i32
    %53 = arith.cmpi ne, %52, %c0_i32_45 : i32
    scf.if %53 {
      %c0_50 = arith.constant 0 : index
      %c0_51 = arith.constant 0 : index
      %62 = vector.load %arg9[%c0_50, %c0_51] : memref<72x1xf32, #tpu.memory_space<vmem>>, vector<72x1xf32>
      %63 = vector.broadcast %62 : vector<72x1xf32> to vector<72x128xf32>
      %64 = arith.mulf %45, %63 : vector<72x128xf32>
      %c0_52 = arith.constant 0 : index
      %c0_53 = arith.constant 0 : index
      %65 = vector.load %arg11[%c0_52, %c0_53] : memref<1x128xf32, #tpu.memory_space<vmem>>, vector<1x128xf32>
      %cst_54 = arith.constant dense<0.000000e+00> : vector<128xf32>
      %66 = vector.multi_reduction <add>, %64, %cst_54 [0] : vector<72x128xf32> to vector<128xf32>
      %67 = vector.shape_cast %66 : vector<128xf32> to vector<1x128xf32>
      %68 = arith.addf %65, %67 : vector<1x128xf32>
      %c0_55 = arith.constant 0 : index
      %c0_56 = arith.constant 0 : index
      %69 = vector.load %arg11[%c0_55, %c0_56] : memref<1x128xf32, #tpu.memory_space<vmem>>, vector<1x128xf32>
      tpu.vector_store %arg11[%c0_55, %c0_56], %68 {strides = array<i32>} : memref<1x128xf32, #tpu.memory_space<vmem>>, vector<1x128xf32>,
      %c0_57 = arith.constant 0 : index
      %c0_58 = arith.constant 0 : index
      %70 = vector.load %arg12[%c0_57, %c0_58] : memref<1x128xf32, #tpu.memory_space<vmem>>, vector<1x128xf32>
      %71 = arith.mulf %64, %45 : vector<72x128xf32>
      %cst_59 = arith.constant dense<0.000000e+00> : vector<128xf32>
      %72 = vector.multi_reduction <add>, %71, %cst_59 [0] : vector<72x128xf32> to vector<128xf32>
      %73 = vector.shape_cast %72 : vector<128xf32> to vector<1x128xf32>
      %74 = arith.addf %70, %73 : vector<1x128xf32>
      %c0_60 = arith.constant 0 : index
      %c0_61 = arith.constant 0 : index
      %75 = vector.load %arg12[%c0_60, %c0_61] : memref<1x128xf32, #tpu.memory_space<vmem>>, vector<1x128xf32>
      tpu.vector_store %arg12[%c0_60, %c0_61], %74 {strides = array<i32>} : memref<1x128xf32, #tpu.memory_space<vmem>>, vector<1x128xf32>,
    } else {
    }
    %c1_i32 = arith.constant 1 : i32
    %54 = arith.cmpi eq, %arg1, %c1_i32 : i32
    %c0_i32_46 = arith.constant 0 : i32
    %55 = arith.cmpi eq, %arg2, %c0_i32_46 : i32
    %56 = arith.andi %54, %55 : i1
    %57 = arith.extui %56 : i1 to i32
    %c0_i32_47 = arith.constant 0 : i32
    %58 = arith.cmpi ne, %57, %c0_i32_47 : i32
    scf.if %58 {
      %c0_50 = arith.constant 0 : index
      %c0_51 = arith.constant 0 : index
      %62 = vector.load %arg11[%c0_50, %c0_51] : memref<1x128xf32, #tpu.memory_space<vmem>>, vector<1x128xf32>
      %c0_52 = arith.constant 0 : index
      %c0_53 = arith.constant 0 : index
      %63 = vector.load %arg7[%c0_52, %c0_53] : memref<128x128xf32, #tpu.memory_space<vmem>>, vector<128x128xf32>
      %cst_54 = arith.constant dense<0.000000e+00> : vector<1x128xf32>
      %64 = tpu.matmul %62, %63, %cst_54 {dimension_numbers = #tpu.dot_dimension_numbers<[1], [0], [0], [1], [0, 0, 1, 1], [], []>} : vector<1x128xf32>, vector<128x128xf32>, vector<1x128xf32> -> vector<1x128xf32>
      %c0_55 = arith.constant 0 : index
      %c0_56 = arith.constant 0 : index
      %65 = vector.load %arg12[%c0_55, %c0_56] : memref<1x128xf32, #tpu.memory_space<vmem>>, vector<1x128xf32>
      %c0_57 = arith.constant 0 : index
      %c0_58 = arith.constant 0 : index
      %66 = vector.load %arg7[%c0_57, %c0_58] : memref<128x128xf32, #tpu.memory_space<vmem>>, vector<128x128xf32>
      %cst_59 = arith.constant dense<0.000000e+00> : vector<1x128xf32>
      %67 = tpu.matmul %65, %66, %cst_59 {dimension_numbers = #tpu.dot_dimension_numbers<[1], [0], [0], [1], [0, 0, 1, 1], [], []>} : vector<1x128xf32>, vector<128x128xf32>, vector<1x128xf32> -> vector<1x128xf32>
      %c0_60 = arith.constant 0 : index
      %c0_61 = arith.constant 0 : index
      %68 = vector.load %arg8[%c0_60, %c0_61] : memref<128x128xf32, #tpu.memory_space<vmem>>, vector<128x128xf32>
      %cst_62 = arith.constant dense<0.000000e+00> : vector<1x128xf32>
      %69 = tpu.matmul %64, %68, %cst_62 {dimension_numbers = #tpu.dot_dimension_numbers<[1], [0], [0], [1], [0, 0, 1, 1], [], []>} : vector<1x128xf32>, vector<128x128xf32>, vector<1x128xf32> -> vector<1x128xf32>
      %c0_63 = arith.constant 0 : index
      %c0_64 = arith.constant 0 : index
      %70 = vector.load %arg8[%c0_63, %c0_64] : memref<128x128xf32, #tpu.memory_space<vmem>>, vector<128x128xf32>
      %cst_65 = arith.constant dense<0.000000e+00> : vector<1x128xf32>
      %71 = tpu.matmul %67, %70, %cst_65 {dimension_numbers = #tpu.dot_dimension_numbers<[1], [0], [0], [1], [0, 0, 1, 1], [], []>} : vector<1x128xf32>, vector<128x128xf32>, vector<1x128xf32> -> vector<1x128xf32>
      %72 = arith.mulf %69, %69 : vector<1x128xf32>
      %73 = arith.subf %71, %72 : vector<1x128xf32>
      %cst_66 = arith.constant 0.000000e+00 : f32
      %74 = vector.broadcast %cst_66 : f32 to vector<1x128xf32>
      %75 = arith.maximumf %73, %74 : vector<1x128xf32>
      %cst_67 = arith.constant 9.99999974E-6 : f32
      %76 = vector.broadcast %cst_67 : f32 to vector<1x128xf32>
      %77 = arith.addf %75, %76 : vector<1x128xf32>
      %78 = math.rsqrt %77 : vector<1x128xf32>
      %c0_68 = arith.constant 0 : index
      %c0_69 = arith.constant 0 : index
      %79 = vector.load %arg5[%c0_68, %c0_69] : memref<1x128xf32, #tpu.memory_space<vmem>>, vector<1x128xf32>
      %80 = arith.mulf %78, %79 : vector<1x128xf32>
      %c0_70 = arith.constant 0 : index
      %c0_71 = arith.constant 0 : index
      %81 = vector.load %arg13[%c0_70, %c0_71] : memref<1x128xf32, #tpu.memory_space<vmem>>, vector<1x128xf32>
      tpu.vector_store %arg13[%c0_70, %c0_71], %80 {strides = array<i32>} : memref<1x128xf32, #tpu.memory_space<vmem>>, vector<1x128xf32>,
      %c0_72 = arith.constant 0 : index
      %c0_73 = arith.constant 0 : index
      %82 = vector.load %arg6[%c0_72, %c0_73] : memref<1x128xf32, #tpu.memory_space<vmem>>, vector<1x128xf32>
      %83 = arith.mulf %69, %78 : vector<1x128xf32>
      %c0_74 = arith.constant 0 : index
      %c0_75 = arith.constant 0 : index
      %84 = vector.load %arg5[%c0_74, %c0_75] : memref<1x128xf32, #tpu.memory_space<vmem>>, vector<1x128xf32>
      %85 = arith.mulf %83, %84 : vector<1x128xf32>
      %86 = arith.subf %82, %85 : vector<1x128xf32>
      %c0_76 = arith.constant 0 : index
      %c0_77 = arith.constant 0 : index
      %87 = vector.load %arg14[%c0_76, %c0_77] : memref<1x128xf32, #tpu.memory_space<vmem>>, vector<1x128xf32>
      tpu.vector_store %arg14[%c0_76, %c0_77], %86 {strides = array<i32>} : memref<1x128xf32, #tpu.memory_space<vmem>>, vector<1x128xf32>,
    } else {
    }
    %c1_i32_48 = arith.constant 1 : i32
    %59 = arith.cmpi eq, %arg1, %c1_i32_48 : i32
    %60 = arith.extui %59 : i1 to i32
    %c0_i32_49 = arith.constant 0 : i32
    %61 = arith.cmpi ne, %60, %c0_i32_49 : i32
    scf.if %61 {
      %c0_50 = arith.constant 0 : index
      %c0_51 = arith.constant 0 : index
      %62 = vector.load %arg13[%c0_50, %c0_51] : memref<1x128xf32, #tpu.memory_space<vmem>>, vector<1x128xf32>
      %63 = vector.broadcast %62 : vector<1x128xf32> to vector<72x128xf32>
      %64 = arith.mulf %45, %63 : vector<72x128xf32>
      %c0_52 = arith.constant 0 : index
      %c0_53 = arith.constant 0 : index
      %65 = vector.load %arg14[%c0_52, %c0_53] : memref<1x128xf32, #tpu.memory_space<vmem>>, vector<1x128xf32>
      %66 = vector.broadcast %65 : vector<1x128xf32> to vector<72x128xf32>
      %67 = arith.addf %64, %66 : vector<72x128xf32>
      %cst_54 = arith.constant 0.000000e+00 : f32
      %68 = vector.broadcast %cst_54 : f32 to vector<72x128xf32>
      %69 = arith.maximumf %67, %68 : vector<72x128xf32>
      %c0_55 = arith.constant 0 : index
      %c0_56 = arith.constant 0 : index
      %70 = vector.load %arg10[%c0_55, %c0_56] : memref<72x128xf32, #tpu.memory_space<vmem>>, vector<72x128xf32>
      tpu.vector_store %arg10[%c0_55, %c0_56], %69 {strides = array<i32>} : memref<72x128xf32, #tpu.memory_space<vmem>>, vector<72x128xf32>,
    } else {
    }
    return
  }
  func.func @transform_0(%arg0: i32, %arg1: i32, %arg2: i32) -> (i32, i32) {
    %c0_i32 = arith.constant 0 : i32
    %c0_i32_0 = arith.constant 0 : i32
    return %arg2, %c0_i32 : i32, i32
  }
  func.func @transform_1(%arg0: i32, %arg1: i32, %arg2: i32) -> (i32, i32, i32) {
    %c0_i32 = arith.constant 0 : i32
    %c0_i32_0 = arith.constant 0 : i32
    %c0_i32_1 = arith.constant 0 : i32
    return %c0_i32, %c0_i32_0, %arg0 : i32, i32, i32
  }
  func.func @transform_2(%arg0: i32, %arg1: i32, %arg2: i32) -> (i32, i32) {
    %c0_i32 = arith.constant 0 : i32
    %c0_i32_0 = arith.constant 0 : i32
    return %c0_i32, %arg0 : i32, i32
  }
  func.func @transform_3(%arg0: i32, %arg1: i32, %arg2: i32) -> (i32, i32) {
    %c0_i32 = arith.constant 0 : i32
    %c0_i32_0 = arith.constant 0 : i32
    return %c0_i32, %arg0 : i32, i32
  }
  func.func @transform_4(%arg0: i32, %arg1: i32, %arg2: i32) -> (i32, i32) {
    %c0_i32 = arith.constant 0 : i32
    %c0_i32_0 = arith.constant 0 : i32
    %c0_i32_1 = arith.constant 0 : i32
    return %c0_i32, %c0_i32_0 : i32, i32
  }
  func.func @transform_5(%arg0: i32, %arg1: i32, %arg2: i32) -> (i32, i32) {
    %c0_i32 = arith.constant 0 : i32
    %c0_i32_0 = arith.constant 0 : i32
    %c0_i32_1 = arith.constant 0 : i32
    return %c0_i32, %c0_i32_0 : i32, i32
  }
  func.func @transform_6(%arg0: i32, %arg1: i32, %arg2: i32) -> (i32, i32) {
    %c0_i32 = arith.constant 0 : i32
    %c0_i32_0 = arith.constant 0 : i32
    return %arg2, %c0_i32 : i32, i32
  }
  func.func @transform_7(%arg0: i32, %arg1: i32, %arg2: i32) -> (i32, i32) {
    %0 = arith.muli %arg2, %arg1 : i32
    %c0_i32 = arith.constant 0 : i32
    return %0, %arg0 : i32, i32
  }
}

module attributes {stable_mosaic.version = 11 : i64} {
  func.func @_convt_bn_relu_kernel(%arg0: i32, %arg1: i32, %arg2: i32, %arg3: memref<224x16xf32, #tpu.memory_space<vmem>>, %arg4: memref<9x16x128xf32, #tpu.memory_space<vmem>>, %arg5: memref<1x128xf32, #tpu.memory_space<vmem>>, %arg6: memref<1x128xf32, #tpu.memory_space<vmem>>, %arg7: memref<128x128xf32, #tpu.memory_space<vmem>>, %arg8: memref<128x128xf32, #tpu.memory_space<vmem>>, %arg9: memref<200x1xf32, #tpu.memory_space<vmem>>, %arg10: memref<200x128xf32, #tpu.memory_space<vmem>>, %arg11: memref<1x128xf32, #tpu.memory_space<vmem>>, %arg12: memref<1x128xf32, #tpu.memory_space<vmem>>, %arg13: memref<1x128xf32, #tpu.memory_space<vmem>>, %arg14: memref<1x128xf32, #tpu.memory_space<vmem>>) attributes {dimension_semantics = [#tpu.dimension_semantics<parallel>, #tpu.dimension_semantics<arbitrary>, #tpu.dimension_semantics<arbitrary>], iteration_bounds = array<i64: 1, 2, 1>, scalar_prefetch = 0 : i64, scratch_operands = 4 : i64, tpu.core_type = #tpu.core_type<tc>, window_params = [{transform_indices = @transform_0, window_bounds = array<i64: 224, 16>}, {transform_indices = @transform_1, window_bounds = array<i64: 9, 16, 128>}, {transform_indices = @transform_2, window_bounds = array<i64: 1, 128>}, {transform_indices = @transform_3, window_bounds = array<i64: 1, 128>}, {pipeline_mode = #tpu.pipeline_mode<synchronous>, transform_indices = @transform_4, window_bounds = array<i64: 128, 128>}, {pipeline_mode = #tpu.pipeline_mode<synchronous>, transform_indices = @transform_5, window_bounds = array<i64: 128, 128>}, {transform_indices = @transform_6, window_bounds = array<i64: 200, 1>}, {transform_indices = @transform_7, window_bounds = array<i64: 200, 128>}]} {
    %cst = arith.constant 0.000000e+00 : f32
    %0 = vector.broadcast %cst : f32 to vector<200x128xf32>
    %c0 = arith.constant 0 : index
    %c0_0 = arith.constant 0 : index
    %1 = vector.load %arg3[%c0, %c0_0] : memref<224x16xf32, #tpu.memory_space<vmem>>, vector<200x16xf32>
    %c0_1 = arith.constant 0 : index
    %c0_2 = arith.constant 0 : index
    %c0_3 = arith.constant 0 : index
    %2 = vector.load %arg4[%c0_1, %c0_2, %c0_3] : memref<9x16x128xf32, #tpu.memory_space<vmem>>, vector<1x16x128xf32>
    %3 = vector.shape_cast %2 : vector<1x16x128xf32> to vector<16x128xf32>
    %cst_4 = arith.constant dense<0.000000e+00> : vector<200x128xf32>
    %4 = tpu.matmul %1, %3, %cst_4 {dimension_numbers = #tpu.dot_dimension_numbers<[1], [0], [0], [1], [0, 0, 1, 1], [], []>} : vector<200x16xf32>, vector<16x128xf32>, vector<200x128xf32> -> vector<200x128xf32>
    %5 = arith.addf %0, %4 : vector<200x128xf32>
    %c1 = arith.constant 1 : index
    %c0_5 = arith.constant 0 : index
    %6 = vector.load %arg3[%c1, %c0_5] : memref<224x16xf32, #tpu.memory_space<vmem>>, vector<200x16xf32>
    %c1_6 = arith.constant 1 : index
    %c0_7 = arith.constant 0 : index
    %c0_8 = arith.constant 0 : index
    %7 = vector.load %arg4[%c1_6, %c0_7, %c0_8] : memref<9x16x128xf32, #tpu.memory_space<vmem>>, vector<1x16x128xf32>
    %8 = vector.shape_cast %7 : vector<1x16x128xf32> to vector<16x128xf32>
    %cst_9 = arith.constant dense<0.000000e+00> : vector<200x128xf32>
    %9 = tpu.matmul %6, %8, %cst_9 {dimension_numbers = #tpu.dot_dimension_numbers<[1], [0], [0], [1], [0, 0, 1, 1], [], []>} : vector<200x16xf32>, vector<16x128xf32>, vector<200x128xf32> -> vector<200x128xf32>
    %10 = arith.addf %5, %9 : vector<200x128xf32>
    %c2 = arith.constant 2 : index
    %c0_10 = arith.constant 0 : index
    %11 = vector.load %arg3[%c2, %c0_10] : memref<224x16xf32, #tpu.memory_space<vmem>>, vector<200x16xf32>
    %c2_11 = arith.constant 2 : index
    %c0_12 = arith.constant 0 : index
    %c0_13 = arith.constant 0 : index
    %12 = vector.load %arg4[%c2_11, %c0_12, %c0_13] : memref<9x16x128xf32, #tpu.memory_space<vmem>>, vector<1x16x128xf32>
    %13 = vector.shape_cast %12 : vector<1x16x128xf32> to vector<16x128xf32>
    %cst_14 = arith.constant dense<0.000000e+00> : vector<200x128xf32>
    %14 = tpu.matmul %11, %13, %cst_14 {dimension_numbers = #tpu.dot_dimension_numbers<[1], [0], [0], [1], [0, 0, 1, 1], [], []>} : vector<200x16xf32>, vector<16x128xf32>, vector<200x128xf32> -> vector<200x128xf32>
    %15 = arith.addf %10, %14 : vector<200x128xf32>
    %c10 = arith.constant 10 : index
    %c0_15 = arith.constant 0 : index
    %16 = vector.load %arg3[%c10, %c0_15] : memref<224x16xf32, #tpu.memory_space<vmem>>, vector<200x16xf32>
    %c3 = arith.constant 3 : index
    %c0_16 = arith.constant 0 : index
    %c0_17 = arith.constant 0 : index
    %17 = vector.load %arg4[%c3, %c0_16, %c0_17] : memref<9x16x128xf32, #tpu.memory_space<vmem>>, vector<1x16x128xf32>
    %18 = vector.shape_cast %17 : vector<1x16x128xf32> to vector<16x128xf32>
    %cst_18 = arith.constant dense<0.000000e+00> : vector<200x128xf32>
    %19 = tpu.matmul %16, %18, %cst_18 {dimension_numbers = #tpu.dot_dimension_numbers<[1], [0], [0], [1], [0, 0, 1, 1], [], []>} : vector<200x16xf32>, vector<16x128xf32>, vector<200x128xf32> -> vector<200x128xf32>
    %20 = arith.addf %15, %19 : vector<200x128xf32>
    %c11 = arith.constant 11 : index
    %c0_19 = arith.constant 0 : index
    %21 = vector.load %arg3[%c11, %c0_19] : memref<224x16xf32, #tpu.memory_space<vmem>>, vector<200x16xf32>
    %c4 = arith.constant 4 : index
    %c0_20 = arith.constant 0 : index
    %c0_21 = arith.constant 0 : index
    %22 = vector.load %arg4[%c4, %c0_20, %c0_21] : memref<9x16x128xf32, #tpu.memory_space<vmem>>, vector<1x16x128xf32>
    %23 = vector.shape_cast %22 : vector<1x16x128xf32> to vector<16x128xf32>
    %cst_22 = arith.constant dense<0.000000e+00> : vector<200x128xf32>
    %24 = tpu.matmul %21, %23, %cst_22 {dimension_numbers = #tpu.dot_dimension_numbers<[1], [0], [0], [1], [0, 0, 1, 1], [], []>} : vector<200x16xf32>, vector<16x128xf32>, vector<200x128xf32> -> vector<200x128xf32>
    %25 = arith.addf %20, %24 : vector<200x128xf32>
    %c12 = arith.constant 12 : index
    %c0_23 = arith.constant 0 : index
    %26 = vector.load %arg3[%c12, %c0_23] : memref<224x16xf32, #tpu.memory_space<vmem>>, vector<200x16xf32>
    %c5 = arith.constant 5 : index
    %c0_24 = arith.constant 0 : index
    %c0_25 = arith.constant 0 : index
    %27 = vector.load %arg4[%c5, %c0_24, %c0_25] : memref<9x16x128xf32, #tpu.memory_space<vmem>>, vector<1x16x128xf32>
    %28 = vector.shape_cast %27 : vector<1x16x128xf32> to vector<16x128xf32>
    %cst_26 = arith.constant dense<0.000000e+00> : vector<200x128xf32>
    %29 = tpu.matmul %26, %28, %cst_26 {dimension_numbers = #tpu.dot_dimension_numbers<[1], [0], [0], [1], [0, 0, 1, 1], [], []>} : vector<200x16xf32>, vector<16x128xf32>, vector<200x128xf32> -> vector<200x128xf32>
    %30 = arith.addf %25, %29 : vector<200x128xf32>
    %c20 = arith.constant 20 : index
    %c0_27 = arith.constant 0 : index
    %31 = vector.load %arg3[%c20, %c0_27] : memref<224x16xf32, #tpu.memory_space<vmem>>, vector<200x16xf32>
    %c6 = arith.constant 6 : index
    %c0_28 = arith.constant 0 : index
    %c0_29 = arith.constant 0 : index
    %32 = vector.load %arg4[%c6, %c0_28, %c0_29] : memref<9x16x128xf32, #tpu.memory_space<vmem>>, vector<1x16x128xf32>
    %33 = vector.shape_cast %32 : vector<1x16x128xf32> to vector<16x128xf32>
    %cst_30 = arith.constant dense<0.000000e+00> : vector<200x128xf32>
    %34 = tpu.matmul %31, %33, %cst_30 {dimension_numbers = #tpu.dot_dimension_numbers<[1], [0], [0], [1], [0, 0, 1, 1], [], []>} : vector<200x16xf32>, vector<16x128xf32>, vector<200x128xf32> -> vector<200x128xf32>
    %35 = arith.addf %30, %34 : vector<200x128xf32>
    %c21 = arith.constant 21 : index
    %c0_31 = arith.constant 0 : index
    %36 = vector.load %arg3[%c21, %c0_31] : memref<224x16xf32, #tpu.memory_space<vmem>>, vector<200x16xf32>
    %c7 = arith.constant 7 : index
    %c0_32 = arith.constant 0 : index
    %c0_33 = arith.constant 0 : index
    %37 = vector.load %arg4[%c7, %c0_32, %c0_33] : memref<9x16x128xf32, #tpu.memory_space<vmem>>, vector<1x16x128xf32>
    %38 = vector.shape_cast %37 : vector<1x16x128xf32> to vector<16x128xf32>
    %cst_34 = arith.constant dense<0.000000e+00> : vector<200x128xf32>
    %39 = tpu.matmul %36, %38, %cst_34 {dimension_numbers = #tpu.dot_dimension_numbers<[1], [0], [0], [1], [0, 0, 1, 1], [], []>} : vector<200x16xf32>, vector<16x128xf32>, vector<200x128xf32> -> vector<200x128xf32>
    %40 = arith.addf %35, %39 : vector<200x128xf32>
    %c22 = arith.constant 22 : index
    %c0_35 = arith.constant 0 : index
    %41 = vector.load %arg3[%c22, %c0_35] : memref<224x16xf32, #tpu.memory_space<vmem>>, vector<200x16xf32>
    %c8 = arith.constant 8 : index
    %c0_36 = arith.constant 0 : index
    %c0_37 = arith.constant 0 : index
    %42 = vector.load %arg4[%c8, %c0_36, %c0_37] : memref<9x16x128xf32, #tpu.memory_space<vmem>>, vector<1x16x128xf32>
    %43 = vector.shape_cast %42 : vector<1x16x128xf32> to vector<16x128xf32>
    %cst_38 = arith.constant dense<0.000000e+00> : vector<200x128xf32>
    %44 = tpu.matmul %41, %43, %cst_38 {dimension_numbers = #tpu.dot_dimension_numbers<[1], [0], [0], [1], [0, 0, 1, 1], [], []>} : vector<200x16xf32>, vector<16x128xf32>, vector<200x128xf32> -> vector<200x128xf32>
    %45 = arith.addf %40, %44 : vector<200x128xf32>
    %c0_i32 = arith.constant 0 : i32
    %46 = arith.cmpi eq, %arg1, %c0_i32 : i32
    %c0_i32_39 = arith.constant 0 : i32
    %47 = arith.cmpi eq, %arg2, %c0_i32_39 : i32
    %48 = arith.andi %46, %47 : i1
    %49 = arith.extui %48 : i1 to i32
    %c0_i32_40 = arith.constant 0 : i32
    %50 = arith.cmpi ne, %49, %c0_i32_40 : i32
    scf.if %50 {
      %cst_47 = arith.constant 0.000000e+00 : f32
      %62 = vector.broadcast %cst_47 : f32 to vector<1x128xf32>
      %c0_48 = arith.constant 0 : index
      %c0_49 = arith.constant 0 : index
      %63 = vector.load %arg11[%c0_48, %c0_49] : memref<1x128xf32, #tpu.memory_space<vmem>>, vector<1x128xf32>
      tpu.vector_store %arg11[%c0_48, %c0_49], %62 {strides = array<i32>} : memref<1x128xf32, #tpu.memory_space<vmem>>, vector<1x128xf32>,
      %cst_50 = arith.constant 0.000000e+00 : f32
      %64 = vector.broadcast %cst_50 : f32 to vector<1x128xf32>
      %c0_51 = arith.constant 0 : index
      %c0_52 = arith.constant 0 : index
      %65 = vector.load %arg12[%c0_51, %c0_52] : memref<1x128xf32, #tpu.memory_space<vmem>>, vector<1x128xf32>
      tpu.vector_store %arg12[%c0_51, %c0_52], %64 {strides = array<i32>} : memref<1x128xf32, #tpu.memory_space<vmem>>, vector<1x128xf32>,
    } else {
    }
    %c0_i32_41 = arith.constant 0 : i32
    %51 = arith.cmpi eq, %arg1, %c0_i32_41 : i32
    %52 = arith.extui %51 : i1 to i32
    %c0_i32_42 = arith.constant 0 : i32
    %53 = arith.cmpi ne, %52, %c0_i32_42 : i32
    scf.if %53 {
      %c0_47 = arith.constant 0 : index
      %c0_48 = arith.constant 0 : index
      %62 = vector.load %arg9[%c0_47, %c0_48] : memref<200x1xf32, #tpu.memory_space<vmem>>, vector<200x1xf32>
      %63 = vector.broadcast %62 : vector<200x1xf32> to vector<200x128xf32>
      %64 = arith.mulf %45, %63 : vector<200x128xf32>
      %c0_49 = arith.constant 0 : index
      %c0_50 = arith.constant 0 : index
      %65 = vector.load %arg11[%c0_49, %c0_50] : memref<1x128xf32, #tpu.memory_space<vmem>>, vector<1x128xf32>
      %cst_51 = arith.constant dense<0.000000e+00> : vector<128xf32>
      %66 = vector.multi_reduction <add>, %64, %cst_51 [0] : vector<200x128xf32> to vector<128xf32>
      %67 = vector.shape_cast %66 : vector<128xf32> to vector<1x128xf32>
      %68 = arith.addf %65, %67 : vector<1x128xf32>
      %c0_52 = arith.constant 0 : index
      %c0_53 = arith.constant 0 : index
      %69 = vector.load %arg11[%c0_52, %c0_53] : memref<1x128xf32, #tpu.memory_space<vmem>>, vector<1x128xf32>
      tpu.vector_store %arg11[%c0_52, %c0_53], %68 {strides = array<i32>} : memref<1x128xf32, #tpu.memory_space<vmem>>, vector<1x128xf32>,
      %c0_54 = arith.constant 0 : index
      %c0_55 = arith.constant 0 : index
      %70 = vector.load %arg12[%c0_54, %c0_55] : memref<1x128xf32, #tpu.memory_space<vmem>>, vector<1x128xf32>
      %71 = arith.mulf %64, %45 : vector<200x128xf32>
      %cst_56 = arith.constant dense<0.000000e+00> : vector<128xf32>
      %72 = vector.multi_reduction <add>, %71, %cst_56 [0] : vector<200x128xf32> to vector<128xf32>
      %73 = vector.shape_cast %72 : vector<128xf32> to vector<1x128xf32>
      %74 = arith.addf %70, %73 : vector<1x128xf32>
      %c0_57 = arith.constant 0 : index
      %c0_58 = arith.constant 0 : index
      %75 = vector.load %arg12[%c0_57, %c0_58] : memref<1x128xf32, #tpu.memory_space<vmem>>, vector<1x128xf32>
      tpu.vector_store %arg12[%c0_57, %c0_58], %74 {strides = array<i32>} : memref<1x128xf32, #tpu.memory_space<vmem>>, vector<1x128xf32>,
    } else {
    }
    %c1_i32 = arith.constant 1 : i32
    %54 = arith.cmpi eq, %arg1, %c1_i32 : i32
    %c0_i32_43 = arith.constant 0 : i32
    %55 = arith.cmpi eq, %arg2, %c0_i32_43 : i32
    %56 = arith.andi %54, %55 : i1
    %57 = arith.extui %56 : i1 to i32
    %c0_i32_44 = arith.constant 0 : i32
    %58 = arith.cmpi ne, %57, %c0_i32_44 : i32
    scf.if %58 {
      %c0_47 = arith.constant 0 : index
      %c0_48 = arith.constant 0 : index
      %62 = vector.load %arg11[%c0_47, %c0_48] : memref<1x128xf32, #tpu.memory_space<vmem>>, vector<1x128xf32>
      %c0_49 = arith.constant 0 : index
      %c0_50 = arith.constant 0 : index
      %63 = vector.load %arg7[%c0_49, %c0_50] : memref<128x128xf32, #tpu.memory_space<vmem>>, vector<128x128xf32>
      %cst_51 = arith.constant dense<0.000000e+00> : vector<1x128xf32>
      %64 = tpu.matmul %62, %63, %cst_51 {dimension_numbers = #tpu.dot_dimension_numbers<[1], [0], [0], [1], [0, 0, 1, 1], [], []>} : vector<1x128xf32>, vector<128x128xf32>, vector<1x128xf32> -> vector<1x128xf32>
      %c0_52 = arith.constant 0 : index
      %c0_53 = arith.constant 0 : index
      %65 = vector.load %arg12[%c0_52, %c0_53] : memref<1x128xf32, #tpu.memory_space<vmem>>, vector<1x128xf32>
      %c0_54 = arith.constant 0 : index
      %c0_55 = arith.constant 0 : index
      %66 = vector.load %arg7[%c0_54, %c0_55] : memref<128x128xf32, #tpu.memory_space<vmem>>, vector<128x128xf32>
      %cst_56 = arith.constant dense<0.000000e+00> : vector<1x128xf32>
      %67 = tpu.matmul %65, %66, %cst_56 {dimension_numbers = #tpu.dot_dimension_numbers<[1], [0], [0], [1], [0, 0, 1, 1], [], []>} : vector<1x128xf32>, vector<128x128xf32>, vector<1x128xf32> -> vector<1x128xf32>
      %c0_57 = arith.constant 0 : index
      %c0_58 = arith.constant 0 : index
      %68 = vector.load %arg8[%c0_57, %c0_58] : memref<128x128xf32, #tpu.memory_space<vmem>>, vector<128x128xf32>
      %cst_59 = arith.constant dense<0.000000e+00> : vector<1x128xf32>
      %69 = tpu.matmul %64, %68, %cst_59 {dimension_numbers = #tpu.dot_dimension_numbers<[1], [0], [0], [1], [0, 0, 1, 1], [], []>} : vector<1x128xf32>, vector<128x128xf32>, vector<1x128xf32> -> vector<1x128xf32>
      %c0_60 = arith.constant 0 : index
      %c0_61 = arith.constant 0 : index
      %70 = vector.load %arg8[%c0_60, %c0_61] : memref<128x128xf32, #tpu.memory_space<vmem>>, vector<128x128xf32>
      %cst_62 = arith.constant dense<0.000000e+00> : vector<1x128xf32>
      %71 = tpu.matmul %67, %70, %cst_62 {dimension_numbers = #tpu.dot_dimension_numbers<[1], [0], [0], [1], [0, 0, 1, 1], [], []>} : vector<1x128xf32>, vector<128x128xf32>, vector<1x128xf32> -> vector<1x128xf32>
      %72 = arith.mulf %69, %69 : vector<1x128xf32>
      %73 = arith.subf %71, %72 : vector<1x128xf32>
      %cst_63 = arith.constant 0.000000e+00 : f32
      %74 = vector.broadcast %cst_63 : f32 to vector<1x128xf32>
      %75 = arith.maximumf %73, %74 : vector<1x128xf32>
      %cst_64 = arith.constant 9.99999974E-6 : f32
      %76 = vector.broadcast %cst_64 : f32 to vector<1x128xf32>
      %77 = arith.addf %75, %76 : vector<1x128xf32>
      %78 = math.rsqrt %77 : vector<1x128xf32>
      %c0_65 = arith.constant 0 : index
      %c0_66 = arith.constant 0 : index
      %79 = vector.load %arg5[%c0_65, %c0_66] : memref<1x128xf32, #tpu.memory_space<vmem>>, vector<1x128xf32>
      %80 = arith.mulf %78, %79 : vector<1x128xf32>
      %c0_67 = arith.constant 0 : index
      %c0_68 = arith.constant 0 : index
      %81 = vector.load %arg13[%c0_67, %c0_68] : memref<1x128xf32, #tpu.memory_space<vmem>>, vector<1x128xf32>
      tpu.vector_store %arg13[%c0_67, %c0_68], %80 {strides = array<i32>} : memref<1x128xf32, #tpu.memory_space<vmem>>, vector<1x128xf32>,
      %c0_69 = arith.constant 0 : index
      %c0_70 = arith.constant 0 : index
      %82 = vector.load %arg6[%c0_69, %c0_70] : memref<1x128xf32, #tpu.memory_space<vmem>>, vector<1x128xf32>
      %83 = arith.mulf %69, %78 : vector<1x128xf32>
      %c0_71 = arith.constant 0 : index
      %c0_72 = arith.constant 0 : index
      %84 = vector.load %arg5[%c0_71, %c0_72] : memref<1x128xf32, #tpu.memory_space<vmem>>, vector<1x128xf32>
      %85 = arith.mulf %83, %84 : vector<1x128xf32>
      %86 = arith.subf %82, %85 : vector<1x128xf32>
      %c0_73 = arith.constant 0 : index
      %c0_74 = arith.constant 0 : index
      %87 = vector.load %arg14[%c0_73, %c0_74] : memref<1x128xf32, #tpu.memory_space<vmem>>, vector<1x128xf32>
      tpu.vector_store %arg14[%c0_73, %c0_74], %86 {strides = array<i32>} : memref<1x128xf32, #tpu.memory_space<vmem>>, vector<1x128xf32>,
    } else {
    }
    %c1_i32_45 = arith.constant 1 : i32
    %59 = arith.cmpi eq, %arg1, %c1_i32_45 : i32
    %60 = arith.extui %59 : i1 to i32
    %c0_i32_46 = arith.constant 0 : i32
    %61 = arith.cmpi ne, %60, %c0_i32_46 : i32
    scf.if %61 {
      %c0_47 = arith.constant 0 : index
      %c0_48 = arith.constant 0 : index
      %62 = vector.load %arg13[%c0_47, %c0_48] : memref<1x128xf32, #tpu.memory_space<vmem>>, vector<1x128xf32>
      %63 = vector.broadcast %62 : vector<1x128xf32> to vector<200x128xf32>
      %64 = arith.mulf %45, %63 : vector<200x128xf32>
      %c0_49 = arith.constant 0 : index
      %c0_50 = arith.constant 0 : index
      %65 = vector.load %arg14[%c0_49, %c0_50] : memref<1x128xf32, #tpu.memory_space<vmem>>, vector<1x128xf32>
      %66 = vector.broadcast %65 : vector<1x128xf32> to vector<200x128xf32>
      %67 = arith.addf %64, %66 : vector<200x128xf32>
      %cst_51 = arith.constant 0.000000e+00 : f32
      %68 = vector.broadcast %cst_51 : f32 to vector<200x128xf32>
      %69 = arith.maximumf %67, %68 : vector<200x128xf32>
      %c0_52 = arith.constant 0 : index
      %c0_53 = arith.constant 0 : index
      %70 = vector.load %arg10[%c0_52, %c0_53] : memref<200x128xf32, #tpu.memory_space<vmem>>, vector<200x128xf32>
      tpu.vector_store %arg10[%c0_52, %c0_53], %69 {strides = array<i32>} : memref<200x128xf32, #tpu.memory_space<vmem>>, vector<200x128xf32>,
    } else {
    }
    return
  }
  func.func @transform_0(%arg0: i32, %arg1: i32, %arg2: i32) -> (i32, i32) {
    %c0_i32 = arith.constant 0 : i32
    %c0_i32_0 = arith.constant 0 : i32
    return %arg2, %c0_i32 : i32, i32
  }
  func.func @transform_1(%arg0: i32, %arg1: i32, %arg2: i32) -> (i32, i32, i32) {
    %c0_i32 = arith.constant 0 : i32
    %c0_i32_0 = arith.constant 0 : i32
    %c0_i32_1 = arith.constant 0 : i32
    return %c0_i32, %c0_i32_0, %arg0 : i32, i32, i32
  }
  func.func @transform_2(%arg0: i32, %arg1: i32, %arg2: i32) -> (i32, i32) {
    %c0_i32 = arith.constant 0 : i32
    %c0_i32_0 = arith.constant 0 : i32
    return %c0_i32, %arg0 : i32, i32
  }
  func.func @transform_3(%arg0: i32, %arg1: i32, %arg2: i32) -> (i32, i32) {
    %c0_i32 = arith.constant 0 : i32
    %c0_i32_0 = arith.constant 0 : i32
    return %c0_i32, %arg0 : i32, i32
  }
  func.func @transform_4(%arg0: i32, %arg1: i32, %arg2: i32) -> (i32, i32) {
    %c0_i32 = arith.constant 0 : i32
    %c0_i32_0 = arith.constant 0 : i32
    %c0_i32_1 = arith.constant 0 : i32
    return %c0_i32, %c0_i32_0 : i32, i32
  }
  func.func @transform_5(%arg0: i32, %arg1: i32, %arg2: i32) -> (i32, i32) {
    %c0_i32 = arith.constant 0 : i32
    %c0_i32_0 = arith.constant 0 : i32
    %c0_i32_1 = arith.constant 0 : i32
    return %c0_i32, %c0_i32_0 : i32, i32
  }
  func.func @transform_6(%arg0: i32, %arg1: i32, %arg2: i32) -> (i32, i32) {
    %c0_i32 = arith.constant 0 : i32
    %c0_i32_0 = arith.constant 0 : i32
    return %arg2, %c0_i32 : i32, i32
  }
  func.func @transform_7(%arg0: i32, %arg1: i32, %arg2: i32) -> (i32, i32) {
    %0 = arith.muli %arg2, %arg1 : i32
    %c0_i32 = arith.constant 0 : i32
    return %0, %arg0 : i32, i32
  }
}

module attributes {stable_mosaic.version = 11 : i64} {
  func.func @_convt_tanh_kernel(%arg0: i32, %arg1: memref<536x8xf32, #tpu.memory_space<vmem>>, %arg2: memref<4x8x128xf32, #tpu.memory_space<vmem>>, %arg3: memref<512x128xf32, #tpu.memory_space<vmem>>) attributes {dimension_semantics = [#tpu.dimension_semantics<parallel>], iteration_bounds = array<i64: 1>, scalar_prefetch = 0 : i64, scratch_operands = 0 : i64, tpu.core_type = #tpu.core_type<tc>, window_params = [{transform_indices = @transform_0, window_bounds = array<i64: 536, 8>}, {pipeline_mode = #tpu.pipeline_mode<synchronous>, transform_indices = @transform_1, window_bounds = array<i64: 4, 8, 128>}, {transform_indices = @transform_2, window_bounds = array<i64: 512, 128>}]} {
    %cst = arith.constant 0.000000e+00 : f32
    %0 = vector.broadcast %cst : f32 to vector<512x128xf32>
    %c0 = arith.constant 0 : index
    %c0_0 = arith.constant 0 : index
    %1 = vector.load %arg1[%c0, %c0_0] : memref<536x8xf32, #tpu.memory_space<vmem>>, vector<512x8xf32>
    %c0_1 = arith.constant 0 : index
    %c0_2 = arith.constant 0 : index
    %c0_3 = arith.constant 0 : index
    %2 = vector.load %arg2[%c0_1, %c0_2, %c0_3] : memref<4x8x128xf32, #tpu.memory_space<vmem>>, vector<1x8x128xf32>
    %3 = vector.shape_cast %2 : vector<1x8x128xf32> to vector<8x128xf32>
    %cst_4 = arith.constant dense<0.000000e+00> : vector<512x128xf32>
    %4 = tpu.matmul %1, %3, %cst_4 {dimension_numbers = #tpu.dot_dimension_numbers<[1], [0], [0], [1], [0, 0, 1, 1], [], []>} : vector<512x8xf32>, vector<8x128xf32>, vector<512x128xf32> -> vector<512x128xf32>
    %5 = arith.addf %0, %4 : vector<512x128xf32>
    %c1 = arith.constant 1 : index
    %c0_5 = arith.constant 0 : index
    %6 = vector.load %arg1[%c1, %c0_5] : memref<536x8xf32, #tpu.memory_space<vmem>>, vector<512x8xf32>
    %c1_6 = arith.constant 1 : index
    %c0_7 = arith.constant 0 : index
    %c0_8 = arith.constant 0 : index
    %7 = vector.load %arg2[%c1_6, %c0_7, %c0_8] : memref<4x8x128xf32, #tpu.memory_space<vmem>>, vector<1x8x128xf32>
    %8 = vector.shape_cast %7 : vector<1x8x128xf32> to vector<8x128xf32>
    %cst_9 = arith.constant dense<0.000000e+00> : vector<512x128xf32>
    %9 = tpu.matmul %6, %8, %cst_9 {dimension_numbers = #tpu.dot_dimension_numbers<[1], [0], [0], [1], [0, 0, 1, 1], [], []>} : vector<512x8xf32>, vector<8x128xf32>, vector<512x128xf32> -> vector<512x128xf32>
    %10 = arith.addf %5, %9 : vector<512x128xf32>
    %c16 = arith.constant 16 : index
    %c0_10 = arith.constant 0 : index
    %11 = vector.load %arg1[%c16, %c0_10] : memref<536x8xf32, #tpu.memory_space<vmem>>, vector<512x8xf32>
    %c2 = arith.constant 2 : index
    %c0_11 = arith.constant 0 : index
    %c0_12 = arith.constant 0 : index
    %12 = vector.load %arg2[%c2, %c0_11, %c0_12] : memref<4x8x128xf32, #tpu.memory_space<vmem>>, vector<1x8x128xf32>
    %13 = vector.shape_cast %12 : vector<1x8x128xf32> to vector<8x128xf32>
    %cst_13 = arith.constant dense<0.000000e+00> : vector<512x128xf32>
    %14 = tpu.matmul %11, %13, %cst_13 {dimension_numbers = #tpu.dot_dimension_numbers<[1], [0], [0], [1], [0, 0, 1, 1], [], []>} : vector<512x8xf32>, vector<8x128xf32>, vector<512x128xf32> -> vector<512x128xf32>
    %15 = arith.addf %10, %14 : vector<512x128xf32>
    %c17 = arith.constant 17 : index
    %c0_14 = arith.constant 0 : index
    %16 = vector.load %arg1[%c17, %c0_14] : memref<536x8xf32, #tpu.memory_space<vmem>>, vector<512x8xf32>
    %c3 = arith.constant 3 : index
    %c0_15 = arith.constant 0 : index
    %c0_16 = arith.constant 0 : index
    %17 = vector.load %arg2[%c3, %c0_15, %c0_16] : memref<4x8x128xf32, #tpu.memory_space<vmem>>, vector<1x8x128xf32>
    %18 = vector.shape_cast %17 : vector<1x8x128xf32> to vector<8x128xf32>
    %cst_17 = arith.constant dense<0.000000e+00> : vector<512x128xf32>
    %19 = tpu.matmul %16, %18, %cst_17 {dimension_numbers = #tpu.dot_dimension_numbers<[1], [0], [0], [1], [0, 0, 1, 1], [], []>} : vector<512x8xf32>, vector<8x128xf32>, vector<512x128xf32> -> vector<512x128xf32>
    %20 = arith.addf %15, %19 : vector<512x128xf32>
    %21 = math.tanh %20 : vector<512x128xf32>
    %c0_18 = arith.constant 0 : index
    %c0_19 = arith.constant 0 : index
    %22 = vector.load %arg3[%c0_18, %c0_19] : memref<512x128xf32, #tpu.memory_space<vmem>>, vector<512x128xf32>
    tpu.vector_store %arg3[%c0_18, %c0_19], %21 {strides = array<i32>} : memref<512x128xf32, #tpu.memory_space<vmem>>, vector<512x128xf32>,
    return
  }
  func.func @transform_0(%arg0: i32) -> (i32, i32) {
    %c0_i32 = arith.constant 0 : i32
    %c0_i32_0 = arith.constant 0 : i32
    return %arg0, %c0_i32 : i32, i32
  }
  func.func @transform_1(%arg0: i32) -> (i32, i32, i32) {
    %c0_i32 = arith.constant 0 : i32
    %c0_i32_0 = arith.constant 0 : i32
    %c0_i32_1 = arith.constant 0 : i32
    %c0_i32_2 = arith.constant 0 : i32
    return %c0_i32, %c0_i32_0, %c0_i32_1 : i32, i32, i32
  }
  func.func @transform_2(%arg0: i32) -> (i32, i32) {
    %c0_i32 = arith.constant 0 : i32
    %c0_i32_0 = arith.constant 0 : i32
    return %arg0, %c0_i32 : i32, i32
  }
}

</mosaic_0001>

<bundles_post_ra>
// kernel: dcgan_g_forward.3
= control target key start
LH: loop header
LB: loop body
LE: loop exit
PB: predicated region body
PF: predicated region fallthrough
CT: control target
= control target key end

     0   :  { %s3615_s24 = smov 0   ;;  %s3617_s25 = smov 0   ;;  %s4468_s0 = inlined_call_operand.vmem [shape: f32[88,32], index: 0, kind: input, shape index: {}]   ;;  %s4469_s1 = inlined_call_operand.vmem [shape: f32[9,32,128], index: 1, kind: input, shape index: {}]   ;;  %s4470_s2 = inlined_call_operand.vmem [shape: f32[1,128], index: 2, kind: input, shape index: {}]   ;;  %s4471_s3 = inlined_call_operand.vmem [shape: f32[1,128], index: 3, kind: input, shape index: {}]   ;;  %s4472_s4 = inlined_call_operand.vmem [shape: f32[128,128], index: 4, kind: input, shape index: {}]   ;;  %s4473_s5 = inlined_call_operand.vmem [shape: f32[128,128], index: 5, kind: input, shape index: {}]   ;;  %s4474_s6 = inlined_call_operand.vmem [shape: f32[72,1], index: 6, kind: input, shape index: {}]   ;;  %s4475_s7 = inlined_call_operand.vmem [shape: f32[72,128], index: 7, kind: output, shape index: {}]  }
   0x1   :  { %s3619_s26 = smov 0  }
   0x2 LB: > { %s32_s27 = sadd.s32 1, %s3561_s25  ;;  %p2452_p0 = scmp.ge.s32.totalorder %s3565_s26, 1  ;;  %s3565_s26 = sphi %s3619_s26, %s17_s26   ;;  %s3561_s25 = sphi %s3617_s25, %s4477_s25   ;;  %s3557_s24 = sphi %s3615_s24, %s4476_s24  }
   0x3   : > { %p34_p1 = scmp.ge.s32.totalorder %s32_s27, 2  ;;  %p297_p2 = scmp.lt.s32.totalorder %s3565_s26, 3 }
   0x5   : > { %s4479_s27 = smov (%p34_p1, %s32_s27), 0  ;;  %p298_p3 = pnand %p2452_p0, %p297_p2 }
   0x6   : > { %v2453_v0 = vld [vmem:[%s4469_s1 + $0x20] sm:$0xff] (!%p298_p3)  ;;  %v2454_v1 = vld [vmem:[%s4469_s1 + $0x28] sm:$0xff] (!%p298_p3)  ;;  %v3567_v3 = vmov (!%p298_p3), 0.0|0.0   ;;  %v2455_v6 = vld [vmem:[%s4469_s1 + $0x30] sm:$0xff] (!%p298_p3)  ;;  %vm3568_vm0 = vmmov (!%p298_p3), 0   ;;  %v3569_v11 = vmov (!%p298_p3), 0.0  }
   0x7   : > { %301 = sbr.rel (%p298_p3) target bundleno = 1061 (0x425), region = 48  ;;  %v2501_v2 = vld [vmem:[%s4469_s1 + $0x80] sm:$0xff] (!%p298_p3)  ;;  %3218 = vmatprep.subr.bf16.mxu1 (!%p298_p3), %v3567_v3  ;;  %3242 = vmatprep.subr.bf16.mxu0 (!%p298_p3), %v3567_v3  ;;  %v3219_v4 = vpack.c.bf16 (!%p298_p3), %v2454_v1, %v2453_v0  ;;  %v2502_v5 = vld [vmem:[%s4469_s1 + $0x88] sm:$0xff] (!%p298_p3)  ;;  %v2456_v7 = vld [vmem:[%s4469_s1 + $0x38] sm:$0xff] (!%p298_p3)  ;;  %vm408_vm1 = vcmask (!%p298_p3), 261120   ;;  %p1803_p4 = scmp.eq.s32.totalorder (!%p298_p3), %s3557_s24, 0 }
   0x8   : > { %v3655_v8 = vpack.c.bf16 (!%p298_p3), %v2502_v5, %v2501_v2  ;;  %v2503_v9 = vld [vmem:[%s4469_s1 + $0x90] sm:$0xff] (!%p298_p3)  ;;  %v2504_v10 = vld [vmem:[%s4469_s1 + $0x98] sm:$0xff] (!%p298_p3)  ;;  %2771 = vmatprep.mubr.msk.f32.mxu1 (!%p298_p3), %vm3568_vm0, %v3569_v11  ;;  %2911 = vmatprep.mubr.msk.f32.mxu0 (!%p298_p3), %vm3568_vm0, %v3569_v11  ;;  %v3222_v12 = vpack.c.bf16 (!%p298_p3), %v2456_v7, %v2455_v6  ;;  %v2514_v14 = vld [vmem:[%s4469_s1 + $0xa0] sm:$0xff] (!%p298_p3) }
   0x9   : > { %3220 = vmatpush3.bf16.msra.mxu1 (!%p298_p3), %v3219_v4  ;;  %v3669_v13 = vpack.c.bf16 (!%p298_p3), %v2504_v10, %v2503_v9  ;;  %v2515_v15 = vld [vmem:[%s4469_s1 + $0xa8] sm:$0xff] (!%p298_p3)  ;;  %v390_v16 = vld [vmem:[%s4469_s1] sm:$0xff] (!%p298_p3)  ;;  %v2516_v22 = vld [vmem:[%s4469_s1 + $0xb0] sm:$0xff] (!%p298_p3) }
   0xa   : > { %3244 = vmatpush3.bf16.msra.mxu0 (!%p298_p3), %v3655_v8  ;;  %3221 = vmatprep.subr.bf16.mxu1 (!%p298_p3), %v3567_v3  ;;  %v391_v17 = vld [vmem:[%s4469_s1 + $0x8] sm:$0xff] (!%p298_p3)  ;;  %v3249_v20 = vpack.c.bf16 (!%p298_p3), %v2515_v15, %v2514_v14  ;;  %v2517_v23 = vld [vmem:[%s4469_s1 + $0xb8] sm:$0xff] (!%p298_p3)  ;;  %v392_v24 = vld [vmem:[%s4469_s1 + $0x10] sm:$0xff] (!%p298_p3) }
   0xb   : > { %3245 = vmatprep.subr.bf16.mxu0 (!%p298_p3), %v3567_v3  ;;  %v394_v18 = vld [vmem:[%s4468_s0 + $0x1] sm:$0xff] (!%p298_p3)  ;;  %v3225_v21 = vpack.c.bf16 (!%p298_p3), %v391_v17, %v390_v16  ;;  %v393_v25 = vld [vmem:[%s4469_s1 + $0x18] sm:$0xff] (!%p298_p3)  ;;  %v395_v26 = vld [vmem:[%s4468_s0 + $0x9] sm:$0xff] (!%p298_p3)  ;;  %v3252_v28 = vpack.c.bf16 (!%p298_p3), %v2517_v23, %v2516_v22 }
   0xc   : > { %v1003_v19 = vld [vmem:[%s4468_s0 + $0x7] sm:$0xff] (!%p298_p3)  ;;  %v1004_v27 = vld [vmem:[%s4468_s0 + $0xf] sm:$0xff] (!%p298_p3)  ;;  %v3228_v29 = vpack.c.bf16 (!%p298_p3), %v393_v25, %v392_v24  ;;  %v1005_v31 = vld [vmem:[%s4468_s0 + $0x17] sm:$0xff] (!%p298_p3) }
   0xd   : > { %3223 = vmatpush3.bf16.msra.mxu1 (!%p298_p3), %v3222_v12  ;;  %v396_v30 = vld [vmem:[%s4468_s0 + $0x11] sm:$0xff] (!%p298_p3)  ;;  %v397_v32 = vld [vmem:[%s4468_s0 + $0x19] sm:$0xff] (!%p298_p3)  ;;  %v398_v34 = vld [vmem:[%s4468_s0 + $0x21] sm:$0xff] (!%p298_p3) }
   0xe   : > { %3247 = vmatpush3.bf16.msra.mxu0 %v3669_v13  ;;  %3224 = vmatprep.subr.bf16.mxu1 %v3567_v3  ;;  %v1006_v33 = vld [vmem:[%s4468_s0 + $0x1f] sm:$0xff]  ;;  %v1007_v35 = vld [vmem:[%s4468_s0 + $0x27] sm:$0xff]  ;;  %v2529_v41 = vld [vmem:[%s4469_s1 + $0xd0] sm:$0xff] }
   0xf   : > { %3248 = vmatprep.subr.bf16.mxu0 %v3567_v3  ;;  %v2527_v36 = vld [vmem:[%s4469_s1 + $0xc0] sm:$0xff]  ;;  %v2528_v37 = vld [vmem:[%s4469_s1 + $0xc8] sm:$0xff]  ;;  %v2530_v42 = vld [vmem:[%s4469_s1 + $0xd8] sm:$0xff] }
  0x10   : > { %2772 = vmatmul.mubr.msk.f32.vlgmr.msra.gmra.mrb[0].mxu1 %vm408_vm1, %v394_v18  ;;  %v399_v38 = vld [vmem:[%s4468_s0 + $0x29] sm:$0xff]  ;;  %v3255_v40 = vpack.c.bf16 %v2528_v37, %v2527_v36  ;;  %v400_v43 = vld [vmem:[%s4468_s0 + $0x31] sm:$0xff]  ;;  %v3258_v45 = vpack.c.bf16 %v2530_v42, %v2529_v41  ;;  %v401_v46 = vld [vmem:[%s4468_s0 + $0x39] sm:$0xff] }
  0x11   : > { %2912 = vmatmul.mubr.msk.f32.vlgmr.msra.gmra.mrb[0].mxu0 %vm408_vm1, %v1003_v19  ;;  %2774 = vmatprep.mubr.msk.f32.mxu1 %vm3568_vm0, %v3569_v11  ;;  %v1163_v39 = vld [vmem:[%s4468_s0 + $0x8] sm:$0xff]  ;;  %v1164_v44 = vld [vmem:[%s4468_s0 + $0x10] sm:$0xff]  ;;  %v1165_v47 = vld [vmem:[%s4468_s0 + $0x18] sm:$0xff] }
  0x12   : > { %3250 = vmatpush3.bf16.msra.mxu0 %v3249_v20  ;;  %2914 = vmatprep.mubr.msk.f32.mxu0 %vm3568_vm0, %v3569_v11  ;;  %v402_v48 = vld [vmem:[%s4468_s0 + $0x41] sm:$0xff]  ;;  %v2477_v55 = vld [vmem:[%s4469_s1 + $0x50] sm:$0xff]  ;;  %v2478_v56 = vld [vmem:[%s4469_s1 + $0x58] sm:$0xff] }
  0x13   : > { %3226 = vmatpush3.bf16.msra.mxu1 %v3225_v21  ;;  %3251 = vmatprep.subr.bf16.mxu0 %v3567_v3  ;;  %v1166_v49 = vld [vmem:[%s4468_s0 + $0x20] sm:$0xff]  ;;  %v2476_v51 = vld [vmem:[%s4469_s1 + $0x48] sm:$0xff]  ;;  %v1168_v57 = vld [vmem:[%s4468_s0 + $0x30] sm:$0xff]  ;;  %v3234_v58 = vpack.c.bf16 %v2478_v56, %v2477_v55 }
  0x14   : > { %2775 = vmatmul.mubr.msk.f32.gmra.mrb[2].mxu1 %vm408_vm1, %v395_v26  ;;  %3227 = vmatprep.subr.bf16.mxu1 %v3567_v3  ;;  %v2475_v50 = vld [vmem:[%s4469_s1 + $0x40] sm:$0xff]  ;;  %v1167_v53 = vld [vmem:[%s4468_s0 + $0x28] sm:$0xff]  ;;  %v1169_v59 = vld [vmem:[%s4468_s0 + $0x38] sm:$0xff] }
  0x15   : > { %2915 = vmatmul.mubr.msk.f32.gmra.mrb[2].mxu0 %vm408_vm1, %v1004_v27  ;;  %2777 = vmatprep.mubr.msk.f32.mxu1 %vm3568_vm0, %v3569_v11  ;;  %v381_v52 = vld [vmem:[%s4468_s0] sm:$0xff]  ;;  %v3231_v54 = vpack.c.bf16 %v2476_v51, %v2475_v50  ;;  %v1171_v61 = vld [vmem:[%s4468_s0 + $0x48] sm:$0xff]  ;;  %v2542_v2 = vld [vmem:[%s4469_s1 + $0xf0] sm:$0xff] }
  0x16   : > { %2917 = vmatprep.mubr.msk.f32.mxu0 %vm3568_vm0, %v3569_v11  ;;  %3253 = vmatpush3.bf16.msra.mxu0 %v3252_v28  ;;  %v1170_v60 = vld [vmem:[%s4468_s0 + $0x40] sm:$0xff]  ;;  %v2541_v63 = vld [vmem:[%s4469_s1 + $0xe8] sm:$0xff]  ;;  %v2543_v4 = vld [vmem:[%s4469_s1 + $0xf8] sm:$0xff] }
  0x17   : > { %3254 = vmatprep.subr.bf16.mxu0 %v3567_v3  ;;  %3229 = vmatpush3.bf16.msra.mxu1 %v3228_v29  ;;  %v2540_v62 = vld [vmem:[%s4469_s1 + $0xe0] sm:$0xff]  ;;  %v1323_v0 = vld [vmem:[%s4468_s0 + $0xc] sm:$0xff]  ;;  %v1324_v5 = vld [vmem:[%s4468_s0 + $0x14] sm:$0xff]  ;;  %v3264_v6 = vpack.c.bf16 %v2543_v4, %v2542_v2 }
  0x18   : > { %2778 = vmatmul.mubr.msk.f32.gmra.mrb[4].mxu1 %vm408_vm1, %v396_v30  ;;  %3230 = vmatprep.subr.bf16.mxu1 %v3567_v3  ;;  %v3261_v1 = vpack.c.bf16 %v2541_v63, %v2540_v62  ;;  %v1325_v7 = vld [vmem:[%s4468_s0 + $0x1c] sm:$0xff]  ;;  %v1326_v9 = vld [vmem:[%s4468_s0 + $0x24] sm:$0xff]  ;;  %v1327_v15 = vld [vmem:[%s4468_s0 + $0x2c] sm:$0xff] }
  0x19   : > { %2918 = vmatmul.mubr.msk.f32.gmra.mrb[4].mxu0 %vm408_vm1, %v1005_v31  ;;  %2780 = vmatprep.mubr.msk.f32.mxu1 %vm3568_vm0, %v3569_v11  ;;  %v2488_v10 = vld [vmem:[%s4469_s1 + $0x60] sm:$0xff]  ;;  %v2489_v12 = vld [vmem:[%s4469_s1 + $0x68] sm:$0xff]  ;;  %v2490_v17 = vld [vmem:[%s4469_s1 + $0x70] sm:$0xff] }
  0x1a   : > { %2920 = vmatprep.mubr.msk.f32.mxu0 %vm3568_vm0, %v3569_v11  ;;  %v683_v14 = vld [vmem:[%s4468_s0 + $0x2] sm:$0xff]  ;;  %v3237_v16 = vpack.c.bf16 %v2489_v12, %v2488_v10  ;;  %v2491_v18 = vld [vmem:[%s4469_s1 + $0x78] sm:$0xff]  ;;  %v684_v19 = vld [vmem:[%s4468_s0 + $0xa] sm:$0xff] }
  0x1b   : > { %v1328_v20 = vld [vmem:[%s4468_s0 + $0x34] sm:$0xff]  ;;  %v3240_v21 = vpack.c.bf16 %v2491_v18, %v2490_v17  ;;  %v1329_v23 = vld [vmem:[%s4468_s0 + $0x3c] sm:$0xff]  ;;  %v1330_v25 = vld [vmem:[%s4468_s0 + $0x44] sm:$0xff] }
  0x1c   : > { %2781 = vmatmul.mubr.msk.f32.gmra.mrb[6].mxu1 %vm408_vm1, %v397_v32  ;;  %v685_v22 = vld [vmem:[%s4468_s0 + $0x12] sm:$0xff]  ;;  %v686_v24 = vld [vmem:[%s4468_s0 + $0x1a] sm:$0xff]  ;;  %v687_v26 = vld [vmem:[%s4468_s0 + $0x22] sm:$0xff] }
  0x1d   : > { %2921 = vmatmul.mubr.msk.f32.gmra.mrb[6].mxu0 %vm408_vm1, %v1006_v33  ;;  %2783 = vmatprep.mubr.msk.f32.mxu1 %vm3568_vm0, %v3569_v11  ;;  %v1331_v27 = vld [vmem:[%s4468_s0 + $0x4c] sm:$0xff]  ;;  %v2553_v28 = vld [vmem:[%s4469_s1 + $0x100] sm:$0xff]  ;;  %v1484_v36 = vld [vmem:[%s4468_s0 + $0x15] sm:$0xff] }
  0x1e   : > { %2923 = vmatprep.mubr.msk.f32.mxu0 %vm3568_vm0, %v3569_v11  ;;  %v2554_v29 = vld [vmem:[%s4469_s1 + $0x108] sm:$0xff]  ;;  %v2555_v33 = vld [vmem:[%s4469_s1 + $0x110] sm:$0xff]  ;;  %v850_v51 = vld [vmem:[%s4468_s0 + $0x3e] sm:$0xff] }
  0x1f   : > { %v688_v30 = vld [vmem:[%s4468_s0 + $0x2a] sm:$0xff]  ;;  %v3267_v32 = vpack.c.bf16 %v2554_v29, %v2553_v28  ;;  %v849_v50 = vld [vmem:[%s4468_s0 + $0x36] sm:$0xff]  ;;  %v1010_v55 = vld [vmem:[%s4468_s0 + $0x3f] sm:$0xff] }
  0x20   : > { %2784 = vmatmul.mubr.msk.f32.gmra.mrb[8].mxu1 %vm408_vm1, %v398_v34  ;;  %v1483_v31 = vld [vmem:[%s4468_s0 + $0xd] sm:$0xff]  ;;  %v2556_v34 = vld [vmem:[%s4469_s1 + $0x118] sm:$0xff]  ;;  %v1486_v41 = vld [vmem:[%s4468_s0 + $0x25] sm:$0xff] }
  0x21   : > { %2924 = vmatmul.mubr.msk.f32.gmra.mrb[8].mxu0 %vm408_vm1, %v1007_v35  ;;  %2786 = vmatprep.mubr.msk.f32.mxu1 %vm3568_vm0, %v3569_v11  ;;  %v689_v35 = vld [vmem:[%s4468_s0 + $0x32] sm:$0xff]  ;;  %v3270_v37 = vpack.c.bf16 %v2556_v34, %v2555_v33  ;;  %v843_v42 = vld [vmem:[%s4468_s0 + $0x6] sm:$0xff] }
  0x22   : > { %2946 = vmatprep.mubr.msk.f32.mxu0 %vm3568_vm0, %v3569_v11  ;;  %v1011_v56 = vld [vmem:[%s4468_s0 + $0x47] sm:$0xff] }
  0x24   : > { %2787 = vmatmul.mubr.msk.f32.gmra.mrb[10].mxu1 %vm408_vm1, %v399_v38  ;;  %v690_v38 = vld [vmem:[%s4468_s0 + $0x3a] sm:$0xff] }
  0x25   : > { %2947 = vmatmul.mubr.msk.f32.vlgmr.msra.gmra.mrb[0].mxu0 %vm408_vm1, %v1163_v39  ;;  %2789 = vmatprep.mubr.msk.f32.mxu1 %vm3568_vm0, %v3569_v11 }
  0x26   : > { %3256 = vmatpush3.bf16.msra.mxu0 %v3255_v40  ;;  %2949 = vmatprep.mubr.msk.f32.mxu0 %vm3568_vm0, %v3569_v11  ;;  %v691_v40 = vld [vmem:[%s4468_s0 + $0x42] sm:$0xff] }
  0x27   : > { %3257 = vmatprep.subr.bf16.mxu0 %v3567_v3 }
  0x28   : > { %2790 = vmatmul.mubr.msk.f32.gmra.mrb[12].mxu1 %vm408_vm1, %v400_v43  ;;  %v1487_v43 = vld [vmem:[%s4468_s0 + $0x2d] sm:$0xff] }
  0x29   : > { %2950 = vmatmul.mubr.msk.f32.gmra.mrb[2].mxu0 %vm408_vm1, %v1164_v44  ;;  %2792 = vmatprep.mubr.msk.f32.mxu1 %vm3568_vm0, %v3569_v11 }
  0x2a   : > { %2952 = vmatprep.mubr.msk.f32.mxu0 %vm3568_vm0, %v3569_v11  ;;  %3259 = vmatpush3.bf16.msra.mxu0 %v3258_v45  ;;  %v1488_v45 = vld [vmem:[%s4468_s0 + $0x35] sm:$0xff] }
  0x2b   : > { %3260 = vmatprep.subr.bf16.mxu0 %v3567_v3 }
  0x2c   : > { %2793 = vmatmul.mubr.msk.f32.gmra.mrb[14].mxu1 %vm408_vm1, %v401_v46  ;;  %v845_v46 = vld [vmem:[%s4468_s0 + $0x16] sm:$0xff] }
  0x2d   : > { %2953 = vmatmul.mubr.msk.f32.gmra.mrb[4].mxu0 %vm408_vm1, %v1165_v47  ;;  %2795 = vmatprep.mubr.msk.f32.mxu1 %vm3568_vm0, %v3569_v11 }
  0x2e   : > { %2955 = vmatprep.mubr.msk.f32.mxu0 %vm3568_vm0, %v3569_v11 }
  0x30   : > { %2796 = vmatmul.mubr.msk.f32.gmra.mrb[16].mxu1 %vm408_vm1, %v402_v48  ;;  %v1491_v48 = vld [vmem:[%s4468_s0 + $0x4d] sm:$0xff] }
  0x31   : > { %2956 = vmatmul.mubr.msk.f32.gmra.mrb[6].mxu0 %vm408_vm1, %v1166_v49  ;;  %2806 = vmatprep.mubr.msk.f32.mxu1 %vm3568_vm0, %v3569_v11 }
  0x32   : > { %2958 = vmatprep.mubr.msk.f32.mxu0 %vm3568_vm0, %v3569_v11 }
  0x34   : > { %2807 = vmatmul.mubr.msk.f32.vlgmr.msra.gmra.mrb[0].mxu1 %vm408_vm1, %v381_v52  ;;  %v851_v52 = vld [vmem:[%s4468_s0 + $0x46] sm:$0xff] }
  0x35   : > { %2959 = vmatmul.mubr.msk.f32.gmra.mrb[8].mxu0 %vm408_vm1, %v1167_v53  ;;  %2809 = vmatprep.mubr.msk.f32.mxu1 %vm3568_vm0, %v3569_v11 }
  0x36   : > { %2961 = vmatprep.mubr.msk.f32.mxu0 %vm3568_vm0, %v3569_v11  ;;  %3232 = vmatpush3.bf16.msra.mxu1 %v3231_v54  ;;  %v1009_v54 = vld [vmem:[%s4468_s0 + $0x37] sm:$0xff] }
  0x37   : > { %3233 = vmatprep.subr.bf16.mxu1 %v3567_v3 }
  0x38   : > { %2810 = vmatmul.mubr.msk.f32.gmra.mrb[2].mxu1 %vm408_vm1, %v1163_v39  ;;  %v1485_v39 = vld [vmem:[%s4468_s0 + $0x1d] sm:$0xff] }
  0x39   : > { %2962 = vmatmul.mubr.msk.f32.gmra.mrb[10].mxu0 %vm408_vm1, %v1168_v57  ;;  %2812 = vmatprep.mubr.msk.f32.mxu1 %vm3568_vm0, %v3569_v11 }
  0x3a   : > { %2964 = vmatprep.mubr.msk.f32.mxu0 %vm3568_vm0, %v3569_v11  ;;  %3235 = vmatpush3.bf16.msra.mxu1 %v3234_v58 }
  0x3b   : > { %3236 = vmatprep.subr.bf16.mxu1 %v3567_v3 }
  0x3c   : > { %2813 = vmatmul.mubr.msk.f32.gmra.mrb[4].mxu1 %vm408_vm1, %v1164_v44  ;;  %v844_v44 = vld [vmem:[%s4468_s0 + $0xe] sm:$0xff] }
  0x3d   : > { %2965 = vmatmul.mubr.msk.f32.gmra.mrb[12].mxu0 %vm408_vm1, %v1169_v59  ;;  %2815 = vmatprep.mubr.msk.f32.mxu1 %vm3568_vm0, %v3569_v11 }
  0x3e   : > { %2967 = vmatprep.mubr.msk.f32.mxu0 %vm3568_vm0, %v3569_v11 }
  0x40   : > { %2816 = vmatmul.mubr.msk.f32.gmra.mrb[6].mxu1 %vm408_vm1, %v1165_v47  ;;  %v1490_v47 = vld [vmem:[%s4468_s0 + $0x45] sm:$0xff] }
  0x41   : > { %2968 = vmatmul.mubr.msk.f32.gmra.mrb[14].mxu0 %vm408_vm1, %v1170_v60  ;;  %2818 = vmatprep.mubr.msk.f32.mxu1 %vm3568_vm0, %v3569_v11 }
  0x42   : > { %2970 = vmatprep.mubr.msk.f32.mxu0 %vm3568_vm0, %v3569_v11 }
  0x44   : > { %2819 = vmatmul.mubr.msk.f32.gmra.mrb[8].mxu1 %vm408_vm1, %v1166_v49  ;;  %v848_v49 = vld [vmem:[%s4468_s0 + $0x2e] sm:$0xff] }
  0x45   : > { %2971 = vmatmul.mubr.msk.f32.gmra.mrb[16].mxu0 %vm408_vm1, %v1171_v61  ;;  %2821 = vmatprep.mubr.msk.f32.mxu1 %vm3568_vm0, %v3569_v11 }
  0x46   : > { %2981 = vmatprep.mubr.msk.f32.mxu0 %vm3568_vm0, %v3569_v11 }
  0x48   : > { %2822 = vmatmul.mubr.msk.f32.gmra.mrb[10].mxu1 %vm408_vm1, %v1167_v53  ;;  %v1008_v53 = vld [vmem:[%s4468_s0 + $0x2f] sm:$0xff] }
  0x49   : > { %2982 = vmatmul.mubr.msk.f32.vlgmr.msra.gmra.mrb[0].mxu0 %vm408_vm1, %v1323_v0  ;;  %2824 = vmatprep.mubr.msk.f32.mxu1 %vm3568_vm0, %v3569_v11 }
  0x4a   : > { %3262 = vmatpush3.bf16.msra.mxu0 %v3261_v1  ;;  %2984 = vmatprep.mubr.msk.f32.mxu0 %vm3568_vm0, %v3569_v11 }
  0x4b   : > { %3263 = vmatprep.subr.bf16.mxu0 %v3567_v3 }
  0x4c   : > { %2825 = vmatmul.mubr.msk.f32.gmra.mrb[12].mxu1 %vm408_vm1, %v1168_v57  ;;  %v1651_v57 = vld [vmem:[%s4468_s0 + $0x4e] sm:$0xff] }
  0x4d   : > { %2985 = vmatmul.mubr.msk.f32.gmra.mrb[2].mxu0 %vm408_vm1, %v1324_v5  ;;  %2827 = vmatprep.mubr.msk.f32.mxu1 %vm3568_vm0, %v3569_v11 }
  0x4e   : > { %2987 = vmatprep.mubr.msk.f32.mxu0 %vm3568_vm0, %v3569_v11  ;;  %3265 = vmatpush3.bf16.msra.mxu0 %v3264_v6 }
  0x4f   : > { %3266 = vmatprep.subr.bf16.mxu0 %v3567_v3 }
  0x50   : > { %2828 = vmatmul.mubr.msk.f32.gmra.mrb[14].mxu1 %vm408_vm1, %v1169_v59 }
  0x51   : > { %2988 = vmatmul.mubr.msk.f32.gmra.mrb[4].mxu0 %vm408_vm1, %v1325_v7  ;;  %2830 = vmatprep.mubr.msk.f32.mxu1 %vm3568_vm0, %v3569_v11 }
  0x52   : > { %2990 = vmatprep.mubr.msk.f32.mxu0 %vm3568_vm0, %v3569_v11 }
  0x54   : > { %2831 = vmatmul.mubr.msk.f32.gmra.mrb[16].mxu1 %vm408_vm1, %v1170_v60 }
  0x55   : > { %2991 = vmatmul.mubr.msk.f32.gmra.mrb[6].mxu0 %vm408_vm1, %v1326_v9  ;;  %2841 = vmatprep.mubr.msk.f32.mxu1 %vm3568_vm0, %v3569_v11 }
  0x56   : > { %2993 = vmatprep.mubr.msk.f32.mxu0 %vm3568_vm0, %v3569_v11 }
  0x58   : > { %2842 = vmatmul.mubr.msk.f32.vlgmr.msra.gmra.mrb[0].mxu1 %vm408_vm1, %v683_v14 }
  0x59   : > { %2994 = vmatmul.mubr.msk.f32.gmra.mrb[8].mxu0 %vm408_vm1, %v1327_v15  ;;  %2844 = vmatprep.mubr.msk.f32.mxu1 %vm3568_vm0, %v3569_v11 }
  0x5a   : > { %2996 = vmatprep.mubr.msk.f32.mxu0 %vm3568_vm0, %v3569_v11  ;;  %3238 = vmatpush3.bf16.msra.mxu1 %v3237_v16 }
  0x5b   : > { %3239 = vmatprep.subr.bf16.mxu1 %v3567_v3 }
  0x5c   : > { %2845 = vmatmul.mubr.msk.f32.gmra.mrb[2].mxu1 %vm408_vm1, %v684_v19 }
  0x5d   : > { %2997 = vmatmul.mubr.msk.f32.gmra.mrb[10].mxu0 %vm408_vm1, %v1328_v20  ;;  %2847 = vmatprep.mubr.msk.f32.mxu1 %vm3568_vm0, %v3569_v11 }
  0x5e   : > { %2999 = vmatprep.mubr.msk.f32.mxu0 %vm3568_vm0, %v3569_v11  ;;  %3241 = vmatpush3.bf16.msra.mxu1 %v3240_v21 }
  0x5f   : > { %3368 = vmatprep.subr.bf16.mxu1 %v3567_v3 }
  0x60   : > { %2848 = vmatmul.mubr.msk.f32.gmra.mrb[4].mxu1 %vm408_vm1, %v685_v22 }
  0x61   : > { %3000 = vmatmul.mubr.msk.f32.gmra.mrb[12].mxu0 %vm408_vm1, %v1329_v23  ;;  %2850 = vmatprep.mubr.msk.f32.mxu1 %vm3568_vm0, %v3569_v11 }
  0x62   : > { %3002 = vmatprep.mubr.msk.f32.mxu0 %vm3568_vm0, %v3569_v11 }
  0x64   : > { %2851 = vmatmul.mubr.msk.f32.gmra.mrb[6].mxu1 %vm408_vm1, %v686_v24 }
  0x65   : > { %3003 = vmatmul.mubr.msk.f32.gmra.mrb[14].mxu0 %vm408_vm1, %v1330_v25  ;;  %2853 = vmatprep.mubr.msk.f32.mxu1 %vm3568_vm0, %v3569_v11 }
  0x66   : > { %3005 = vmatprep.mubr.msk.f32.mxu0 %vm3568_vm0, %v3569_v11 }
  0x68   : > { %2854 = vmatmul.mubr.msk.f32.gmra.mrb[8].mxu1 %vm408_vm1, %v687_v26 }
  0x69   : > { %3006 = vmatmul.mubr.msk.f32.gmra.mrb[16].mxu0 %vm408_vm1, %v1331_v27  ;;  %2856 = vmatprep.mubr.msk.f32.mxu1 %vm3568_vm0, %v3569_v11 }
  0x6a   : > { %3016 = vmatprep.mubr.msk.f32.mxu0 %vm3568_vm0, %v3569_v11 }
  0x6c   : > { %2857 = vmatmul.mubr.msk.f32.gmra.mrb[10].mxu1 %vm408_vm1, %v688_v30 }
  0x6d   : > { %3017 = vmatmul.mubr.msk.f32.vlgmr.msra.gmra.mrb[0].mxu0 %vm408_vm1, %v1483_v31  ;;  %2859 = vmatprep.mubr.msk.f32.mxu1 %vm3568_vm0, %v3569_v11 }
  0x6e   : > { %3268 = vmatpush3.bf16.msra.mxu0 %v3267_v32  ;;  %3019 = vmatprep.mubr.msk.f32.mxu0 %vm3568_vm0, %v3569_v11 }
  0x6f   : > { %3269 = vmatprep.subr.bf16.mxu0 %v3567_v3 }
  0x70   : > { %2860 = vmatmul.mubr.msk.f32.gmra.mrb[12].mxu1 %vm408_vm1, %v689_v35 }
  0x71   : > { %3020 = vmatmul.mubr.msk.f32.gmra.mrb[2].mxu0 %vm408_vm1, %v1484_v36  ;;  %2862 = vmatprep.mubr.msk.f32.mxu1 %vm3568_vm0, %v3569_v11 }
  0x72   : > { %3022 = vmatprep.mubr.msk.f32.mxu0 %vm3568_vm0, %v3569_v11  ;;  %3271 = vmatpush3.bf16.msra.mxu0 %v3270_v37 }
  0x74   : > { %2863 = vmatmul.mubr.msk.f32.gmra.mrb[14].mxu1 %vm408_vm1, %v690_v38 }
  0x75   : > { %3023 = vmatmul.mubr.msk.f32.gmra.mrb[4].mxu0 %vm408_vm1, %v1485_v39  ;;  %2865 = vmatprep.mubr.msk.f32.mxu1 %vm3568_vm0, %v3569_v11 }
  0x76   : > { %3025 = vmatprep.mubr.msk.f32.mxu0 %vm3568_vm0, %v3569_v11 }
  0x78   : > { %2866 = vmatmul.mubr.msk.f32.gmra.mrb[16].mxu1 %vm408_vm1, %v691_v40 }
  0x79   : > { %3026 = vmatmul.mubr.msk.f32.gmra.mrb[6].mxu0 %vm408_vm1, %v1486_v41  ;;  %2876 = vmatprep.mubr.msk.f32.mxu1 %vm3568_vm0, %v3569_v11 }
  0x7a   : > { %3028 = vmatprep.mubr.msk.f32.mxu0 %vm3568_vm0, %v3569_v11 }
  0x7c   : > { %2877 = vmatmul.mubr.msk.f32.vlgmr.msra.gmra.mrb[0].mxu1 %vm408_vm1, %v843_v42  ;;  %v3570_v42 = vmov (%p1803_p4), 0.0  }
  0x7d   : > { %3029 = vmatmul.mubr.msk.f32.gmra.mrb[8].mxu0 %vm408_vm1, %v1487_v43  ;;  %2879 = vmatprep.mubr.msk.f32.mxu1 %vm3568_vm0, %v3569_v11  ;;  %1809 = vst [vmem:[#allocation2] sm:$0x1] (%p1803_p4), %v3570_v42  ;;  %1810 = vst [vmem:[#allocation3] sm:$0x1] (%p1803_p4), %v3570_v42 }
  0x7e   : > { %3031 = vmatprep.mubr.msk.f32.mxu0 %vm3568_vm0, %v3569_v11  ;;  %3370 = vmatpush3.bf16.msra.mxu1 %v3655_v8  ;;  %v1489_v8 = vld [vmem:[%s4468_s0 + $0x3d] sm:$0xff] }
  0x7f   : > { %3369 = vmatprep.subr.bf16.mxu1 %v3567_v3  ;;  %v846_v3 = vld [vmem:[%s4468_s0 + $0x1e] sm:$0xff] }
  0x80   : > { %2880 = vmatmul.mubr.msk.f32.gmra.mrb[2].mxu1 %vm408_vm1, %v844_v44 }
  0x81   : > { %3032 = vmatmul.mubr.msk.f32.gmra.mrb[10].mxu0 %vm408_vm1, %v1488_v45  ;;  %2882 = vmatprep.mubr.msk.f32.mxu1 %vm3568_vm0, %v3569_v11 }
  0x82   : > { %3034 = vmatprep.mubr.msk.f32.mxu0 %vm3568_vm0, %v3569_v11  ;;  %3371 = vmatpush3.bf16.msra.mxu1 %v3669_v13  ;;  %v847_v13 = vld [vmem:[%s4468_s0 + $0x26] sm:$0xff] }
  0x84   : > { %2883 = vmatmul.mubr.msk.f32.gmra.mrb[4].mxu1 %vm408_vm1, %v845_v46 }
  0x85   : > { %3035 = vmatmul.mubr.msk.f32.gmra.mrb[12].mxu0 %vm408_vm1, %v1489_v8  ;;  %2885 = vmatprep.mubr.msk.f32.mxu1 %vm3568_vm0, %v3569_v11 }
  0x86   : > { %3037 = vmatprep.mubr.msk.f32.mxu0 %vm3568_vm0, %v3569_v11 }
  0x88   : > { %2886 = vmatmul.mubr.msk.f32.gmra.mrb[6].mxu1 %vm408_vm1, %v846_v3 }
  0x89   : > { %3038 = vmatmul.mubr.msk.f32.gmra.mrb[14].mxu0 %vm408_vm1, %v1490_v47  ;;  %2888 = vmatprep.mubr.msk.f32.mxu1 %vm3568_vm0, %v3569_v11 }
  0x8a   : > { %3040 = vmatprep.mubr.msk.f32.mxu0 %vm3568_vm0, %v3569_v11 }
  0x8c   : > { %2889 = vmatmul.mubr.msk.f32.gmra.mrb[8].mxu1 %vm408_vm1, %v847_v13 }
  0x8d   : > { %3041 = vmatmul.mubr.msk.f32.gmra.mrb[16].mxu0 %vm408_vm1, %v1491_v48  ;;  %2891 = vmatprep.mubr.msk.f32.mxu1 %vm3568_vm0, %v3569_v11 }
  0x8e   : > { %3051 = vmatprep.mubr.msk.f32.mxu0 %vm3568_vm0, %v3569_v11 }
  0x90   : > { %2892 = vmatmul.mubr.msk.f32.gmra.mrb[10].mxu1 %vm408_vm1, %v848_v49 }
  0x91   : > { %3052 = vmatmul.mubr.msk.f32.vlgmr.msra.gmra.mrb[0].mxu0 %vm408_vm1, %v844_v44  ;;  %2894 = vmatprep.mubr.msk.f32.mxu1 %vm3568_vm0, %v3569_v11 }
  0x92   : > { %3054 = vmatprep.mubr.msk.f32.mxu0 %vm3568_vm0, %v3569_v11 }
  0x94   : > { %2895 = vmatmul.mubr.msk.f32.gmra.mrb[12].mxu1 %vm408_vm1, %v849_v50 }
  0x95   : > { %3055 = vmatmul.mubr.msk.f32.gmra.mrb[2].mxu0 %vm408_vm1, %v845_v46  ;;  %2897 = vmatprep.mubr.msk.f32.mxu1 %vm3568_vm0, %v3569_v11 }
  0x96   : > { %3057 = vmatprep.mubr.msk.f32.mxu0 %vm3568_vm0, %v3569_v11 }
  0x98   : > { %2898 = vmatmul.mubr.msk.f32.gmra.mrb[14].mxu1 %vm408_vm1, %v850_v51 }
  0x99   : > { %3058 = vmatmul.mubr.msk.f32.gmra.mrb[4].mxu0 %vm408_vm1, %v846_v3  ;;  %2900 = vmatprep.mubr.msk.f32.mxu1 %vm3568_vm0, %v3569_v11 }
  0x9a   : > { %3060 = vmatprep.mubr.msk.f32.mxu0 %vm3568_vm0, %v3569_v11 }
  0x9c   : > { %2901 = vmatmul.mubr.msk.f32.gmra.mrb[16].mxu1 %vm408_vm1, %v851_v52 }
  0x9d   : > { %3061 = vmatmul.mubr.msk.f32.gmra.mrb[6].mxu0 %vm408_vm1, %v847_v13  ;;  %2926 = vmatprep.mubr.msk.f32.mxu1 %vm3568_vm0, %v3569_v11 }
  0x9e   : > { %3063 = vmatprep.mubr.msk.f32.mxu0 %vm3568_vm0, %v3569_v11 }
  0xa0   : > { %2927 = vmatmul.mubr.msk.f32.vlgmr.msra.gmra.mrb[10].mxu1 %vm408_vm1, %v1008_v53 }
  0xa1   : > { %3064 = vmatmul.mubr.msk.f32.gmra.mrb[8].mxu0 %vm408_vm1, %v848_v49  ;;  %2929 = vmatprep.mubr.msk.f32.mxu1 %vm3568_vm0, %v3569_v11 }
  0xa2   : > { %3066 = vmatprep.mubr.msk.f32.mxu0 %vm3568_vm0, %v3569_v11 }
  0xa4   : > { %2930 = vmatmul.mubr.msk.f32.gmra.mrb[12].mxu1 %vm408_vm1, %v1009_v54 }
  0xa5   : > { %3067 = vmatmul.mubr.msk.f32.gmra.mrb[10].mxu0 %vm408_vm1, %v849_v50  ;;  %2932 = vmatprep.mubr.msk.f32.mxu1 %vm3568_vm0, %v3569_v11 }
  0xa6   : > { %3069 = vmatprep.mubr.msk.f32.mxu0 %vm3568_vm0, %v3569_v11 }
  0xa8   : > { %2933 = vmatmul.mubr.msk.f32.gmra.mrb[14].mxu1 %vm408_vm1, %v1010_v55 }
  0xa9   : > { %3070 = vmatmul.mubr.msk.f32.gmra.mrb[12].mxu0 %vm408_vm1, %v850_v51  ;;  %2935 = vmatprep.mubr.msk.f32.mxu1 %vm3568_vm0, %v3569_v11 }
  0xaa   : > { %3072 = vmatprep.mubr.msk.f32.mxu0 %vm3568_vm0, %v3569_v11 }
  0xac   : > { %2936 = vmatmul.mubr.msk.f32.gmra.mrb[16].mxu1 %vm408_vm1, %v1011_v56 }
  0xad   : > { %3073 = vmatmul.mubr.msk.f32.gmra.mrb[14].mxu0 %vm408_vm1, %v851_v52 }
  0xae   : > { %3075 = vmatprep.mubr.msk.f32.mxu0 %vm3568_vm0, %v3569_v11 }
  0xb1   : > { %3076 = vmatmul.mubr.msk.f32.gmra.mrb[16].mxu0 %vm408_vm1, %v1651_v57 }
 0x14f   : > { %v950_v58 = vpop.f32.mrb[0].mxu1 }
 0x150   : > { %v2878_v59 = vpop.f32.mrb[1].mxu1 }
 0x153   : > { %v955_v60 = vpop.f32.mrb[2].mxu1 }
 0x154   : > { %v2881_v61 = vpop.f32.mrb[3].mxu1 }
 0x157   : > { %v960_v62 = vpop.f32.mrb[4].mxu1 }
 0x158   : > { %v2884_v63 = vpop.f32.mrb[5].mxu1 }
 0x15b   : > { %v965_v0 = vpop.f32.mrb[6].mxu1 }
 0x15c   : > { %v2887_v1 = vpop.f32.mrb[7].mxu1 }
 0x15f   : > { %v970_v2 = vpop.f32.mrb[8].mxu1 }
 0x160   : > { %v2890_v4 = vpop.f32.mrb[9].mxu1 }
 0x164   : > { %v1750_v5 = vpop.f32.mrb[0].mxu0 }
 0x165   : > { %v4210_v6 = vadd.f32 %v1750_v5, %v950_v58  ;;  %v3053_v11 = vpop.f32.mrb[1].mxu0 }
 0x168   : > { %v1755_v7 = vpop.f32.mrb[2].mxu0 }
 0x169   : > { %v4212_v9 = vadd.f32 %v1755_v7, %v955_v60  ;;  %v3056_v10 = vpop.f32.mrb[3].mxu0 }
 0x16c   : > { %v1760_v12 = vpop.f32.mrb[4].mxu0 }
 0x16d   : > { %v4214_v14 = vadd.f32 %v1760_v12, %v960_v62  ;;  %v3059_v15 = vpop.f32.mrb[5].mxu0 }
 0x170   : > { %v1765_v16 = vpop.f32.mrb[6].mxu0 }
 0x171   : > { %v4216_v17 = vadd.f32 %v1765_v16, %v965_v0  ;;  %v3062_v18 = vpop.f32.mrb[7].mxu0 }
 0x173   : > { %v1135_v19 = vpop.f32.mrb[10].mxu1 }
 0x174   : > { %v1770_v20 = vpop.f32.mrb[8].mxu0  ;;  %v2928_v21 = vpop.f32.mrb[11].mxu1 }
 0x175   : > { %v4218_v22 = vadd.f32 %v1770_v20, %v970_v2  ;;  %v3065_v23 = vpop.f32.mrb[9].mxu0 }
 0x177   : > { %v1140_v24 = vpop.f32.mrb[12].mxu1 }
 0x178   : > { %v1775_v25 = vpop.f32.mrb[10].mxu0  ;;  %v2931_v26 = vpop.f32.mrb[13].mxu1 }
 0x179   : > { %v4220_v27 = vadd.f32 %v1775_v25, %v1135_v19  ;;  %v3068_v28 = vpop.f32.mrb[11].mxu0 }
 0x17b   : > { %v1145_v29 = vpop.f32.mrb[14].mxu1 }
 0x17c   : > { %v1780_v30 = vpop.f32.mrb[12].mxu0  ;;  %v2934_v31 = vpop.f32.mrb[15].mxu1 }
 0x17d   : > { %v4222_v32 = vadd.f32 %v1780_v30, %v1140_v24  ;;  %v3071_v33 = vpop.f32.mrb[13].mxu0 }
 0x17f   : > { %v1150_v34 = vpop.f32.mrb[16].mxu1  ;;  %1808 = sbr.rel (!%p1803_p4) target bundleno = 390 (0x186), region = 52 }
 0x180   : > { %v1785_v35 = vpop.f32.mrb[14].mxu0  ;;  %v2937_v36 = vpop.f32.mrb[17].mxu1 }
 0x181   : > { %v4224_v37 = vadd.f32 %v1785_v35, %v1145_v29  ;;  %v3074_v38 = vpop.f32.mrb[15].mxu0 }
 0x184   : > { %v1790_v39 = vpop.f32.mrb[16].mxu0 }
 0x185   : > { %v4226_v40 = vadd.f32 %v1790_v39, %v1150_v34  ;;  %v3077_v41 = vpop.f32.mrb[17].mxu0 }
 0x186 PF: > { %p2567_p5 = scmp.ne.s32.totalorder %s3557_s24, 0 }
 0x187   : > { %v1816_v43 = vld [vmem:[%s4474_s6 + $0x10] sm:$0xff] (!%p2567_p5)  ;;  %v1814_v44 = vld [vmem:[%s4474_s6] sm:$0xff] (!%p2567_p5)  ;;  %v3571_v45 = vmov (!%p2567_p5), 0   ;;  %v1817_v46 = vld [vmem:[%s4474_s6 + $0x18] sm:$0xff] (!%p2567_p5) }
 0x188   : > { %1813 = sbr.rel (%p2567_p5) target bundleno = 560 (0x230), region = 56  ;;  %3540 = vset.pattern.permute.xlu1 (!%p2567_p5), %v3571_v45  ;;  %3539 = vset.pattern.permute.xlu0 (!%p2567_p5), %v3571_v45  ;;  %v1815_v8 = vld [vmem:[%s4474_s6 + $0x8] sm:$0xff] (!%p2567_p5)  ;;  %v1818_v47 = vld [vmem:[%s4474_s6 + $0x20] sm:$0xff] (!%p2567_p5)  ;;  %v1821_v13 = vld [vmem:[%s4474_s6 + $0x38] sm:$0xff] (!%p2567_p5) }
 0x189   : > { %1835 = vperm.xlu1 (!%p2567_p5), %3540, %v1816_v43   ;;  %1825 = vperm.xlu0 (!%p2567_p5), %3539, %v1814_v44   ;;  %v1819_v3 = vld [vmem:[%s4474_s6 + $0x28] sm:$0xff] (!%p2567_p5)  ;;  %v1820_v48 = vld [vmem:[%s4474_s6 + $0x30] sm:$0xff] (!%p2567_p5)  ;;  %v1822_v49 = vld [vmem:[%s4474_s6 + $0x40] sm:$0xff] (!%p2567_p5) }
 0x18d   : > { %1840 = vperm.xlu1 (!%p2567_p5), %3540, %v1817_v46   ;;  %1830 = vperm.xlu0 (!%p2567_p5), %3539, %v1815_v8  }
 0x191   : > { %1850 = vperm.xlu1 %3540, %v1819_v3   ;;  %1845 = vperm.xlu0 %3539, %v1818_v47  }
 0x195   : > { %1860 = vperm.xlu1 %3540, %v1821_v13   ;;  %1855 = vperm.xlu0 %3539, %v1820_v48   ;;  %v1877_v13 = vld [vmem:[#allocation2] sm:$0x1] }
 0x199   : > { %1865 = vperm.xlu0 %3539, %v1822_v49  }
 0x208   : > { %v1836_v50 = vpop.permute.xlu1 %1835  ;;  %v1826_v51 = vpop.permute.xlu0 %1825 }
 0x209   : > { %v1868_v52 = vmul.f32 %v4210_v6, %v1826_v51  ;;  %v1870_v55 = vmul.f32 %v4214_v14, %v1836_v50  ;;  %v1894_v50 = vld [vmem:[#allocation3] sm:$0x1] }
 0x20b   : > { %v1895_v57 = vmul.f32 %v4210_v6, %v1868_v52  ;;  %v1897_v63 = vmul.f32 %v4214_v14, %v1870_v55 }
 0x20c   : > { %v1841_v53 = vpop.permute.xlu1 %1840  ;;  %v1831_v54 = vpop.permute.xlu0 %1830 }
 0x20d   : > { %v1869_v56 = vmul.f32 %v4212_v9, %v1831_v54  ;;  %v1871_v58 = vmul.f32 %v4216_v17, %v1841_v53 }
 0x20f   : > { %v1878_v59 = vadd.f32 %v1869_v56, %v1868_v52  ;;  %v1896_v60 = vmul.f32 %v4212_v9, %v1869_v56  ;;  %v1898_v4 = vmul.f32 %v4216_v17, %v1871_v58 }
 0x210   : > { %v1851_v61 = vpop.permute.xlu1 %1850  ;;  %v1846_v62 = vpop.permute.xlu0 %1845 }
 0x211   : > { %v1879_v0 = vadd.f32 %v1878_v59, %v1870_v55  ;;  %v1904_v1 = vadd.f32 %v1896_v60, %v1895_v57  ;;  %v1872_v2 = vmul.f32 %v4218_v22, %v1846_v62  ;;  %v1873_v11 = vmul.f32 %v4220_v27, %v1851_v61 }
 0x213   : > { %v1905_v5 = vadd.f32 %v1904_v1, %v1897_v63  ;;  %v1880_v7 = vadd.f32 %v1879_v0, %v1871_v58  ;;  %v1899_v18 = vmul.f32 %v4218_v22, %v1872_v2  ;;  %v1900_v20 = vmul.f32 %v4220_v27, %v1873_v11 }
 0x214   : > { %v1861_v10 = vpop.permute.xlu1 %1860  ;;  %v1856_v12 = vpop.permute.xlu0 %1855 }
 0x215   : > { %v1906_v15 = vadd.f32 %v1905_v5, %v1898_v4  ;;  %v1881_v16 = vadd.f32 %v1880_v7, %v1872_v2  ;;  %v1874_v19 = vmul.f32 %v4222_v32, %v1856_v12  ;;  %v1875_v23 = vmul.f32 %v4224_v37, %v1861_v10 }
 0x217   : > { %v1907_v21 = vadd.f32 %v1906_v15, %v1899_v18  ;;  %v1882_v24 = vadd.f32 %v1881_v16, %v1873_v11  ;;  %v1901_v29 = vmul.f32 %v4222_v32, %v1874_v19  ;;  %v1902_v31 = vmul.f32 %v4224_v37, %v1875_v23 }
 0x218   : > { %v1866_v25 = vpop.permute.xlu0 %1865 }
 0x219   : > { %v1908_v26 = vadd.f32 %v1907_v21, %v1900_v20  ;;  %v1883_v28 = vadd.f32 %v1882_v24, %v1874_v19  ;;  %v1876_v30 = vmul.f32 %v4226_v40, %v1866_v25 }
 0x21b   : > { %v1909_v33 = vadd.f32 %v1908_v26, %v1901_v29  ;;  %v1884_v34 = vadd.f32 %v1883_v28, %v1875_v23  ;;  %v1903_v38 = vmul.f32 %v4226_v40, %v1876_v30 }
 0x21d   : > { %v1910_v35 = vadd.f32 %v1909_v33, %v1902_v31  ;;  %v1885_v36 = vadd.f32 %v1884_v34, %v1876_v30 }
 0x21f   : > { %v1886_v39 = vrot.slane %v1885_v36, 4  ;;  %v1911_v41 = vadd.f32 %v1910_v35, %v1903_v38 }
 0x221   : > { %v1887_v42 = vadd.f32 %v1886_v39, %v1885_v36  ;;  %v1912_v43 = vrot.slane %v1911_v41, 4 }
 0x223   : > { %v1888_v44 = vrot.slane %v1887_v42, 2  ;;  %v1913_v45 = vadd.f32 %v1912_v43, %v1911_v41 }
 0x225   : > { %v1889_v46 = vadd.f32 %v1888_v44, %v1887_v42  ;;  %v1914_v8 = vrot.slane %v1913_v45, 2 }
 0x227   : > { %v1890_v3 = vrot.slane %v1889_v46, 1  ;;  %v1915_v47 = vadd.f32 %v1914_v8, %v1913_v45 }
 0x229   : > { %v1891_v48 = vadd.f32 %v1890_v3, %v1889_v46  ;;  %v1916_v49 = vrot.slane %v1915_v47, 1 }
 0x22b   : > { %v1892_v51 = vadd.f32 %v1891_v48, %v1877_v13  ;;  %v1917_v52 = vadd.f32 %v1916_v49, %v1915_v47 }
 0x22d   : > { %1893 = vst [vmem:[#allocation2] sm:$0x1] %v1892_v51  ;;  %v1918_v53 = vadd.f32 %v1917_v52, %v1894_v50 }
 0x22f   : > { %1919 = vst [vmem:[#allocation3] sm:$0x1] %v1918_v53 }
 0x230 PF: > { %p1920_p6 = scmp.eq.s32.totalorder %s3557_s24, 1 }
 0x231   : > { %v1926_v54 = vld [vmem:[%s4472_s4] sm:$0xff] (%p1920_p6)  ;;  %v1927_v55 = vld [vmem:[%s4472_s4 + $0x8] sm:$0xff] (%p1920_p6)  ;;  %v1928_v56 = vld [vmem:[%s4472_s4 + $0x10] sm:$0xff] (%p1920_p6)  ;;  %v3572_v57 = vmov (%p1920_p6), 0.0|0.0   ;;  %vm3573_vm2 = vmmov (%p1920_p6), 0   ;;  %v3574_v60 = vmov (%p1920_p6), 0.0  }
 0x232   : > { %1924 = sbr.rel (!%p1920_p6) target bundleno = 1045 (0x415), region = 60  ;;  %3272 = vmatprep.subr.bf16.mxu0 (%p1920_p6), %v3572_v57  ;;  %v3273_v58 = vpack.c.bf16 (%p1920_p6), %v1927_v55, %v1926_v54  ;;  %3296 = vmatprep.subr.bf16.mxu1 (%p1920_p6), %v3572_v57  ;;  %v1929_v59 = vld [vmem:[%s4472_s4 + $0x18] sm:$0xff] (%p1920_p6)  ;;  %v1930_v62 = vld [vmem:[%s4472_s4 + $0x20] sm:$0xff] (%p1920_p6)  ;;  %v1931_v63 = vld [vmem:[%s4472_s4 + $0x28] sm:$0xff] (%p1920_p6) }
 0x233   : > { %3110 = vmatprep.mubr.msk.f32.mxu0 (%p1920_p6), %vm3573_vm2, %v3574_v60  ;;  %3145 = vmatprep.mubr.msk.f32.mxu1 (%p1920_p6), %vm3573_vm2, %v3574_v60  ;;  %v3276_v61 = vpack.c.bf16 (%p1920_p6), %v1929_v59, %v1928_v56  ;;  %v3279_v0 = vpack.c.bf16 (%p1920_p6), %v1931_v63, %v1930_v62  ;;  %v1932_v1 = vld [vmem:[%s4472_s4 + $0x30] sm:$0xff] (%p1920_p6)  ;;  %v1933_v2 = vld [vmem:[%s4472_s4 + $0x38] sm:$0xff] (%p1920_p6)  ;;  %v1934_v5 = vld [vmem:[%s4472_s4 + $0x40] sm:$0xff] (%p1920_p6) }
 0x234   : > { %3274 = vmatpush3.bf16.msra.mxu0 (%p1920_p6), %v3273_v58  ;;  %3298 = vmatpush3.bf16.msra.mxu1 (%p1920_p6), %v3273_v58  ;;  %v3282_v4 = vpack.c.bf16 (%p1920_p6), %v1933_v2, %v1932_v1  ;;  %v1935_v11 = vld [vmem:[%s4472_s4 + $0x48] sm:$0xff] (%p1920_p6)  ;;  %v1936_v10 = vld [vmem:[%s4472_s4 + $0x50] sm:$0xff] (%p1920_p6)  ;;  %v1937_v12 = vld [vmem:[%s4472_s4 + $0x58] sm:$0xff] (%p1920_p6) }
 0x235   : > { %3275 = vmatprep.subr.bf16.mxu0 (%p1920_p6), %v3572_v57  ;;  %3299 = vmatprep.subr.bf16.mxu1 (%p1920_p6), %v3572_v57  ;;  %v3285_v7 = vpack.c.bf16 (%p1920_p6), %v1935_v11, %v1934_v5  ;;  %v3288_v15 = vpack.c.bf16 (%p1920_p6), %v1937_v12, %v1936_v10  ;;  %v1938_v16 = vld [vmem:[%s4472_s4 + $0x60] sm:$0xff] (%p1920_p6)  ;;  %v1939_v18 = vld [vmem:[%s4472_s4 + $0x68] sm:$0xff] (%p1920_p6)  ;;  %v1940_v20 = vld [vmem:[%s4472_s4 + $0x70] sm:$0xff] (%p1920_p6) }
 0x236   : > { %v3291_v19 = vpack.c.bf16 (%p1920_p6), %v1939_v18, %v1938_v16  ;;  %v1941_v21 = vld [vmem:[%s4472_s4 + $0x78] sm:$0xff] (%p1920_p6)  ;;  %v2083_v24 = vld [vmem:[%s4473_s5] sm:$0xff] (%p1920_p6)  ;;  %v2084_v25 = vld [vmem:[%s4473_s5 + $0x8] sm:$0xff] (%p1920_p6) }
 0x237   : > { %v3294_v23 = vpack.c.bf16 (%p1920_p6), %v1941_v21, %v1940_v20  ;;  %v1925_v26 = vld [vmem:[#allocation2] sm:$0x1] (%p1920_p6)  ;;  %v2012_v28 = vld [vmem:[#allocation3] sm:$0x1] (%p1920_p6)  ;;  %v3321_v29 = vpack.c.bf16 (%p1920_p6), %v2084_v25, %v2083_v24  ;;  %v2085_v30 = vld [vmem:[%s4473_s5 + $0x10] sm:$0xff] (%p1920_p6) }
 0x238   : > { %3277 = vmatpush3.bf16.msra.mxu0 (%p1920_p6), %v3276_v61  ;;  %3301 = vmatpush3.bf16.msra.mxu1 (%p1920_p6), %v3276_v61  ;;  %v2086_v31 = vld [vmem:[%s4473_s5 + $0x18] sm:$0xff] (%p1920_p6)  ;;  %v2087_v34 = vld [vmem:[%s4473_s5 + $0x20] sm:$0xff] (%p1920_p6)  ;;  %v2088_v35 = vld [vmem:[%s4473_s5 + $0x28] sm:$0xff] (%p1920_p6) }
 0x239   : > { %3278 = vmatprep.subr.bf16.mxu0 %v3572_v57  ;;  %3302 = vmatprep.subr.bf16.mxu1 %v3572_v57  ;;  %v3324_v33 = vpack.c.bf16 %v2086_v31, %v2085_v30  ;;  %v3327_v36 = vpack.c.bf16 %v2088_v35, %v2087_v34  ;;  %v2089_v38 = vld [vmem:[%s4473_s5 + $0x30] sm:$0xff]  ;;  %v2090_v39 = vld [vmem:[%s4473_s5 + $0x38] sm:$0xff]  ;;  %v2091_v42 = vld [vmem:[%s4473_s5 + $0x40] sm:$0xff] }
 0x23a   : > { %v3330_v41 = vpack.c.bf16 %v2090_v39, %v2089_v38  ;;  %v2092_v43 = vld [vmem:[%s4473_s5 + $0x48] sm:$0xff]  ;;  %v2093_v45 = vld [vmem:[%s4473_s5 + $0x50] sm:$0xff]  ;;  %v2094_v46 = vld [vmem:[%s4473_s5 + $0x58] sm:$0xff] }
 0x23b   : > { %v3333_v44 = vpack.c.bf16 %v2092_v43, %v2091_v42  ;;  %v3336_v8 = vpack.c.bf16 %v2094_v46, %v2093_v45  ;;  %v2095_v3 = vld [vmem:[%s4473_s5 + $0x60] sm:$0xff]  ;;  %v2096_v47 = vld [vmem:[%s4473_s5 + $0x68] sm:$0xff]  ;;  %v2097_v48 = vld [vmem:[%s4473_s5 + $0x70] sm:$0xff] }
 0x23c   : > { %3280 = vmatpush3.bf16.msra.mxu0 %v3279_v0  ;;  %3304 = vmatpush3.bf16.msra.mxu1 %v3279_v0  ;;  %v3339_v13 = vpack.c.bf16 %v2096_v47, %v2095_v3  ;;  %v2098_v49 = vld [vmem:[%s4473_s5 + $0x78] sm:$0xff]  ;;  %v2249_v1 = vld [vmem:[%s4470_s2] sm:$0x1] }
 0x23d   : > { %3281 = vmatprep.subr.bf16.mxu0 %v3572_v57  ;;  %3305 = vmatprep.subr.bf16.mxu1 %v3572_v57  ;;  %v3342_v50 = vpack.c.bf16 %v2098_v49, %v2097_v48  ;;  %v2247_v5 = vld [vmem:[%s4471_s3] sm:$0x1] }
 0x240   : > { %3283 = vmatpush3.bf16.msra.mxu0 %v3282_v4  ;;  %3307 = vmatpush3.bf16.msra.mxu1 %v3282_v4 }
 0x241   : > { %3284 = vmatprep.subr.bf16.mxu0 %v3572_v57  ;;  %3308 = vmatprep.subr.bf16.mxu1 %v3572_v57 }
 0x244   : > { %3286 = vmatpush3.bf16.msra.mxu0 %v3285_v7  ;;  %3310 = vmatpush3.bf16.msra.mxu1 %v3285_v7 }
 0x245   : > { %3287 = vmatprep.subr.bf16.mxu0 %v3572_v57  ;;  %3311 = vmatprep.subr.bf16.mxu1 %v3572_v57 }
 0x248   : > { %3289 = vmatpush3.bf16.msra.mxu0 %v3288_v15  ;;  %3313 = vmatpush3.bf16.msra.mxu1 %v3288_v15 }
 0x249   : > { %3290 = vmatprep.subr.bf16.mxu0 %v3572_v57  ;;  %3314 = vmatprep.subr.bf16.mxu1 %v3572_v57 }
 0x24c   : > { %3292 = vmatpush3.bf16.msra.mxu0 %v3291_v19  ;;  %3316 = vmatpush3.bf16.msra.mxu1 %v3291_v19 }
 0x24d   : > { %3293 = vmatprep.subr.bf16.mxu0 %v3572_v57  ;;  %3317 = vmatprep.subr.bf16.mxu1 %v3572_v57 }
 0x250   : > { %3295 = vmatpush3.bf16.msra.mxu0 %v3294_v23  ;;  %3319 = vmatpush3.bf16.msra.mxu1 %v3294_v23 }
 0x251   : > { %3320 = vmatprep.subr.bf16.mxu0 %v3572_v57  ;;  %3344 = vmatprep.subr.bf16.mxu1 %v3572_v57 }
 0x253   : > { %3111 = vmatmul.mubr.f32.vlgmr.msra.gmra.mrb[0].mxu0 %v1925_v26  ;;  %3146 = vmatmul.mubr.f32.vlgmr.msra.gmra.mrb[0].mxu1 %v2012_v28 }
 0x254   : > { %3322 = vmatpush3.bf16.msra.mxu0 %v3321_v29  ;;  %3346 = vmatpush3.bf16.msra.mxu1 %v3321_v29 }
 0x255   : > { %3323 = vmatprep.subr.bf16.mxu0 %v3572_v57  ;;  %3347 = vmatprep.subr.bf16.mxu1 %v3572_v57 }
 0x256   : > { %3180 = vmatprep.mubr.msk.f32.mxu0 %vm3573_vm2, %v3574_v60  ;;  %3215 = vmatprep.mubr.msk.f32.mxu1 %vm3573_vm2, %v3574_v60 }
 0x258   : > { %3325 = vmatpush3.bf16.msra.mxu0 %v3324_v33  ;;  %3349 = vmatpush3.bf16.msra.mxu1 %v3324_v33 }
 0x259   : > { %3326 = vmatprep.subr.bf16.mxu0 %v3572_v57  ;;  %3350 = vmatprep.subr.bf16.mxu1 %v3572_v57 }
 0x25c   : > { %3328 = vmatpush3.bf16.msra.mxu0 %v3327_v36  ;;  %3352 = vmatpush3.bf16.msra.mxu1 %v3327_v36 }
 0x25d   : > { %3329 = vmatprep.subr.bf16.mxu0 %v3572_v57  ;;  %3353 = vmatprep.subr.bf16.mxu1 %v3572_v57 }
 0x260   : > { %3331 = vmatpush3.bf16.msra.mxu0 %v3330_v41  ;;  %3355 = vmatpush3.bf16.msra.mxu1 %v3330_v41 }
 0x261   : > { %3332 = vmatprep.subr.bf16.mxu0 %v3572_v57  ;;  %3356 = vmatprep.subr.bf16.mxu1 %v3572_v57 }
 0x264   : > { %3334 = vmatpush3.bf16.msra.mxu0 %v3333_v44  ;;  %3358 = vmatpush3.bf16.msra.mxu1 %v3333_v44 }
 0x265   : > { %3335 = vmatprep.subr.bf16.mxu0 %v3572_v57  ;;  %3359 = vmatprep.subr.bf16.mxu1 %v3572_v57 }
 0x268   : > { %3337 = vmatpush3.bf16.msra.mxu0 %v3336_v8  ;;  %3361 = vmatpush3.bf16.msra.mxu1 %v3336_v8 }
 0x269   : > { %3338 = vmatprep.subr.bf16.mxu0 %v3572_v57  ;;  %3362 = vmatprep.subr.bf16.mxu1 %v3572_v57 }
 0x26c   : > { %3340 = vmatpush3.bf16.msra.mxu0 %v3339_v13  ;;  %3364 = vmatpush3.bf16.msra.mxu1 %v3339_v13 }
 0x26d   : > { %3341 = vmatprep.subr.bf16.mxu0 %v3572_v57  ;;  %3365 = vmatprep.subr.bf16.mxu1 %v3572_v57  ;;  %v2244_v57 = vld [vmem:[%s4470_s2] sm:$0x1] }
 0x270   : > { %3343 = vmatpush3.bf16.msra.mxu0 %v3342_v50  ;;  %3367 = vmatpush3.bf16.msra.mxu1 %v3342_v50 }
 0x326   : > { %v2008_v51 = vpop.f32.mrb[0].mxu0  ;;  %v2079_v52 = vpop.f32.mrb[0].mxu1 }
 0x327   : > { %v3112_v53 = vpop.f32.mrb[1].mxu0  ;;  %3181 = vmatmul.mubr.f32.vlgmr.msra.gmra.mrb[2].mxu0 %v2008_v51  ;;  %v3147_v54 = vpop.f32.mrb[1].mxu1  ;;  %3216 = vmatmul.mubr.f32.vlgmr.msra.gmra.mrb[2].mxu1 %v2079_v52 }
 0x3fa   : > { %v2165_v55 = vpop.f32.mrb[2].mxu0  ;;  %v2235_v56 = vpop.f32.mrb[2].mxu1 }
 0x3fb   : > { %v2239_v58 = vmul.f32 %v2165_v55, %v2165_v55  ;;  %v3182_v59 = vpop.f32.mrb[3].mxu0  ;;  %v3217_v60 = vpop.f32.mrb[3].mxu1 }
 0x3fd   : > { %v2240_v61 = vsub.f32 %v2235_v56, %v2239_v58 }
 0x3ff   : > { %v2241_v62 = vmax.f32 %v2240_v61, 0.0 }
 0x401   : > { %v2242_v63 = vadd.f32 1e-05, %v2241_v62 }
 0x403   : > { %3541 = vrsqrt.f32 %v2242_v63 }
 0x40d   : > { %v3542_v0 = vpop.eup %3541 }
 0x40e   : > { %v2245_v2 = vmul.f32 %v3542_v0, %v2244_v57  ;;  %v2248_v4 = vmul.f32 %v3542_v0, %v2165_v55 }
 0x410   : > { %2246 = vst [vmem:[#allocation4] sm:$0x1] %v2245_v2  ;;  %v2250_v11 = vmul.f32 %v2249_v1, %v2248_v4 }
 0x412   : > { %v2251_v7 = vsub.f32 %v2247_v5, %v2250_v11 }
 0x414   : > { %2252 = vst [vmem:[#allocation5] sm:$0x1] %v2251_v7 }
 0x415 PF: > { %p2569_p7 = scmp.ne.s32.totalorder %s3557_s24, 1 }
 0x417   : > { %2255 = sbr.rel (%p2569_p7) target bundleno = 1061 (0x425), region = 64  ;;  %v2570_v10 = vld [vmem:[#allocation4] ss:$0 sm:$0xff] (!%p2569_p7) }
 0x418   : > { %v2263_v15 = vmul.f32 (!%p2569_p7), %v4210_v6, %v2570_v10  ;;  %v2264_v16 = vmul.f32 (!%p2569_p7), %v4212_v9, %v2570_v10  ;;  %v2265_v18 = vmul.f32 (!%p2569_p7), %v4214_v14, %v2570_v10  ;;  %v2266_v19 = vmul.f32 (!%p2569_p7), %v4216_v17, %v2570_v10 }
 0x419   : > { %v2267_v20 = vmul.f32 (!%p2569_p7), %v4218_v22, %v2570_v10  ;;  %v2268_v21 = vmul.f32 (!%p2569_p7), %v4220_v27, %v2570_v10  ;;  %v2269_v23 = vmul.f32 (!%p2569_p7), %v4222_v32, %v2570_v10  ;;  %v2270_v24 = vmul.f32 (!%p2569_p7), %v4224_v37, %v2570_v10 }
 0x41a   : > { %v2271_v32 = vmul.f32 (!%p2569_p7), %v4226_v40, %v2570_v10 }
 0x41b   : > { %v2571_v12 = vld [vmem:[#allocation5] ss:$0 sm:$0xff] (!%p2569_p7) }
 0x41c   : > { %v2279_v25 = vadd.f32 (!%p2569_p7), %v2571_v12, %v2263_v15  ;;  %v2280_v26 = vadd.f32 (!%p2569_p7), %v2571_v12, %v2264_v16  ;;  %v2281_v28 = vadd.f32 (!%p2569_p7), %v2571_v12, %v2265_v18  ;;  %v2282_v29 = vadd.f32 (!%p2569_p7), %v2571_v12, %v2266_v19 }
 0x41d   : > { %v2283_v30 = vadd.f32 (!%p2569_p7), %v2571_v12, %v2267_v20  ;;  %v2284_v6 = vadd.f32 (!%p2569_p7), %v2571_v12, %v2268_v21  ;;  %v2285_v31 = vadd.f32 (!%p2569_p7), %v2571_v12, %v2269_v23  ;;  %v2286_v9 = vadd.f32 (!%p2569_p7), %v2571_v12, %v2270_v24 }
 0x41e   : > { %v2288_v33 = vmax.f32 %v2279_v25, 0.0  ;;  %v2289_v14 = vmax.f32 %v2280_v26, 0.0  ;;  %v2290_v34 = vmax.f32 %v2281_v28, 0.0  ;;  %v2291_v17 = vmax.f32 %v2282_v29, 0.0 }
 0x41f   : > { %v2292_v35 = vmax.f32 %v2283_v30, 0.0  ;;  %v2293_v22 = vmax.f32 %v2284_v6, 0.0  ;;  %v2294_v36 = vmax.f32 %v2285_v31, 0.0  ;;  %v2295_v27 = vmax.f32 %v2286_v9, 0.0 }
 0x420   : > { %2297 = vst [vmem:[%s4475_s7] sm:$0xff] %v2288_v33  ;;  %2298 = vst [vmem:[%s4475_s7 + $0x8] sm:$0xff] %v2289_v14  ;;  %v2287_v37 = vadd.f32 %v2571_v12, %v2271_v32 }
 0x421   : > { %2299 = vst [vmem:[%s4475_s7 + $0x10] sm:$0xff] %v2290_v34  ;;  %2300 = vst [vmem:[%s4475_s7 + $0x18] sm:$0xff] %v2291_v17 }
 0x422   : > { %2301 = vst [vmem:[%s4475_s7 + $0x20] sm:$0xff] %v2292_v35  ;;  %2302 = vst [vmem:[%s4475_s7 + $0x28] sm:$0xff] %v2293_v22  ;;  %v2296_v38 = vmax.f32 %v2287_v37, 0.0 }
 0x423   : > { %2303 = vst [vmem:[%s4475_s7 + $0x30] sm:$0xff] %v2294_v36  ;;  %2304 = vst [vmem:[%s4475_s7 + $0x38] sm:$0xff] %v2295_v27 }
 0x424   : > { %2305 = vst [vmem:[%s4475_s7 + $0x40] sm:$0xff] %v2296_v38 }
 0x425 PF: > { %s17_s26 = sadd.s32 1, %s3565_s26   ;;  %s4476_s24 = smov %s3561_s25 }
 0x426   : > { %p14_p8 = scmp.ge.s32.totalorder %s17_s26, 4   ;;  %s4477_s25 = smov %s4479_s27 }
 0x428   :  { %16 = sbr.rel (!%p14_p8) target bundleno = 2 (0x2), region = 114 }

// kernel: dcgan_g_forward.4
= control target key start
LH: loop header
LB: loop body
LE: loop exit
PB: predicated region body
PF: predicated region fallthrough
CT: control target
= control target key end

     0   :  { %s6090_s24 = smov 0   ;;  %s6092_s25 = smov 0   ;;  %s8065_s0 = inlined_call_operand.vmem [shape: f32[224,16], index: 0, kind: input, shape index: {}]   ;;  %s8066_s1 = inlined_call_operand.vmem [shape: f32[9,16,128], index: 1, kind: input, shape index: {}]   ;;  %s8067_s2 = inlined_call_operand.vmem [shape: f32[1,128], index: 2, kind: input, shape index: {}]   ;;  %s8068_s3 = inlined_call_operand.vmem [shape: f32[1,128], index: 3, kind: input, shape index: {}]   ;;  %s8069_s4 = inlined_call_operand.vmem [shape: f32[128,128], index: 4, kind: input, shape index: {}]   ;;  %s8070_s5 = inlined_call_operand.vmem [shape: f32[128,128], index: 5, kind: input, shape index: {}]   ;;  %s8071_s6 = inlined_call_operand.vmem [shape: f32[200,1], index: 6, kind: input, shape index: {}]   ;;  %s8072_s7 = inlined_call_operand.vmem [shape: f32[200,128], index: 7, kind: output, shape index: {}]  }
   0x1   :  { %s6094_s26 = smov 0  }
   0x2 LB: > { %s32_s27 = sadd.s32 1, %s6036_s25  ;;  %p4066_p0 = scmp.ge.s32.totalorder %s6040_s26, 1  ;;  %s6040_s26 = sphi %s6094_s26, %s17_s26   ;;  %s6036_s25 = sphi %s6092_s25, %s8074_s25   ;;  %s6032_s24 = sphi %s6090_s24, %s8073_s24  }
   0x3   : > { %p34_p1 = scmp.ge.s32.totalorder %s32_s27, 2  ;;  %p297_p2 = scmp.lt.s32.totalorder %s6040_s26, 3 }
   0x5   : > { %s8076_s27 = smov (%p34_p1, %s32_s27), 0  ;;  %p298_p3 = pnand %p4066_p0, %p297_p2 }
   0x6   : > { %v4067_v0 = vld [vmem:[%s8066_s1 + $0x10] sm:$0xff] (!%p298_p3)  ;;  %v4068_v1 = vld [vmem:[%s8066_s1 + $0x18] sm:$0xff] (!%p298_p3)  ;;  %v4173_v2 = vld [vmem:[%s8066_s1 + $0x40] sm:$0xff] (!%p298_p3)  ;;  %v6042_v3 = vmov (!%p298_p3), 0.0|0.0   ;;  %vm6043_vm0 = vmmov (!%p298_p3), 0   ;;  %v6044_v7 = vmov (!%p298_p3), 0.0  }
   0x7   : > { %301 = sbr.rel (%p298_p3) target bundleno = 1390 (0x56e), region = 48  ;;  %5482 = vmatprep.subr.bf16.mxu1 (!%p298_p3), %v6042_v3  ;;  %5494 = vmatprep.subr.bf16.mxu0 (!%p298_p3), %v6042_v3  ;;  %v5483_v4 = vpack.c.bf16 (!%p298_p3), %v4068_v1, %v4067_v0  ;;  %v4174_v5 = vld [vmem:[%s8066_s1 + $0x48] sm:$0xff] (!%p298_p3)  ;;  %v4200_v8 = vld [vmem:[%s8066_s1 + $0x50] sm:$0xff] (!%p298_p3)  ;;  %v4201_v9 = vld [vmem:[%s8066_s1 + $0x58] sm:$0xff] (!%p298_p3)  ;;  %vm436_vm1 = vcmask (!%p298_p3), 130048   ;;  %p3193_p4 = scmp.eq.s32.totalorder (!%p298_p3), %s6032_s24, 0 }
   0x8   : > { %v6124_v6 = vpack.c.bf16 (!%p298_p3), %v4174_v5, %v4173_v2  ;;  %4635 = vmatprep.mubr.msk.f32.mxu1 (!%p298_p3), %vm6043_vm0, %v6044_v7  ;;  %4951 = vmatprep.mubr.msk.f32.mxu0 (!%p298_p3), %vm6043_vm0, %v6044_v7  ;;  %v408_v10 = vld [vmem:[%s8065_s0 + $0x1] sm:$0xff] (!%p298_p3)  ;;  %v1603_v13 = vld [vmem:[%s8065_s0 + $0xb] sm:$0xff] (!%p298_p3)  ;;  %v5498_v14 = vpack.c.bf16 (!%p298_p3), %v4201_v9, %v4200_v8  ;;  %v1604_v17 = vld [vmem:[%s8065_s0 + $0x13] sm:$0xff] (!%p298_p3) }
   0x9   : > { %5484 = vmatpush3.bf16.msra.mxu1 (!%p298_p3), %v5483_v4  ;;  %v406_v11 = vld [vmem:[%s8066_s1] sm:$0xff] (!%p298_p3)  ;;  %v407_v12 = vld [vmem:[%s8066_s1 + $0x8] sm:$0xff] (!%p298_p3)  ;;  %v410_v18 = vld [vmem:[%s8065_s0 + $0x11] sm:$0xff] (!%p298_p3) }
   0xa   : > { %5496 = vmatpush3.bf16.msra.mxu0 (!%p298_p3), %v6124_v6  ;;  %5485 = vmatprep.subr.bf16.mxu1 (!%p298_p3), %v6042_v3  ;;  %v5486_v15 = vpack.c.bf16 (!%p298_p3), %v407_v12, %v406_v11  ;;  %v409_v16 = vld [vmem:[%s8065_s0 + $0x9] sm:$0xff] (!%p298_p3)  ;;  %v1605_v19 = vld [vmem:[%s8065_s0 + $0x1b] sm:$0xff] (!%p298_p3)  ;;  %v1608_v25 = vld [vmem:[%s8065_s0 + $0x33] sm:$0xff] (!%p298_p3) }
   0xb   : > { %5497 = vmatprep.subr.bf16.mxu0 (!%p298_p3), %v6042_v3  ;;  %v411_v20 = vld [vmem:[%s8065_s0 + $0x19] sm:$0xff] (!%p298_p3)  ;;  %v1606_v21 = vld [vmem:[%s8065_s0 + $0x23] sm:$0xff] (!%p298_p3)  ;;  %v1607_v23 = vld [vmem:[%s8065_s0 + $0x2b] sm:$0xff] (!%p298_p3) }
   0xc   : > { %4636 = vmatmul.mubr.msk.f32.vlgmr.msra.gmra.mrb[0].mxu1 (!%p298_p3), %vm436_vm1, %v408_v10  ;;  %v412_v22 = vld [vmem:[%s8065_s0 + $0x21] sm:$0xff] (!%p298_p3)  ;;  %v413_v24 = vld [vmem:[%s8065_s0 + $0x29] sm:$0xff] (!%p298_p3)  ;;  %v414_v26 = vld [vmem:[%s8065_s0 + $0x31] sm:$0xff] (!%p298_p3) }
   0xd   : > { %4952 = vmatmul.mubr.msk.f32.vlgmr.msra.gmra.mrb[0].mxu0 (!%p298_p3), %vm436_vm1, %v1603_v13  ;;  %4638 = vmatprep.mubr.msk.f32.mxu1 (!%p298_p3), %vm6043_vm0, %v6044_v7  ;;  %v1609_v27 = vld [vmem:[%s8065_s0 + $0x3b] sm:$0xff] (!%p298_p3)  ;;  %v1610_v29 = vld [vmem:[%s8065_s0 + $0x43] sm:$0xff] (!%p298_p3)  ;;  %v1611_v31 = vld [vmem:[%s8065_s0 + $0x4b] sm:$0xff] (!%p298_p3) }
   0xe   : > { %5499 = vmatpush3.bf16.msra.mxu0 %v5498_v14  ;;  %4954 = vmatprep.mubr.msk.f32.mxu0 %vm6043_vm0, %v6044_v7  ;;  %v415_v28 = vld [vmem:[%s8065_s0 + $0x39] sm:$0xff]  ;;  %v416_v30 = vld [vmem:[%s8065_s0 + $0x41] sm:$0xff]  ;;  %v417_v32 = vld [vmem:[%s8065_s0 + $0x49] sm:$0xff] }
   0xf   : > { %5487 = vmatpush3.bf16.msra.mxu1 %v5486_v15  ;;  %5500 = vmatprep.subr.bf16.mxu0 %v6042_v3  ;;  %v1612_v33 = vld [vmem:[%s8065_s0 + $0x53] sm:$0xff]  ;;  %v1613_v35 = vld [vmem:[%s8065_s0 + $0x5b] sm:$0xff]  ;;  %v1614_v37 = vld [vmem:[%s8065_s0 + $0x63] sm:$0xff] }
  0x10   : > { %4639 = vmatmul.mubr.msk.f32.gmra.mrb[2].mxu1 %vm436_vm1, %v409_v16  ;;  %5488 = vmatprep.subr.bf16.mxu1 %v6042_v3  ;;  %v418_v34 = vld [vmem:[%s8065_s0 + $0x51] sm:$0xff]  ;;  %v419_v36 = vld [vmem:[%s8065_s0 + $0x59] sm:$0xff]  ;;  %v420_v38 = vld [vmem:[%s8065_s0 + $0x61] sm:$0xff] }
  0x11   : > { %4955 = vmatmul.mubr.msk.f32.gmra.mrb[2].mxu0 %vm436_vm1, %v1604_v17  ;;  %4641 = vmatprep.mubr.msk.f32.mxu1 %vm6043_vm0, %v6044_v7  ;;  %v1615_v39 = vld [vmem:[%s8065_s0 + $0x6b] sm:$0xff]  ;;  %v4227_v40 = vld [vmem:[%s8066_s1 + $0x60] sm:$0xff]  ;;  %v6327_v46 = vld [vmem:[%s8065_s0 + $0x14] sm:$0xff] }
  0x12   : > { %4957 = vmatprep.mubr.msk.f32.mxu0 %vm6043_vm0, %v6044_v7  ;;  %v4228_v41 = vld [vmem:[%s8066_s1 + $0x68] sm:$0xff]  ;;  %v422_v45 = vld [vmem:[%s8065_s0 + $0x71] sm:$0xff]  ;;  %v423_v47 = vld [vmem:[%s8065_s0 + $0x79] sm:$0xff] }
  0x13   : > { %v421_v42 = vld [vmem:[%s8065_s0 + $0x69] sm:$0xff]  ;;  %v5501_v44 = vpack.c.bf16 %v4228_v41, %v4227_v40  ;;  %v6343_v48 = vld [vmem:[%s8065_s0 + $0x1c] sm:$0xff]  ;;  %v426_v53 = vld [vmem:[%s8065_s0 + $0x91] sm:$0xff] }
  0x14   : > { %4642 = vmatmul.mubr.msk.f32.gmra.mrb[4].mxu1 %vm436_vm1, %v410_v18  ;;  %v1921_v43 = vld [vmem:[%s8065_s0 + $0xc] sm:$0xff]  ;;  %v424_v49 = vld [vmem:[%s8065_s0 + $0x81] sm:$0xff]  ;;  %v6388_v54 = vld [vmem:[%s8065_s0 + $0x34] sm:$0xff] }
  0x15   : > { %4958 = vmatmul.mubr.msk.f32.gmra.mrb[4].mxu0 %vm436_vm1, %v1605_v19  ;;  %4644 = vmatprep.mubr.msk.f32.mxu1 %vm6043_vm0, %v6044_v7  ;;  %v6358_v50 = vld [vmem:[%s8065_s0 + $0x24] sm:$0xff]  ;;  %v6373_v52 = vld [vmem:[%s8065_s0 + $0x2c] sm:$0xff]  ;;  %v427_v55 = vld [vmem:[%s8065_s0 + $0x99] sm:$0xff] }
  0x16   : > { %4960 = vmatprep.mubr.msk.f32.mxu0 %vm6043_vm0, %v6044_v7  ;;  %v425_v51 = vld [vmem:[%s8065_s0 + $0x89] sm:$0xff]  ;;  %v6403_v56 = vld [vmem:[%s8065_s0 + $0x3c] sm:$0xff]  ;;  %v430_v61 = vld [vmem:[%s8065_s0 + $0xb1] sm:$0xff] }
  0x17   : > { %v428_v57 = vld [vmem:[%s8065_s0 + $0xa1] sm:$0xff]  ;;  %v429_v59 = vld [vmem:[%s8065_s0 + $0xa9] sm:$0xff]  ;;  %v6448_v62 = vld [vmem:[%s8065_s0 + $0x54] sm:$0xff] }
  0x18   : > { %4645 = vmatmul.mubr.msk.f32.gmra.mrb[6].mxu1 %vm436_vm1, %v411_v20  ;;  %v6418_v58 = vld [vmem:[%s8065_s0 + $0x44] sm:$0xff]  ;;  %v6433_v60 = vld [vmem:[%s8065_s0 + $0x4c] sm:$0xff]  ;;  %v431_v63 = vld [vmem:[%s8065_s0 + $0xb9] sm:$0xff] }
  0x19   : > { %4961 = vmatmul.mubr.msk.f32.gmra.mrb[6].mxu0 %vm436_vm1, %v1606_v21  ;;  %4647 = vmatprep.mubr.msk.f32.mxu1 %vm6043_vm0, %v6044_v7  ;;  %v6463_v0 = vld [vmem:[%s8065_s0 + $0x5c] sm:$0xff]  ;;  %v6478_v2 = vld [vmem:[%s8065_s0 + $0x64] sm:$0xff]  ;;  %v6499_v9 = vld [vmem:[%s8065_s0 + $0x6c] sm:$0xff] }
  0x1a   : > { %4963 = vmatprep.mubr.msk.f32.mxu0 %vm6043_vm0, %v6044_v7  ;;  %v432_v1 = vld [vmem:[%s8065_s0 + $0xc1] sm:$0xff]  ;;  %v6514_v12 = vld [vmem:[%s8065_s0 + $0x74] sm:$0xff]  ;;  %v6560_v18 = vld [vmem:[%s8065_s0 + $0x8c] sm:$0xff] }
  0x1b   : > { %v4119_v4 = vld [vmem:[%s8066_s1 + $0x20] sm:$0xff]  ;;  %v4120_v5 = vld [vmem:[%s8066_s1 + $0x28] sm:$0xff]  ;;  %v383_v13 = vld [vmem:[%s8065_s0 + $0x10] sm:$0xff] }
  0x1c   : > { %4648 = vmatmul.mubr.msk.f32.gmra.mrb[8].mxu1 %vm436_vm1, %v412_v22  ;;  %v381_v8 = vld [vmem:[%s8065_s0] sm:$0xff]  ;;  %v5489_v10 = vpack.c.bf16 %v4120_v5, %v4119_v4  ;;  %v382_v11 = vld [vmem:[%s8065_s0 + $0x8] sm:$0xff]  ;;  %v384_v15 = vld [vmem:[%s8065_s0 + $0x18] sm:$0xff] }
  0x1d   : > { %4964 = vmatmul.mubr.msk.f32.gmra.mrb[8].mxu0 %vm436_vm1, %v1607_v23  ;;  %4650 = vmatprep.mubr.msk.f32.mxu1 %vm6043_vm0, %v6044_v7  ;;  %v6530_v14 = vld [vmem:[%s8065_s0 + $0x7c] sm:$0xff]  ;;  %v6545_v16 = vld [vmem:[%s8065_s0 + $0x84] sm:$0xff]  ;;  %v6575_v20 = vld [vmem:[%s8065_s0 + $0x94] sm:$0xff] }
  0x1e   : > { %4966 = vmatprep.mubr.msk.f32.mxu0 %vm6043_vm0, %v6044_v7  ;;  %v385_v17 = vld [vmem:[%s8065_s0 + $0x20] sm:$0xff]  ;;  %v386_v19 = vld [vmem:[%s8065_s0 + $0x28] sm:$0xff]  ;;  %v387_v21 = vld [vmem:[%s8065_s0 + $0x30] sm:$0xff] }
  0x1f   : > { %v6590_v22 = vld [vmem:[%s8065_s0 + $0x9c] sm:$0xff]  ;;  %v4282_v4 = vld [vmem:[%s8066_s1 + $0x88] sm:$0xff] }
  0x20   : > { %4651 = vmatmul.mubr.msk.f32.gmra.mrb[10].mxu1 %vm436_vm1, %v413_v24  ;;  %v388_v23 = vld [vmem:[%s8065_s0 + $0x38] sm:$0xff]  ;;  %v6605_v24 = vld [vmem:[%s8065_s0 + $0xa4] sm:$0xff] }
  0x21   : > { %4967 = vmatmul.mubr.msk.f32.gmra.mrb[10].mxu0 %vm436_vm1, %v1608_v25  ;;  %4653 = vmatprep.mubr.msk.f32.mxu1 %vm6043_vm0, %v6044_v7  ;;  %v389_v25 = vld [vmem:[%s8065_s0 + $0x40] sm:$0xff]  ;;  %v396_v40 = vld [vmem:[%s8065_s0 + $0x78] sm:$0xff]  ;;  %v6998_v5 = vld [vmem:[%s8065_s0 + $0x6a] sm:$0xff] }
  0x22   : > { %4969 = vmatprep.mubr.msk.f32.mxu0 %vm6043_vm0, %v6044_v7  ;;  %v397_v41 = vld [vmem:[%s8065_s0 + $0x80] sm:$0xff] }
  0x24   : > { %4654 = vmatmul.mubr.msk.f32.gmra.mrb[12].mxu1 %vm436_vm1, %v414_v26  ;;  %v6620_v26 = vld [vmem:[%s8065_s0 + $0xac] sm:$0xff] }
  0x25   : > { %4970 = vmatmul.mubr.msk.f32.gmra.mrb[12].mxu0 %vm436_vm1, %v1609_v27  ;;  %4656 = vmatprep.mubr.msk.f32.mxu1 %vm6043_vm0, %v6044_v7  ;;  %v390_v27 = vld [vmem:[%s8065_s0 + $0x48] sm:$0xff] }
  0x26   : > { %4972 = vmatprep.mubr.msk.f32.mxu0 %vm6043_vm0, %v6044_v7 }
  0x28   : > { %4657 = vmatmul.mubr.msk.f32.gmra.mrb[14].mxu1 %vm436_vm1, %v415_v28  ;;  %v6635_v28 = vld [vmem:[%s8065_s0 + $0xb4] sm:$0xff] }
  0x29   : > { %4973 = vmatmul.mubr.msk.f32.gmra.mrb[14].mxu0 %vm436_vm1, %v1610_v29  ;;  %4659 = vmatprep.mubr.msk.f32.mxu1 %vm6043_vm0, %v6044_v7  ;;  %v391_v29 = vld [vmem:[%s8065_s0 + $0x50] sm:$0xff] }
  0x2a   : > { %4975 = vmatprep.mubr.msk.f32.mxu0 %vm6043_vm0, %v6044_v7 }
  0x2c   : > { %4660 = vmatmul.mubr.msk.f32.gmra.mrb[16].mxu1 %vm436_vm1, %v416_v30  ;;  %v6650_v30 = vld [vmem:[%s8065_s0 + $0xbc] sm:$0xff] }
  0x2d   : > { %4976 = vmatmul.mubr.msk.f32.gmra.mrb[16].mxu0 %vm436_vm1, %v1611_v31  ;;  %4662 = vmatprep.mubr.msk.f32.mxu1 %vm6043_vm0, %v6044_v7  ;;  %v392_v31 = vld [vmem:[%s8065_s0 + $0x58] sm:$0xff] }
  0x2e   : > { %4978 = vmatprep.mubr.msk.f32.mxu0 %vm6043_vm0, %v6044_v7 }
  0x30   : > { %4663 = vmatmul.mubr.msk.f32.gmra.mrb[18].mxu1 %vm436_vm1, %v417_v32  ;;  %v6665_v32 = vld [vmem:[%s8065_s0 + $0xc4] sm:$0xff] }
  0x31   : > { %4979 = vmatmul.mubr.msk.f32.gmra.mrb[18].mxu0 %vm436_vm1, %v1612_v33  ;;  %4665 = vmatprep.mubr.msk.f32.mxu1 %vm6043_vm0, %v6044_v7  ;;  %v393_v33 = vld [vmem:[%s8065_s0 + $0x60] sm:$0xff] }
  0x32   : > { %4981 = vmatprep.mubr.msk.f32.mxu0 %vm6043_vm0, %v6044_v7 }
  0x34   : > { %4666 = vmatmul.mubr.msk.f32.gmra.mrb[20].mxu1 %vm436_vm1, %v418_v34  ;;  %v6680_v34 = vld [vmem:[%s8065_s0 + $0xcc] sm:$0xff] }
  0x35   : > { %4982 = vmatmul.mubr.msk.f32.gmra.mrb[20].mxu0 %vm436_vm1, %v1613_v35  ;;  %4668 = vmatprep.mubr.msk.f32.mxu1 %vm6043_vm0, %v6044_v7  ;;  %v4254_v35 = vld [vmem:[%s8066_s1 + $0x70] sm:$0xff] }
  0x36   : > { %4984 = vmatprep.mubr.msk.f32.mxu0 %vm6043_vm0, %v6044_v7 }
  0x38   : > { %4669 = vmatmul.mubr.msk.f32.gmra.mrb[22].mxu1 %vm436_vm1, %v419_v36  ;;  %v4255_v36 = vld [vmem:[%s8066_s1 + $0x78] sm:$0xff] }
  0x39   : > { %4985 = vmatmul.mubr.msk.f32.gmra.mrb[22].mxu0 %vm436_vm1, %v1614_v37  ;;  %4671 = vmatprep.mubr.msk.f32.mxu1 %vm6043_vm0, %v6044_v7  ;;  %v394_v37 = vld [vmem:[%s8065_s0 + $0x68] sm:$0xff] }
  0x3a   : > { %4987 = vmatprep.mubr.msk.f32.mxu0 %vm6043_vm0, %v6044_v7 }
  0x3c   : > { %4672 = vmatmul.mubr.msk.f32.gmra.mrb[24].mxu1 %vm436_vm1, %v420_v38  ;;  %v5504_v38 = vpack.c.bf16 %v4255_v36, %v4254_v35  ;;  %v2573_v35 = vld [vmem:[%s8065_s0 + $0x95] sm:$0xff]  ;;  %v2574_v36 = vld [vmem:[%s8065_s0 + $0x9d] sm:$0xff] }
  0x3d   : > { %4988 = vmatmul.mubr.msk.f32.gmra.mrb[24].mxu0 %vm436_vm1, %v1615_v39  ;;  %4674 = vmatprep.mubr.msk.f32.mxu1 %vm6043_vm0, %v6044_v7  ;;  %v395_v39 = vld [vmem:[%s8065_s0 + $0x70] sm:$0xff] }
  0x3e   : > { %5030 = vmatprep.mubr.msk.f32.mxu0 %vm6043_vm0, %v6044_v7 }
  0x40   : > { %4675 = vmatmul.mubr.msk.f32.gmra.mrb[26].mxu1 %vm436_vm1, %v421_v42  ;;  %v398_v42 = vld [vmem:[%s8065_s0 + $0x88] sm:$0xff] }
  0x41   : > { %5031 = vmatmul.mubr.msk.f32.vlgmr.msra.gmra.mrb[0].mxu0 %vm436_vm1, %v1921_v43  ;;  %4677 = vmatprep.mubr.msk.f32.mxu1 %vm6043_vm0, %v6044_v7  ;;  %v399_v43 = vld [vmem:[%s8065_s0 + $0x90] sm:$0xff] }
  0x42   : > { %5502 = vmatpush3.bf16.msra.mxu0 %v5501_v44  ;;  %5033 = vmatprep.mubr.msk.f32.mxu0 %vm6043_vm0, %v6044_v7  ;;  %v400_v44 = vld [vmem:[%s8065_s0 + $0x98] sm:$0xff] }
  0x43   : > { %5503 = vmatprep.subr.bf16.mxu0 %v6042_v3 }
  0x44   : > { %4678 = vmatmul.mubr.msk.f32.gmra.mrb[28].mxu1 %vm436_vm1, %v422_v45  ;;  %v401_v45 = vld [vmem:[%s8065_s0 + $0xa0] sm:$0xff] }
  0x45   : > { %5034 = vmatmul.mubr.msk.f32.gmra.mrb[2].mxu0 %vm436_vm1, %v6327_v46  ;;  %4680 = vmatprep.mubr.msk.f32.mxu1 %vm6043_vm0, %v6044_v7 }
  0x46   : > { %5036 = vmatprep.mubr.msk.f32.mxu0 %vm6043_vm0, %v6044_v7 }
  0x48   : > { %4681 = vmatmul.mubr.msk.f32.gmra.mrb[30].mxu1 %vm436_vm1, %v423_v47  ;;  %v403_v47 = vld [vmem:[%s8065_s0 + $0xb0] sm:$0xff] }
  0x49   : > { %5037 = vmatmul.mubr.msk.f32.gmra.mrb[4].mxu0 %vm436_vm1, %v6343_v48  ;;  %4683 = vmatprep.mubr.msk.f32.mxu1 %vm6043_vm0, %v6044_v7 }
  0x4a   : > { %5039 = vmatprep.mubr.msk.f32.mxu0 %vm6043_vm0, %v6044_v7 }
  0x4c   : > { %4684 = vmatmul.mubr.msk.f32.gmra.mrb[32].mxu1 %vm436_vm1, %v424_v49  ;;  %v405_v49 = vld [vmem:[%s8065_s0 + $0xc0] sm:$0xff] }
  0x4d   : > { %5040 = vmatmul.mubr.msk.f32.gmra.mrb[6].mxu0 %vm436_vm1, %v6358_v50  ;;  %4686 = vmatprep.mubr.msk.f32.mxu1 %vm6043_vm0, %v6044_v7 }
  0x4e   : > { %5042 = vmatprep.mubr.msk.f32.mxu0 %vm6043_vm0, %v6044_v7 }
  0x50   : > { %4687 = vmatmul.mubr.msk.f32.gmra.mrb[34].mxu1 %vm436_vm1, %v425_v51  ;;  %v4147_v51 = vld [vmem:[%s8066_s1 + $0x38] sm:$0xff] }
  0x51   : > { %5043 = vmatmul.mubr.msk.f32.gmra.mrb[8].mxu0 %vm436_vm1, %v6373_v52  ;;  %4689 = vmatprep.mubr.msk.f32.mxu1 %vm6043_vm0, %v6044_v7 }
  0x52   : > { %5045 = vmatprep.mubr.msk.f32.mxu0 %vm6043_vm0, %v6044_v7 }
  0x54   : > { %4690 = vmatmul.mubr.msk.f32.gmra.mrb[36].mxu1 %vm436_vm1, %v426_v53 }
  0x55   : > { %5046 = vmatmul.mubr.msk.f32.gmra.mrb[10].mxu0 %vm436_vm1, %v6388_v54  ;;  %4692 = vmatprep.mubr.msk.f32.mxu1 %vm6043_vm0, %v6044_v7 }
  0x56   : > { %5048 = vmatprep.mubr.msk.f32.mxu0 %vm6043_vm0, %v6044_v7 }
  0x58   : > { %4693 = vmatmul.mubr.msk.f32.gmra.mrb[38].mxu1 %vm436_vm1, %v427_v55  ;;  %v6847_v55 = vld [vmem:[%s8065_s0 + $0x12] sm:$0xff] }
  0x59   : > { %5049 = vmatmul.mubr.msk.f32.gmra.mrb[12].mxu0 %vm436_vm1, %v6403_v56  ;;  %4695 = vmatprep.mubr.msk.f32.mxu1 %vm6043_vm0, %v6044_v7 }
  0x5a   : > { %5051 = vmatprep.mubr.msk.f32.mxu0 %vm6043_vm0, %v6044_v7 }
  0x5c   : > { %4696 = vmatmul.mubr.msk.f32.gmra.mrb[40].mxu1 %vm436_vm1, %v428_v57  ;;  %v6886_v57 = vld [vmem:[%s8065_s0 + $0x2a] sm:$0xff] }
  0x5d   : > { %5052 = vmatmul.mubr.msk.f32.gmra.mrb[14].mxu0 %vm436_vm1, %v6418_v58  ;;  %4698 = vmatprep.mubr.msk.f32.mxu1 %vm6043_vm0, %v6044_v7 }
  0x5e   : > { %5054 = vmatprep.mubr.msk.f32.mxu0 %vm6043_vm0, %v6044_v7 }
  0x60   : > { %4699 = vmatmul.mubr.msk.f32.gmra.mrb[42].mxu1 %vm436_vm1, %v429_v59  ;;  %v6912_v59 = vld [vmem:[%s8065_s0 + $0x3a] sm:$0xff] }
  0x61   : > { %5055 = vmatmul.mubr.msk.f32.gmra.mrb[16].mxu0 %vm436_vm1, %v6433_v60  ;;  %4701 = vmatprep.mubr.msk.f32.mxu1 %vm6043_vm0, %v6044_v7 }
  0x62   : > { %5057 = vmatprep.mubr.msk.f32.mxu0 %vm6043_vm0, %v6044_v7 }
  0x64   : > { %4702 = vmatmul.mubr.msk.f32.gmra.mrb[44].mxu1 %vm436_vm1, %v430_v61  ;;  %v6938_v61 = vld [vmem:[%s8065_s0 + $0x4a] sm:$0xff] }
  0x65   : > { %5058 = vmatmul.mubr.msk.f32.gmra.mrb[18].mxu0 %vm436_vm1, %v6448_v62  ;;  %4704 = vmatprep.mubr.msk.f32.mxu1 %vm6043_vm0, %v6044_v7 }
  0x66   : > { %5060 = vmatprep.mubr.msk.f32.mxu0 %vm6043_vm0, %v6044_v7 }
  0x68   : > { %4705 = vmatmul.mubr.msk.f32.gmra.mrb[46].mxu1 %vm436_vm1, %v431_v63  ;;  %v6964_v63 = vld [vmem:[%s8065_s0 + $0x5a] sm:$0xff] }
  0x69   : > { %5061 = vmatmul.mubr.msk.f32.gmra.mrb[20].mxu0 %vm436_vm1, %v6463_v0  ;;  %4707 = vmatprep.mubr.msk.f32.mxu1 %vm6043_vm0, %v6044_v7 }
  0x6a   : > { %5063 = vmatprep.mubr.msk.f32.mxu0 %vm6043_vm0, %v6044_v7 }
  0x6c   : > { %4708 = vmatmul.mubr.msk.f32.gmra.mrb[48].mxu1 %vm436_vm1, %v432_v1  ;;  %v2263_v1 = vld [vmem:[%s8065_s0 + $0xd4] sm:$0xff] }
  0x6d   : > { %5064 = vmatmul.mubr.msk.f32.gmra.mrb[22].mxu0 %vm436_vm1, %v6478_v2  ;;  %4714 = vmatprep.mubr.msk.f32.mxu1 %vm6043_vm0, %v6044_v7 }
  0x6e   : > { %5066 = vmatprep.mubr.msk.f32.mxu0 %vm6043_vm0, %v6044_v7 }
  0x70   : > { %4715 = vmatmul.mubr.msk.f32.vlgmr.msra.gmra.mrb[0].mxu1 %vm436_vm1, %v381_v8  ;;  %v2557_v8 = vld [vmem:[%s8065_s0 + $0x15] sm:$0xff] }
  0x71   : > { %5067 = vmatmul.mubr.msk.f32.gmra.mrb[24].mxu0 %vm436_vm1, %v6499_v9  ;;  %4717 = vmatprep.mubr.msk.f32.mxu1 %vm6043_vm0, %v6044_v7 }
  0x72   : > { %5069 = vmatprep.mubr.msk.f32.mxu0 %vm6043_vm0, %v6044_v7  ;;  %5490 = vmatpush3.bf16.msra.mxu1 %v5489_v10  ;;  %v7013_v10 = vld [vmem:[%s8065_s0 + $0x72] sm:$0xff] }
  0x73   : > { %5491 = vmatprep.subr.bf16.mxu1 %v6042_v3 }
  0x74   : > { %4718 = vmatmul.mubr.msk.f32.gmra.mrb[2].mxu1 %vm436_vm1, %v382_v11  ;;  %v2558_v11 = vld [vmem:[%s8065_s0 + $0x1d] sm:$0xff] }
  0x75   : > { %5070 = vmatmul.mubr.msk.f32.gmra.mrb[26].mxu0 %vm436_vm1, %v6514_v12  ;;  %4720 = vmatprep.mubr.msk.f32.mxu1 %vm6043_vm0, %v6044_v7 }
  0x76   : > { %5072 = vmatprep.mubr.msk.f32.mxu0 %vm6043_vm0, %v6044_v7 }
  0x78   : > { %4721 = vmatmul.mubr.msk.f32.gmra.mrb[4].mxu1 %vm436_vm1, %v383_v13  ;;  %v2559_v13 = vld [vmem:[%s8065_s0 + $0x25] sm:$0xff] }
  0x79   : > { %5073 = vmatmul.mubr.msk.f32.gmra.mrb[28].mxu0 %vm436_vm1, %v6530_v14  ;;  %4723 = vmatprep.mubr.msk.f32.mxu1 %vm6043_vm0, %v6044_v7 }
  0x7a   : > { %5075 = vmatprep.mubr.msk.f32.mxu0 %vm6043_vm0, %v6044_v7 }
  0x7c   : > { %4724 = vmatmul.mubr.msk.f32.gmra.mrb[6].mxu1 %vm436_vm1, %v384_v15  ;;  %v2560_v15 = vld [vmem:[%s8065_s0 + $0x2d] sm:$0xff] }
  0x7d   : > { %5076 = vmatmul.mubr.msk.f32.gmra.mrb[30].mxu0 %vm436_vm1, %v6545_v16  ;;  %4726 = vmatprep.mubr.msk.f32.mxu1 %vm6043_vm0, %v6044_v7 }
  0x7e   : > { %5078 = vmatprep.mubr.msk.f32.mxu0 %vm6043_vm0, %v6044_v7 }
  0x80   : > { %4727 = vmatmul.mubr.msk.f32.gmra.mrb[8].mxu1 %vm436_vm1, %v385_v17  ;;  %v2561_v17 = vld [vmem:[%s8065_s0 + $0x35] sm:$0xff] }
  0x81   : > { %5079 = vmatmul.mubr.msk.f32.gmra.mrb[32].mxu0 %vm436_vm1, %v6560_v18  ;;  %4729 = vmatprep.mubr.msk.f32.mxu1 %vm6043_vm0, %v6044_v7 }
  0x82   : > { %5081 = vmatprep.mubr.msk.f32.mxu0 %vm6043_vm0, %v6044_v7 }
  0x84   : > { %4730 = vmatmul.mubr.msk.f32.gmra.mrb[10].mxu1 %vm436_vm1, %v386_v19  ;;  %v2562_v19 = vld [vmem:[%s8065_s0 + $0x3d] sm:$0xff] }
  0x85   : > { %5082 = vmatmul.mubr.msk.f32.gmra.mrb[34].mxu0 %vm436_vm1, %v6575_v20  ;;  %4732 = vmatprep.mubr.msk.f32.mxu1 %vm6043_vm0, %v6044_v7 }
  0x86   : > { %5084 = vmatprep.mubr.msk.f32.mxu0 %vm6043_vm0, %v6044_v7 }
  0x88   : > { %4733 = vmatmul.mubr.msk.f32.gmra.mrb[12].mxu1 %vm436_vm1, %v387_v21  ;;  %v2563_v21 = vld [vmem:[%s8065_s0 + $0x45] sm:$0xff] }
  0x89   : > { %5085 = vmatmul.mubr.msk.f32.gmra.mrb[36].mxu0 %vm436_vm1, %v6590_v22  ;;  %4735 = vmatprep.mubr.msk.f32.mxu1 %vm6043_vm0, %v6044_v7 }
  0x8a   : > { %5087 = vmatprep.mubr.msk.f32.mxu0 %vm6043_vm0, %v6044_v7 }
  0x8c   : > { %4736 = vmatmul.mubr.msk.f32.gmra.mrb[14].mxu1 %vm436_vm1, %v388_v23  ;;  %v2564_v23 = vld [vmem:[%s8065_s0 + $0x4d] sm:$0xff] }
  0x8d   : > { %5088 = vmatmul.mubr.msk.f32.gmra.mrb[38].mxu0 %vm436_vm1, %v6605_v24  ;;  %4738 = vmatprep.mubr.msk.f32.mxu1 %vm6043_vm0, %v6044_v7 }
  0x8e   : > { %5090 = vmatprep.mubr.msk.f32.mxu0 %vm6043_vm0, %v6044_v7 }
  0x90   : > { %4739 = vmatmul.mubr.msk.f32.gmra.mrb[16].mxu1 %vm436_vm1, %v389_v25  ;;  %v2565_v25 = vld [vmem:[%s8065_s0 + $0x55] sm:$0xff] }
  0x91   : > { %5091 = vmatmul.mubr.msk.f32.gmra.mrb[40].mxu0 %vm436_vm1, %v6620_v26  ;;  %4741 = vmatprep.mubr.msk.f32.mxu1 %vm6043_vm0, %v6044_v7 }
  0x92   : > { %5093 = vmatprep.mubr.msk.f32.mxu0 %vm6043_vm0, %v6044_v7 }
  0x94   : > { %4742 = vmatmul.mubr.msk.f32.gmra.mrb[18].mxu1 %vm436_vm1, %v390_v27  ;;  %v2566_v27 = vld [vmem:[%s8065_s0 + $0x5d] sm:$0xff] }
  0x95   : > { %5094 = vmatmul.mubr.msk.f32.gmra.mrb[42].mxu0 %vm436_vm1, %v6635_v28  ;;  %4744 = vmatprep.mubr.msk.f32.mxu1 %vm6043_vm0, %v6044_v7 }
  0x96   : > { %5096 = vmatprep.mubr.msk.f32.mxu0 %vm6043_vm0, %v6044_v7 }
  0x98   : > { %4745 = vmatmul.mubr.msk.f32.gmra.mrb[20].mxu1 %vm436_vm1, %v391_v29  ;;  %v2567_v29 = vld [vmem:[%s8065_s0 + $0x65] sm:$0xff] }
  0x99   : > { %5097 = vmatmul.mubr.msk.f32.gmra.mrb[44].mxu0 %vm436_vm1, %v6650_v30  ;;  %4747 = vmatprep.mubr.msk.f32.mxu1 %vm6043_vm0, %v6044_v7 }
  0x9a   : > { %5099 = vmatprep.mubr.msk.f32.mxu0 %vm6043_vm0, %v6044_v7 }
  0x9c   : > { %4748 = vmatmul.mubr.msk.f32.gmra.mrb[22].mxu1 %vm436_vm1, %v392_v31  ;;  %v2568_v31 = vld [vmem:[%s8065_s0 + $0x6d] sm:$0xff] }
  0x9d   : > { %5100 = vmatmul.mubr.msk.f32.gmra.mrb[46].mxu0 %vm436_vm1, %v6665_v32  ;;  %4750 = vmatprep.mubr.msk.f32.mxu1 %vm6043_vm0, %v6044_v7 }
  0x9e   : > { %5102 = vmatprep.mubr.msk.f32.mxu0 %vm6043_vm0, %v6044_v7 }
  0xa0   : > { %4751 = vmatmul.mubr.msk.f32.gmra.mrb[24].mxu1 %vm436_vm1, %v393_v33  ;;  %v2570_v33 = vld [vmem:[%s8065_s0 + $0x7d] sm:$0xff] }
  0xa1   : > { %5103 = vmatmul.mubr.msk.f32.gmra.mrb[48].mxu0 %vm436_vm1, %v6680_v34  ;;  %4753 = vmatprep.mubr.msk.f32.mxu1 %vm6043_vm0, %v6044_v7 }
  0xa2   : > { %5109 = vmatprep.mubr.msk.f32.mxu0 %vm6043_vm0, %v6044_v7 }
  0xa4   : > { %4754 = vmatmul.mubr.msk.f32.gmra.mrb[26].mxu1 %vm436_vm1, %v394_v37  ;;  %v2575_v37 = vld [vmem:[%s8065_s0 + $0xa5] sm:$0xff] }
  0xa5   : > { %5110 = vmatmul.mubr.msk.f32.vlgmr.msra.gmra.mrb[0].mxu0 %vm436_vm1, %v6327_v46  ;;  %4756 = vmatprep.mubr.msk.f32.mxu1 %vm6043_vm0, %v6044_v7  ;;  %v402_v46 = vld [vmem:[%s8065_s0 + $0xa8] sm:$0xff] }
  0xa6   : > { %5505 = vmatpush3.bf16.msra.mxu0 %v5504_v38  ;;  %5112 = vmatprep.mubr.msk.f32.mxu0 %vm6043_vm0, %v6044_v7  ;;  %v2576_v38 = vld [vmem:[%s8065_s0 + $0xad] sm:$0xff] }
  0xa7   : > { %5506 = vmatprep.subr.bf16.mxu0 %v6042_v3 }
  0xa8   : > { %4757 = vmatmul.mubr.msk.f32.gmra.mrb[28].mxu1 %vm436_vm1, %v395_v39  ;;  %v2577_v39 = vld [vmem:[%s8065_s0 + $0xb5] sm:$0xff] }
  0xa9   : > { %5113 = vmatmul.mubr.msk.f32.gmra.mrb[2].mxu0 %vm436_vm1, %v6343_v48  ;;  %4759 = vmatprep.mubr.msk.f32.mxu1 %vm6043_vm0, %v6044_v7  ;;  %v404_v48 = vld [vmem:[%s8065_s0 + $0xb8] sm:$0xff] }
  0xaa   : > { %5115 = vmatprep.mubr.msk.f32.mxu0 %vm6043_vm0, %v6044_v7 }
  0xac   : > { %4760 = vmatmul.mubr.msk.f32.gmra.mrb[30].mxu1 %vm436_vm1, %v396_v40  ;;  %v2578_v40 = vld [vmem:[%s8065_s0 + $0xbd] sm:$0xff] }
  0xad   : > { %5116 = vmatmul.mubr.msk.f32.gmra.mrb[4].mxu0 %vm436_vm1, %v6358_v50  ;;  %4762 = vmatprep.mubr.msk.f32.mxu1 %vm6043_vm0, %v6044_v7  ;;  %v4146_v50 = vld [vmem:[%s8066_s1 + $0x30] sm:$0xff] }
  0xae   : > { %5118 = vmatprep.mubr.msk.f32.mxu0 %vm6043_vm0, %v6044_v7  ;;  %v5492_v53 = vpack.c.bf16 %v4147_v51, %v4146_v50  ;;  %v2881_v50 = vld [vmem:[%s8065_s0 + $0x46] sm:$0xff]  ;;  %v2882_v51 = vld [vmem:[%s8065_s0 + $0x4e] sm:$0xff] }
  0xb0   : > { %4763 = vmatmul.mubr.msk.f32.gmra.mrb[32].mxu1 %vm436_vm1, %v397_v41  ;;  %v2579_v41 = vld [vmem:[%s8065_s0 + $0xc5] sm:$0xff] }
  0xb1   : > { %5119 = vmatmul.mubr.msk.f32.gmra.mrb[6].mxu0 %vm436_vm1, %v6373_v52  ;;  %4765 = vmatprep.mubr.msk.f32.mxu1 %vm6043_vm0, %v6044_v7  ;;  %v967_v52 = vld [vmem:[%s8065_s0 + $0x2] sm:$0xff] }
  0xb2   : > { %5121 = vmatprep.mubr.msk.f32.mxu0 %vm6043_vm0, %v6044_v7 }
  0xb4   : > { %4766 = vmatmul.mubr.msk.f32.gmra.mrb[34].mxu1 %vm436_vm1, %v398_v42  ;;  %v2580_v42 = vld [vmem:[%s8065_s0 + $0xcd] sm:$0xff] }
  0xb5   : > { %5122 = vmatmul.mubr.msk.f32.gmra.mrb[8].mxu0 %vm436_vm1, %v6388_v54  ;;  %4768 = vmatprep.mubr.msk.f32.mxu1 %vm6043_vm0, %v6044_v7  ;;  %v6833_v54 = vld [vmem:[%s8065_s0 + $0xa] sm:$0xff] }
  0xb6   : > { %5124 = vmatprep.mubr.msk.f32.mxu0 %vm6043_vm0, %v6044_v7 }
  0xb8   : > { %4769 = vmatmul.mubr.msk.f32.gmra.mrb[36].mxu1 %vm436_vm1, %v399_v43  ;;  %v2581_v43 = vld [vmem:[%s8065_s0 + $0xd5] sm:$0xff] }
  0xb9   : > { %5125 = vmatmul.mubr.msk.f32.gmra.mrb[10].mxu0 %vm436_vm1, %v6403_v56  ;;  %4771 = vmatprep.mubr.msk.f32.mxu1 %vm6043_vm0, %v6044_v7  ;;  %v6873_v56 = vld [vmem:[%s8065_s0 + $0x22] sm:$0xff] }
  0xba   : > { %5127 = vmatprep.mubr.msk.f32.mxu0 %vm6043_vm0, %v6044_v7 }
  0xbc   : > { %4772 = vmatmul.mubr.msk.f32.gmra.mrb[38].mxu1 %vm436_vm1, %v400_v44  ;;  %v2875_v44 = vld [vmem:[%s8065_s0 + $0x16] sm:$0xff] }
  0xbd   : > { %5128 = vmatmul.mubr.msk.f32.gmra.mrb[12].mxu0 %vm436_vm1, %v6418_v58  ;;  %4774 = vmatprep.mubr.msk.f32.mxu1 %vm6043_vm0, %v6044_v7  ;;  %v6899_v58 = vld [vmem:[%s8065_s0 + $0x32] sm:$0xff] }
  0xbe   : > { %5130 = vmatprep.mubr.msk.f32.mxu0 %vm6043_vm0, %v6044_v7 }
  0xc0   : > { %4775 = vmatmul.mubr.msk.f32.gmra.mrb[40].mxu1 %vm436_vm1, %v401_v45  ;;  %v2876_v45 = vld [vmem:[%s8065_s0 + $0x1e] sm:$0xff] }
  0xc1   : > { %5131 = vmatmul.mubr.msk.f32.gmra.mrb[14].mxu0 %vm436_vm1, %v6433_v60  ;;  %4777 = vmatprep.mubr.msk.f32.mxu1 %vm6043_vm0, %v6044_v7  ;;  %v6925_v60 = vld [vmem:[%s8065_s0 + $0x42] sm:$0xff] }
  0xc2   : > { %5133 = vmatprep.mubr.msk.f32.mxu0 %vm6043_vm0, %v6044_v7 }
  0xc4   : > { %4778 = vmatmul.mubr.msk.f32.gmra.mrb[42].mxu1 %vm436_vm1, %v402_v46  ;;  %v2877_v46 = vld [vmem:[%s8065_s0 + $0x26] sm:$0xff] }
  0xc5   : > { %5134 = vmatmul.mubr.msk.f32.gmra.mrb[16].mxu0 %vm436_vm1, %v6448_v62  ;;  %4780 = vmatprep.mubr.msk.f32.mxu1 %vm6043_vm0, %v6044_v7  ;;  %v6951_v62 = vld [vmem:[%s8065_s0 + $0x52] sm:$0xff] }
  0xc6   : > { %5136 = vmatprep.mubr.msk.f32.mxu0 %vm6043_vm0, %v6044_v7 }
  0xc8   : > { %4781 = vmatmul.mubr.msk.f32.gmra.mrb[44].mxu1 %vm436_vm1, %v403_v47  ;;  %v2878_v47 = vld [vmem:[%s8065_s0 + $0x2e] sm:$0xff] }
  0xc9   : > { %5137 = vmatmul.mubr.msk.f32.gmra.mrb[18].mxu0 %vm436_vm1, %v6463_v0  ;;  %4783 = vmatprep.mubr.msk.f32.mxu1 %vm6043_vm0, %v6044_v7  ;;  %v6977_v0 = vld [vmem:[%s8065_s0 + $0x62] sm:$0xff] }
  0xca   : > { %5139 = vmatprep.mubr.msk.f32.mxu0 %vm6043_vm0, %v6044_v7 }
  0xcc   : > { %4784 = vmatmul.mubr.msk.f32.gmra.mrb[46].mxu1 %vm436_vm1, %v404_v48  ;;  %v2879_v48 = vld [vmem:[%s8065_s0 + $0x36] sm:$0xff] }
  0xcd   : > { %5140 = vmatmul.mubr.msk.f32.gmra.mrb[20].mxu0 %vm436_vm1, %v6478_v2  ;;  %4786 = vmatprep.mubr.msk.f32.mxu1 %vm6043_vm0, %v6044_v7  ;;  %v4281_v2 = vld [vmem:[%s8066_s1 + $0x80] sm:$0xff] }
  0xce   : > { %5142 = vmatprep.mubr.msk.f32.mxu0 %vm6043_vm0, %v6044_v7 }
  0xd0   : > { %4787 = vmatmul.mubr.msk.f32.gmra.mrb[48].mxu1 %vm436_vm1, %v405_v49  ;;  %v2880_v49 = vld [vmem:[%s8065_s0 + $0x3e] sm:$0xff] }
  0xd1   : > { %5143 = vmatmul.mubr.msk.f32.gmra.mrb[22].mxu0 %vm436_vm1, %v6499_v9  ;;  %4793 = vmatprep.mubr.msk.f32.mxu1 %vm6043_vm0, %v6044_v7  ;;  %v5507_v9 = vpack.c.bf16 %v4282_v4, %v4281_v2  ;;  %v1621_v2 = vld [vmem:[%s8065_s0 + $0x9b] sm:$0xff] }
  0xd2   : > { %5145 = vmatprep.mubr.msk.f32.mxu0 %vm6043_vm0, %v6044_v7  ;;  %v2892_v4 = vld [vmem:[%s8065_s0 + $0x9e] sm:$0xff] }
  0xd4   : > { %4794 = vmatmul.mubr.msk.f32.vlgmr.msra.gmra.mrb[0].mxu1 %vm436_vm1, %v967_v52  ;;  %v2883_v52 = vld [vmem:[%s8065_s0 + $0x56] sm:$0xff] }
  0xd5   : > { %5146 = vmatmul.mubr.msk.f32.gmra.mrb[24].mxu0 %vm436_vm1, %v6514_v12  ;;  %4796 = vmatprep.mubr.msk.f32.mxu1 %vm6043_vm0, %v6044_v7  ;;  %v7028_v12 = vld [vmem:[%s8065_s0 + $0x7a] sm:$0xff] }
  0xd6   : > { %5148 = vmatprep.mubr.msk.f32.mxu0 %vm6043_vm0, %v6044_v7  ;;  %5493 = vmatpush3.bf16.msra.mxu1 %v5492_v53  ;;  %v2884_v53 = vld [vmem:[%s8065_s0 + $0x5e] sm:$0xff] }
  0xd7   : > { %5605 = vmatprep.subr.bf16.mxu1 %v6042_v3  ;;  %v6860_v3 = vld [vmem:[%s8065_s0 + $0x1a] sm:$0xff] }
  0xd8   : > { %4797 = vmatmul.mubr.msk.f32.gmra.mrb[2].mxu1 %vm436_vm1, %v6833_v54 }
  0xd9   : > { %5149 = vmatmul.mubr.msk.f32.gmra.mrb[26].mxu0 %vm436_vm1, %v6530_v14  ;;  %4799 = vmatprep.mubr.msk.f32.mxu1 %vm6043_vm0, %v6044_v7  ;;  %v7043_v14 = vld [vmem:[%s8065_s0 + $0x82] sm:$0xff] }
  0xda   : > { %5151 = vmatprep.mubr.msk.f32.mxu0 %vm6043_vm0, %v6044_v7 }
  0xdc   : > { %4800 = vmatmul.mubr.msk.f32.gmra.mrb[4].mxu1 %vm436_vm1, %v6847_v55 }
  0xdd   : > { %5152 = vmatmul.mubr.msk.f32.gmra.mrb[28].mxu0 %vm436_vm1, %v6545_v16  ;;  %4802 = vmatprep.mubr.msk.f32.mxu1 %vm6043_vm0, %v6044_v7  ;;  %v7058_v16 = vld [vmem:[%s8065_s0 + $0x8a] sm:$0xff] }
  0xde   : > { %5154 = vmatprep.mubr.msk.f32.mxu0 %vm6043_vm0, %v6044_v7 }
  0xe0   : > { %4803 = vmatmul.mubr.msk.f32.gmra.mrb[6].mxu1 %vm436_vm1, %v6860_v3 }
  0xe1   : > { %5155 = vmatmul.mubr.msk.f32.gmra.mrb[30].mxu0 %vm436_vm1, %v6560_v18  ;;  %4805 = vmatprep.mubr.msk.f32.mxu1 %vm6043_vm0, %v6044_v7  ;;  %v7073_v18 = vld [vmem:[%s8065_s0 + $0x92] sm:$0xff] }
  0xe2   : > { %5157 = vmatprep.mubr.msk.f32.mxu0 %vm6043_vm0, %v6044_v7 }
  0xe4   : > { %4806 = vmatmul.mubr.msk.f32.gmra.mrb[8].mxu1 %vm436_vm1, %v6873_v56 }
  0xe5   : > { %5158 = vmatmul.mubr.msk.f32.gmra.mrb[32].mxu0 %vm436_vm1, %v6575_v20  ;;  %4808 = vmatprep.mubr.msk.f32.mxu1 %vm6043_vm0, %v6044_v7  ;;  %v7088_v20 = vld [vmem:[%s8065_s0 + $0x9a] sm:$0xff] }
  0xe6   : > { %5160 = vmatprep.mubr.msk.f32.mxu0 %vm6043_vm0, %v6044_v7 }
  0xe8   : > { %4809 = vmatmul.mubr.msk.f32.gmra.mrb[10].mxu1 %vm436_vm1, %v6886_v57 }
  0xe9   : > { %5161 = vmatmul.mubr.msk.f32.gmra.mrb[34].mxu0 %vm436_vm1, %v6590_v22  ;;  %4811 = vmatprep.mubr.msk.f32.mxu1 %vm6043_vm0, %v6044_v7  ;;  %v7103_v22 = vld [vmem:[%s8065_s0 + $0xa2] sm:$0xff] }
  0xea   : > { %5163 = vmatprep.mubr.msk.f32.mxu0 %vm6043_vm0, %v6044_v7 }
  0xec   : > { %4812 = vmatmul.mubr.msk.f32.gmra.mrb[12].mxu1 %vm436_vm1, %v6899_v58 }
  0xed   : > { %5164 = vmatmul.mubr.msk.f32.gmra.mrb[36].mxu0 %vm436_vm1, %v6605_v24  ;;  %4814 = vmatprep.mubr.msk.f32.mxu1 %vm6043_vm0, %v6044_v7  ;;  %v7118_v24 = vld [vmem:[%s8065_s0 + $0xaa] sm:$0xff] }
  0xee   : > { %5166 = vmatprep.mubr.msk.f32.mxu0 %vm6043_vm0, %v6044_v7 }
  0xf0   : > { %4815 = vmatmul.mubr.msk.f32.gmra.mrb[14].mxu1 %vm436_vm1, %v6912_v59 }
  0xf1   : > { %5167 = vmatmul.mubr.msk.f32.gmra.mrb[38].mxu0 %vm436_vm1, %v6620_v26  ;;  %4817 = vmatprep.mubr.msk.f32.mxu1 %vm6043_vm0, %v6044_v7  ;;  %v7133_v26 = vld [vmem:[%s8065_s0 + $0xb2] sm:$0xff] }
  0xf2   : > { %5169 = vmatprep.mubr.msk.f32.mxu0 %vm6043_vm0, %v6044_v7 }
  0xf4   : > { %4818 = vmatmul.mubr.msk.f32.gmra.mrb[16].mxu1 %vm436_vm1, %v6925_v60 }
  0xf5   : > { %5170 = vmatmul.mubr.msk.f32.gmra.mrb[40].mxu0 %vm436_vm1, %v6635_v28  ;;  %4820 = vmatprep.mubr.msk.f32.mxu1 %vm6043_vm0, %v6044_v7  ;;  %v7148_v28 = vld [vmem:[%s8065_s0 + $0xba] sm:$0xff] }
  0xf6   : > { %5172 = vmatprep.mubr.msk.f32.mxu0 %vm6043_vm0, %v6044_v7 }
  0xf8   : > { %4821 = vmatmul.mubr.msk.f32.gmra.mrb[18].mxu1 %vm436_vm1, %v6938_v61 }
  0xf9   : > { %5173 = vmatmul.mubr.msk.f32.gmra.mrb[42].mxu0 %vm436_vm1, %v6650_v30  ;;  %4823 = vmatprep.mubr.msk.f32.mxu1 %vm6043_vm0, %v6044_v7  ;;  %v7163_v30 = vld [vmem:[%s8065_s0 + $0xc2] sm:$0xff] }
  0xfa   : > { %5175 = vmatprep.mubr.msk.f32.mxu0 %vm6043_vm0, %v6044_v7 }
  0xfc   : > { %4824 = vmatmul.mubr.msk.f32.gmra.mrb[20].mxu1 %vm436_vm1, %v6951_v62 }
  0xfd   : > { %5176 = vmatmul.mubr.msk.f32.gmra.mrb[44].mxu0 %vm436_vm1, %v6665_v32  ;;  %4826 = vmatprep.mubr.msk.f32.mxu1 %vm6043_vm0, %v6044_v7  ;;  %v2569_v32 = vld [vmem:[%s8065_s0 + $0x75] sm:$0xff] }
  0xfe   : > { %5178 = vmatprep.mubr.msk.f32.mxu0 %vm6043_vm0, %v6044_v7 }
 0x100   : > { %4827 = vmatmul.mubr.msk.f32.gmra.mrb[22].mxu1 %vm436_vm1, %v6964_v63 }
 0x101   : > { %5179 = vmatmul.mubr.msk.f32.gmra.mrb[46].mxu0 %vm436_vm1, %v6680_v34  ;;  %4829 = vmatprep.mubr.msk.f32.mxu1 %vm6043_vm0, %v6044_v7  ;;  %v2571_v34 = vld [vmem:[%s8065_s0 + $0x85] sm:$0xff] }
 0x102   : > { %5181 = vmatprep.mubr.msk.f32.mxu0 %vm6043_vm0, %v6044_v7 }
 0x104   : > { %4830 = vmatmul.mubr.msk.f32.gmra.mrb[24].mxu1 %vm436_vm1, %v6977_v0 }
 0x105   : > { %5182 = vmatmul.mubr.msk.f32.gmra.mrb[48].mxu0 %vm436_vm1, %v2263_v1  ;;  %4832 = vmatprep.mubr.msk.f32.mxu1 %vm6043_vm0, %v6044_v7  ;;  %v2891_v1 = vld [vmem:[%s8065_s0 + $0x96] sm:$0xff] }
 0x106   : > { %5188 = vmatprep.mubr.msk.f32.mxu0 %vm6043_vm0, %v6044_v7 }
 0x108   : > { %4833 = vmatmul.mubr.msk.f32.gmra.mrb[26].mxu1 %vm436_vm1, %v6998_v5 }
 0x109   : > { %5189 = vmatmul.mubr.msk.f32.vlgmr.msra.gmra.mrb[0].mxu0 %vm436_vm1, %v2557_v8  ;;  %4835 = vmatprep.mubr.msk.f32.mxu1 %vm6043_vm0, %v6044_v7  ;;  %v2893_v8 = vld [vmem:[%s8065_s0 + $0xa6] sm:$0xff] }
 0x10a   : > { %5508 = vmatpush3.bf16.msra.mxu0 %v5507_v9  ;;  %5191 = vmatprep.mubr.msk.f32.mxu0 %vm6043_vm0, %v6044_v7  ;;  %v1623_v9 = vld [vmem:[%s8065_s0 + $0xab] sm:$0xff] }
 0x10c   : > { %4836 = vmatmul.mubr.msk.f32.gmra.mrb[28].mxu1 %vm436_vm1, %v7013_v10 }
 0x10d   : > { %5192 = vmatmul.mubr.msk.f32.gmra.mrb[2].mxu0 %vm436_vm1, %v2558_v11  ;;  %4838 = vmatprep.mubr.msk.f32.mxu1 %vm6043_vm0, %v6044_v7  ;;  %v1624_v11 = vld [vmem:[%s8065_s0 + $0xb3] sm:$0xff] }
 0x10e   : > { %5194 = vmatprep.mubr.msk.f32.mxu0 %vm6043_vm0, %v6044_v7 }
 0x110   : > { %4839 = vmatmul.mubr.msk.f32.gmra.mrb[30].mxu1 %vm436_vm1, %v7028_v12 }
 0x111   : > { %5195 = vmatmul.mubr.msk.f32.gmra.mrb[4].mxu0 %vm436_vm1, %v2559_v13  ;;  %4841 = vmatprep.mubr.msk.f32.mxu1 %vm6043_vm0, %v6044_v7  ;;  %v1625_v13 = vld [vmem:[%s8065_s0 + $0xbb] sm:$0xff] }
 0x112   : > { %5197 = vmatprep.mubr.msk.f32.mxu0 %vm6043_vm0, %v6044_v7 }
 0x114   : > { %4842 = vmatmul.mubr.msk.f32.gmra.mrb[32].mxu1 %vm436_vm1, %v7043_v14 }
 0x115   : > { %5198 = vmatmul.mubr.msk.f32.gmra.mrb[6].mxu0 %vm436_vm1, %v2560_v15  ;;  %4844 = vmatprep.mubr.msk.f32.mxu1 %vm6043_vm0, %v6044_v7  ;;  %v1626_v15 = vld [vmem:[%s8065_s0 + $0xc3] sm:$0xff] }
 0x116   : > { %5200 = vmatprep.mubr.msk.f32.mxu0 %vm6043_vm0, %v6044_v7 }
 0x118   : > { %4845 = vmatmul.mubr.msk.f32.gmra.mrb[34].mxu1 %vm436_vm1, %v7058_v16 }
 0x119   : > { %5201 = vmatmul.mubr.msk.f32.gmra.mrb[8].mxu0 %vm436_vm1, %v2561_v17  ;;  %4847 = vmatprep.mubr.msk.f32.mxu1 %vm6043_vm0, %v6044_v7  ;;  %v1627_v17 = vld [vmem:[%s8065_s0 + $0xcb] sm:$0xff] }
 0x11a   : > { %5203 = vmatprep.mubr.msk.f32.mxu0 %vm6043_vm0, %v6044_v7 }
 0x11c   : > { %4848 = vmatmul.mubr.msk.f32.gmra.mrb[36].mxu1 %vm436_vm1, %v7073_v18 }
 0x11d   : > { %5204 = vmatmul.mubr.msk.f32.gmra.mrb[10].mxu0 %vm436_vm1, %v2562_v19  ;;  %4850 = vmatprep.mubr.msk.f32.mxu1 %vm6043_vm0, %v6044_v7  ;;  %v2899_v19 = vld [vmem:[%s8065_s0 + $0xd6] sm:$0xff] }
 0x11e   : > { %5206 = vmatprep.mubr.msk.f32.mxu0 %vm6043_vm0, %v6044_v7 }
 0x120   : > { %4851 = vmatmul.mubr.msk.f32.gmra.mrb[38].mxu1 %vm436_vm1, %v7088_v20 }
 0x121   : > { %5207 = vmatmul.mubr.msk.f32.gmra.mrb[12].mxu0 %vm436_vm1, %v2563_v21  ;;  %4853 = vmatprep.mubr.msk.f32.mxu1 %vm6043_vm0, %v6044_v7 }
 0x122   : > { %5209 = vmatprep.mubr.msk.f32.mxu0 %vm6043_vm0, %v6044_v7 }
 0x124   : > { %4854 = vmatmul.mubr.msk.f32.gmra.mrb[40].mxu1 %vm436_vm1, %v7103_v22 }
 0x125   : > { %5210 = vmatmul.mubr.msk.f32.gmra.mrb[14].mxu0 %vm436_vm1, %v2564_v23  ;;  %4856 = vmatprep.mubr.msk.f32.mxu1 %vm6043_vm0, %v6044_v7 }
 0x126   : > { %5212 = vmatprep.mubr.msk.f32.mxu0 %vm6043_vm0, %v6044_v7 }
 0x128   : > { %4857 = vmatmul.mubr.msk.f32.gmra.mrb[42].mxu1 %vm436_vm1, %v7118_v24 }
 0x129   : > { %5213 = vmatmul.mubr.msk.f32.gmra.mrb[16].mxu0 %vm436_vm1, %v2565_v25  ;;  %4859 = vmatprep.mubr.msk.f32.mxu1 %vm6043_vm0, %v6044_v7 }
 0x12a   : > { %5215 = vmatprep.mubr.msk.f32.mxu0 %vm6043_vm0, %v6044_v7 }
 0x12c   : > { %4860 = vmatmul.mubr.msk.f32.gmra.mrb[44].mxu1 %vm436_vm1, %v7133_v26 }
 0x12d   : > { %5216 = vmatmul.mubr.msk.f32.gmra.mrb[18].mxu0 %vm436_vm1, %v2566_v27  ;;  %4862 = vmatprep.mubr.msk.f32.mxu1 %vm6043_vm0, %v6044_v7 }
 0x12e   : > { %5218 = vmatprep.mubr.msk.f32.mxu0 %vm6043_vm0, %v6044_v7 }
 0x130   : > { %4863 = vmatmul.mubr.msk.f32.gmra.mrb[46].mxu1 %vm436_vm1, %v7148_v28 }
 0x131   : > { %5219 = vmatmul.mubr.msk.f32.gmra.mrb[20].mxu0 %vm436_vm1, %v2567_v29  ;;  %4865 = vmatprep.mubr.msk.f32.mxu1 %vm6043_vm0, %v6044_v7 }
 0x132   : > { %5221 = vmatprep.mubr.msk.f32.mxu0 %vm6043_vm0, %v6044_v7 }
 0x134   : > { %4866 = vmatmul.mubr.msk.f32.gmra.mrb[48].mxu1 %vm436_vm1, %v7163_v30 }
 0x135   : > { %5222 = vmatmul.mubr.msk.f32.gmra.mrb[22].mxu0 %vm436_vm1, %v2568_v31  ;;  %4872 = vmatprep.mubr.msk.f32.mxu1 %vm6043_vm0, %v6044_v7 }
 0x136   : > { %5224 = vmatprep.mubr.msk.f32.mxu0 %vm6043_vm0, %v6044_v7 }
 0x138   : > { %4873 = vmatmul.mubr.msk.f32.vlgmr.msra.gmra.mrb[0].mxu1 %vm436_vm1, %v6833_v54  ;;  %v2885_v54 = vld [vmem:[%s8065_s0 + $0x66] sm:$0xff] }
 0x139   : > { %5225 = vmatmul.mubr.msk.f32.gmra.mrb[24].mxu0 %vm436_vm1, %v2569_v32  ;;  %4875 = vmatprep.mubr.msk.f32.mxu1 %vm6043_vm0, %v6044_v7 }
 0x13a   : > { %5227 = vmatprep.mubr.msk.f32.mxu0 %vm6043_vm0, %v6044_v7  ;;  %5606 = vmatpush3.bf16.msra.mxu1 %v6124_v6  ;;  %v2572_v6 = vld [vmem:[%s8065_s0 + $0x8d] sm:$0xff] }
 0x13c   : > { %4876 = vmatmul.mubr.msk.f32.gmra.mrb[2].mxu1 %vm436_vm1, %v6847_v55  ;;  %v1309_v55 = vld [vmem:[%s8065_s0 + $0xca] sm:$0xff] }
 0x13d   : > { %5228 = vmatmul.mubr.msk.f32.gmra.mrb[26].mxu0 %vm436_vm1, %v2570_v33  ;;  %4878 = vmatprep.mubr.msk.f32.mxu1 %vm6043_vm0, %v6044_v7 }
 0x13e   : > { %5230 = vmatprep.mubr.msk.f32.mxu0 %vm6043_vm0, %v6044_v7 }
 0x140   : > { %4879 = vmatmul.mubr.msk.f32.gmra.mrb[4].mxu1 %vm436_vm1, %v6860_v3  ;;  %v2886_v3 = vld [vmem:[%s8065_s0 + $0x6e] sm:$0xff] }
 0x141   : > { %5231 = vmatmul.mubr.msk.f32.gmra.mrb[28].mxu0 %vm436_vm1, %v2571_v34  ;;  %4881 = vmatprep.mubr.msk.f32.mxu1 %vm6043_vm0, %v6044_v7 }
 0x142   : > { %5233 = vmatprep.mubr.msk.f32.mxu0 %vm6043_vm0, %v6044_v7 }
 0x144   : > { %4882 = vmatmul.mubr.msk.f32.gmra.mrb[6].mxu1 %vm436_vm1, %v6873_v56  ;;  %v1616_v56 = vld [vmem:[%s8065_s0 + $0x73] sm:$0xff] }
 0x145   : > { %5234 = vmatmul.mubr.msk.f32.gmra.mrb[30].mxu0 %vm436_vm1, %v2572_v6  ;;  %4884 = vmatprep.mubr.msk.f32.mxu1 %vm6043_vm0, %v6044_v7 }
 0x146   : > { %5236 = vmatprep.mubr.msk.f32.mxu0 %vm6043_vm0, %v6044_v7 }
 0x148   : > { %4885 = vmatmul.mubr.msk.f32.gmra.mrb[8].mxu1 %vm436_vm1, %v6886_v57  ;;  %v2887_v57 = vld [vmem:[%s8065_s0 + $0x76] sm:$0xff] }
 0x149   : > { %5237 = vmatmul.mubr.msk.f32.gmra.mrb[32].mxu0 %vm436_vm1, %v2573_v35  ;;  %4887 = vmatprep.mubr.msk.f32.mxu1 %vm6043_vm0, %v6044_v7 }
 0x14a   : > { %5239 = vmatprep.mubr.msk.f32.mxu0 %vm6043_vm0, %v6044_v7 }
 0x14c   : > { %4888 = vmatmul.mubr.msk.f32.gmra.mrb[10].mxu1 %vm436_vm1, %v6899_v58  ;;  %v1617_v58 = vld [vmem:[%s8065_s0 + $0x7b] sm:$0xff] }
 0x14d   : > { %5240 = vmatmul.mubr.msk.f32.gmra.mrb[34].mxu0 %vm436_vm1, %v2574_v36  ;;  %4890 = vmatprep.mubr.msk.f32.mxu1 %vm6043_vm0, %v6044_v7 }
 0x14e   : > { %5242 = vmatprep.mubr.msk.f32.mxu0 %vm6043_vm0, %v6044_v7 }
 0x150   : > { %4891 = vmatmul.mubr.msk.f32.gmra.mrb[12].mxu1 %vm436_vm1, %v6912_v59  ;;  %v2888_v59 = vld [vmem:[%s8065_s0 + $0x7e] sm:$0xff] }
 0x151   : > { %5243 = vmatmul.mubr.msk.f32.gmra.mrb[36].mxu0 %vm436_vm1, %v2575_v37  ;;  %4893 = vmatprep.mubr.msk.f32.mxu1 %vm6043_vm0, %v6044_v7 }
 0x152   : > { %5245 = vmatprep.mubr.msk.f32.mxu0 %vm6043_vm0, %v6044_v7 }
 0x154   : > { %4894 = vmatmul.mubr.msk.f32.gmra.mrb[14].mxu1 %vm436_vm1, %v6925_v60  ;;  %v1618_v60 = vld [vmem:[%s8065_s0 + $0x83] sm:$0xff] }
 0x155   : > { %5246 = vmatmul.mubr.msk.f32.gmra.mrb[38].mxu0 %vm436_vm1, %v2576_v38  ;;  %4896 = vmatprep.mubr.msk.f32.mxu1 %vm6043_vm0, %v6044_v7 }
 0x156   : > { %5248 = vmatprep.mubr.msk.f32.mxu0 %vm6043_vm0, %v6044_v7 }
 0x158   : > { %4897 = vmatmul.mubr.msk.f32.gmra.mrb[16].mxu1 %vm436_vm1, %v6938_v61  ;;  %v2889_v61 = vld [vmem:[%s8065_s0 + $0x86] sm:$0xff] }
 0x159   : > { %5249 = vmatmul.mubr.msk.f32.gmra.mrb[40].mxu0 %vm436_vm1, %v2577_v39  ;;  %4899 = vmatprep.mubr.msk.f32.mxu1 %vm6043_vm0, %v6044_v7 }
 0x15a   : > { %5251 = vmatprep.mubr.msk.f32.mxu0 %vm6043_vm0, %v6044_v7 }
 0x15c   : > { %4900 = vmatmul.mubr.msk.f32.gmra.mrb[18].mxu1 %vm436_vm1, %v6951_v62  ;;  %v1619_v62 = vld [vmem:[%s8065_s0 + $0x8b] sm:$0xff] }
 0x15d   : > { %5252 = vmatmul.mubr.msk.f32.gmra.mrb[42].mxu0 %vm436_vm1, %v2578_v40  ;;  %4902 = vmatprep.mubr.msk.f32.mxu1 %vm6043_vm0, %v6044_v7 }
 0x15e   : > { %5254 = vmatprep.mubr.msk.f32.mxu0 %vm6043_vm0, %v6044_v7 }
 0x160   : > { %4903 = vmatmul.mubr.msk.f32.gmra.mrb[20].mxu1 %vm436_vm1, %v6964_v63  ;;  %v2890_v63 = vld [vmem:[%s8065_s0 + $0x8e] sm:$0xff] }
 0x161   : > { %5255 = vmatmul.mubr.msk.f32.gmra.mrb[44].mxu0 %vm436_vm1, %v2579_v41  ;;  %4905 = vmatprep.mubr.msk.f32.mxu1 %vm6043_vm0, %v6044_v7 }
 0x162   : > { %5257 = vmatprep.mubr.msk.f32.mxu0 %vm6043_vm0, %v6044_v7 }
 0x164   : > { %4906 = vmatmul.mubr.msk.f32.gmra.mrb[22].mxu1 %vm436_vm1, %v6977_v0  ;;  %v1620_v0 = vld [vmem:[%s8065_s0 + $0x93] sm:$0xff] }
 0x165   : > { %5258 = vmatmul.mubr.msk.f32.gmra.mrb[46].mxu0 %vm436_vm1, %v2580_v42  ;;  %4908 = vmatprep.mubr.msk.f32.mxu1 %vm6043_vm0, %v6044_v7 }
 0x166   : > { %5260 = vmatprep.mubr.msk.f32.mxu0 %vm6043_vm0, %v6044_v7 }
 0x168   : > { %4909 = vmatmul.mubr.msk.f32.gmra.mrb[24].mxu1 %vm436_vm1, %v6998_v5  ;;  %v1622_v5 = vld [vmem:[%s8065_s0 + $0xa3] sm:$0xff] }
 0x169   : > { %5261 = vmatmul.mubr.msk.f32.gmra.mrb[48].mxu0 %vm436_vm1, %v2581_v43  ;;  %4911 = vmatprep.mubr.msk.f32.mxu1 %vm6043_vm0, %v6044_v7 }
 0x16a   : > { %5267 = vmatprep.mubr.msk.f32.mxu0 %vm6043_vm0, %v6044_v7 }
 0x16c   : > { %4912 = vmatmul.mubr.msk.f32.gmra.mrb[26].mxu1 %vm436_vm1, %v7013_v10  ;;  %v2894_v10 = vld [vmem:[%s8065_s0 + $0xae] sm:$0xff] }
 0x16d   : > { %5268 = vmatmul.mubr.msk.f32.vlgmr.msra.gmra.mrb[0].mxu0 %vm436_vm1, %v2875_v44  ;;  %4914 = vmatprep.mubr.msk.f32.mxu1 %vm6043_vm0, %v6044_v7 }
 0x16e   : > { %5270 = vmatprep.mubr.msk.f32.mxu0 %vm6043_vm0, %v6044_v7 }
 0x170   : > { %4915 = vmatmul.mubr.msk.f32.gmra.mrb[28].mxu1 %vm436_vm1, %v7028_v12  ;;  %v2895_v12 = vld [vmem:[%s8065_s0 + $0xb6] sm:$0xff] }
 0x171   : > { %5271 = vmatmul.mubr.msk.f32.gmra.mrb[2].mxu0 %vm436_vm1, %v2876_v45  ;;  %4917 = vmatprep.mubr.msk.f32.mxu1 %vm6043_vm0, %v6044_v7 }
 0x172   : > { %5273 = vmatprep.mubr.msk.f32.mxu0 %vm6043_vm0, %v6044_v7 }
 0x174   : > { %4918 = vmatmul.mubr.msk.f32.gmra.mrb[30].mxu1 %vm436_vm1, %v7043_v14  ;;  %v2896_v14 = vld [vmem:[%s8065_s0 + $0xbe] sm:$0xff] }
 0x175   : > { %5274 = vmatmul.mubr.msk.f32.gmra.mrb[4].mxu0 %vm436_vm1, %v2877_v46  ;;  %4920 = vmatprep.mubr.msk.f32.mxu1 %vm6043_vm0, %v6044_v7 }
 0x176   : > { %5276 = vmatprep.mubr.msk.f32.mxu0 %vm6043_vm0, %v6044_v7 }
 0x178   : > { %4921 = vmatmul.mubr.msk.f32.gmra.mrb[32].mxu1 %vm436_vm1, %v7058_v16  ;;  %v2897_v16 = vld [vmem:[%s8065_s0 + $0xc6] sm:$0xff] }
 0x179   : > { %5277 = vmatmul.mubr.msk.f32.gmra.mrb[6].mxu0 %vm436_vm1, %v2878_v47  ;;  %4923 = vmatprep.mubr.msk.f32.mxu1 %vm6043_vm0, %v6044_v7 }
 0x17a   : > { %5279 = vmatprep.mubr.msk.f32.mxu0 %vm6043_vm0, %v6044_v7 }
 0x17c   : > { %4924 = vmatmul.mubr.msk.f32.gmra.mrb[34].mxu1 %vm436_vm1, %v7073_v18  ;;  %v2898_v18 = vld [vmem:[%s8065_s0 + $0xce] sm:$0xff] }
 0x17d   : > { %5280 = vmatmul.mubr.msk.f32.gmra.mrb[8].mxu0 %vm436_vm1, %v2879_v48  ;;  %4926 = vmatprep.mubr.msk.f32.mxu1 %vm6043_vm0, %v6044_v7 }
 0x17e   : > { %5282 = vmatprep.mubr.msk.f32.mxu0 %vm6043_vm0, %v6044_v7 }
 0x180   : > { %4927 = vmatmul.mubr.msk.f32.gmra.mrb[36].mxu1 %vm436_vm1, %v7088_v20 }
 0x181   : > { %5283 = vmatmul.mubr.msk.f32.gmra.mrb[10].mxu0 %vm436_vm1, %v2880_v49  ;;  %4929 = vmatprep.mubr.msk.f32.mxu1 %vm6043_vm0, %v6044_v7 }
 0x182   : > { %5285 = vmatprep.mubr.msk.f32.mxu0 %vm6043_vm0, %v6044_v7 }
 0x184   : > { %4930 = vmatmul.mubr.msk.f32.gmra.mrb[38].mxu1 %vm436_vm1, %v7103_v22 }
 0x185   : > { %5286 = vmatmul.mubr.msk.f32.gmra.mrb[12].mxu0 %vm436_vm1, %v2881_v50  ;;  %4932 = vmatprep.mubr.msk.f32.mxu1 %vm6043_vm0, %v6044_v7 }
 0x186   : > { %5288 = vmatprep.mubr.msk.f32.mxu0 %vm6043_vm0, %v6044_v7 }
 0x188   : > { %4933 = vmatmul.mubr.msk.f32.gmra.mrb[40].mxu1 %vm436_vm1, %v7118_v24 }
 0x189   : > { %5289 = vmatmul.mubr.msk.f32.gmra.mrb[14].mxu0 %vm436_vm1, %v2882_v51  ;;  %4935 = vmatprep.mubr.msk.f32.mxu1 %vm6043_vm0, %v6044_v7 }
 0x18a   : > { %5291 = vmatprep.mubr.msk.f32.mxu0 %vm6043_vm0, %v6044_v7 }
 0x18c   : > { %4936 = vmatmul.mubr.msk.f32.gmra.mrb[42].mxu1 %vm436_vm1, %v7133_v26 }
 0x18d   : > { %5292 = vmatmul.mubr.msk.f32.gmra.mrb[16].mxu0 %vm436_vm1, %v2883_v52  ;;  %4938 = vmatprep.mubr.msk.f32.mxu1 %vm6043_vm0, %v6044_v7 }
 0x18e   : > { %5294 = vmatprep.mubr.msk.f32.mxu0 %vm6043_vm0, %v6044_v7 }
 0x190   : > { %4939 = vmatmul.mubr.msk.f32.gmra.mrb[44].mxu1 %vm436_vm1, %v7148_v28 }
 0x191   : > { %5295 = vmatmul.mubr.msk.f32.gmra.mrb[18].mxu0 %vm436_vm1, %v2884_v53  ;;  %4941 = vmatprep.mubr.msk.f32.mxu1 %vm6043_vm0, %v6044_v7 }
 0x192   : > { %5297 = vmatprep.mubr.msk.f32.mxu0 %vm6043_vm0, %v6044_v7 }
 0x194   : > { %4942 = vmatmul.mubr.msk.f32.gmra.mrb[46].mxu1 %vm436_vm1, %v7163_v30 }
 0x195   : > { %5298 = vmatmul.mubr.msk.f32.gmra.mrb[20].mxu0 %vm436_vm1, %v2885_v54  ;;  %4944 = vmatprep.mubr.msk.f32.mxu1 %vm6043_vm0, %v6044_v7 }
 0x196   : > { %5300 = vmatprep.mubr.msk.f32.mxu0 %vm6043_vm0, %v6044_v7 }
 0x198   : > { %4945 = vmatmul.mubr.msk.f32.gmra.mrb[48].mxu1 %vm436_vm1, %v1309_v55 }
 0x199   : > { %5301 = vmatmul.mubr.msk.f32.gmra.mrb[22].mxu0 %vm436_vm1, %v2886_v3  ;;  %4990 = vmatprep.mubr.msk.f32.mxu1 %vm6043_vm0, %v6044_v7 }
 0x19a   : > { %5303 = vmatprep.mubr.msk.f32.mxu0 %vm6043_vm0, %v6044_v7 }
 0x19c   : > { %4991 = vmatmul.mubr.msk.f32.vlgmr.msra.gmra.mrb[26].mxu1 %vm436_vm1, %v1616_v56 }
 0x19d   : > { %5304 = vmatmul.mubr.msk.f32.gmra.mrb[24].mxu0 %vm436_vm1, %v2887_v57  ;;  %4993 = vmatprep.mubr.msk.f32.mxu1 %vm6043_vm0, %v6044_v7 }
 0x19e   : > { %5306 = vmatprep.mubr.msk.f32.mxu0 %vm6043_vm0, %v6044_v7 }
 0x1a0   : > { %4994 = vmatmul.mubr.msk.f32.gmra.mrb[28].mxu1 %vm436_vm1, %v1617_v58 }
 0x1a1   : > { %5307 = vmatmul.mubr.msk.f32.gmra.mrb[26].mxu0 %vm436_vm1, %v2888_v59  ;;  %4996 = vmatprep.mubr.msk.f32.mxu1 %vm6043_vm0, %v6044_v7 }
 0x1a2   : > { %5309 = vmatprep.mubr.msk.f32.mxu0 %vm6043_vm0, %v6044_v7 }
 0x1a4   : > { %4997 = vmatmul.mubr.msk.f32.gmra.mrb[30].mxu1 %vm436_vm1, %v1618_v60 }
 0x1a5   : > { %5310 = vmatmul.mubr.msk.f32.gmra.mrb[28].mxu0 %vm436_vm1, %v2889_v61  ;;  %4999 = vmatprep.mubr.msk.f32.mxu1 %vm6043_vm0, %v6044_v7 }
 0x1a6   : > { %5312 = vmatprep.mubr.msk.f32.mxu0 %vm6043_vm0, %v6044_v7 }
 0x1a8   : > { %5000 = vmatmul.mubr.msk.f32.gmra.mrb[32].mxu1 %vm436_vm1, %v1619_v62 }
 0x1a9   : > { %5313 = vmatmul.mubr.msk.f32.gmra.mrb[30].mxu0 %vm436_vm1, %v2890_v63  ;;  %5002 = vmatprep.mubr.msk.f32.mxu1 %vm6043_vm0, %v6044_v7 }
 0x1aa   : > { %5315 = vmatprep.mubr.msk.f32.mxu0 %vm6043_vm0, %v6044_v7 }
 0x1ac   : > { %5003 = vmatmul.mubr.msk.f32.gmra.mrb[34].mxu1 %vm436_vm1, %v1620_v0 }
 0x1ad   : > { %5316 = vmatmul.mubr.msk.f32.gmra.mrb[32].mxu0 %vm436_vm1, %v2891_v1  ;;  %5005 = vmatprep.mubr.msk.f32.mxu1 %vm6043_vm0, %v6044_v7 }
 0x1ae   : > { %5318 = vmatprep.mubr.msk.f32.mxu0 %vm6043_vm0, %v6044_v7 }
 0x1b0   : > { %5006 = vmatmul.mubr.msk.f32.gmra.mrb[36].mxu1 %vm436_vm1, %v1621_v2 }
 0x1b1   : > { %5319 = vmatmul.mubr.msk.f32.gmra.mrb[34].mxu0 %vm436_vm1, %v2892_v4  ;;  %5008 = vmatprep.mubr.msk.f32.mxu1 %vm6043_vm0, %v6044_v7 }
 0x1b2   : > { %5321 = vmatprep.mubr.msk.f32.mxu0 %vm6043_vm0, %v6044_v7 }
 0x1b4   : > { %5009 = vmatmul.mubr.msk.f32.gmra.mrb[38].mxu1 %vm436_vm1, %v1622_v5 }
 0x1b5   : > { %5322 = vmatmul.mubr.msk.f32.gmra.mrb[36].mxu0 %vm436_vm1, %v2893_v8  ;;  %5011 = vmatprep.mubr.msk.f32.mxu1 %vm6043_vm0, %v6044_v7 }
 0x1b6   : > { %5324 = vmatprep.mubr.msk.f32.mxu0 %vm6043_vm0, %v6044_v7 }
 0x1b8   : > { %5012 = vmatmul.mubr.msk.f32.gmra.mrb[40].mxu1 %vm436_vm1, %v1623_v9 }
 0x1b9   : > { %5325 = vmatmul.mubr.msk.f32.gmra.mrb[38].mxu0 %vm436_vm1, %v2894_v10  ;;  %5014 = vmatprep.mubr.msk.f32.mxu1 %vm6043_vm0, %v6044_v7 }
 0x1ba   : > { %5327 = vmatprep.mubr.msk.f32.mxu0 %vm6043_vm0, %v6044_v7 }
 0x1bc   : > { %5015 = vmatmul.mubr.msk.f32.gmra.mrb[42].mxu1 %vm436_vm1, %v1624_v11 }
 0x1bd   : > { %5328 = vmatmul.mubr.msk.f32.gmra.mrb[40].mxu0 %vm436_vm1, %v2895_v12  ;;  %5017 = vmatprep.mubr.msk.f32.mxu1 %vm6043_vm0, %v6044_v7 }
 0x1be   : > { %5330 = vmatprep.mubr.msk.f32.mxu0 %vm6043_vm0, %v6044_v7 }
 0x1c0   : > { %5018 = vmatmul.mubr.msk.f32.gmra.mrb[44].mxu1 %vm436_vm1, %v1625_v13 }
 0x1c1   : > { %5331 = vmatmul.mubr.msk.f32.gmra.mrb[42].mxu0 %vm436_vm1, %v2896_v14  ;;  %5020 = vmatprep.mubr.msk.f32.mxu1 %vm6043_vm0, %v6044_v7 }
 0x1c2   : > { %5333 = vmatprep.mubr.msk.f32.mxu0 %vm6043_vm0, %v6044_v7 }
 0x1c4   : > { %5021 = vmatmul.mubr.msk.f32.gmra.mrb[46].mxu1 %vm436_vm1, %v1626_v15 }
 0x1c5   : > { %5334 = vmatmul.mubr.msk.f32.gmra.mrb[44].mxu0 %vm436_vm1, %v2897_v16  ;;  %5023 = vmatprep.mubr.msk.f32.mxu1 %vm6043_vm0, %v6044_v7 }
 0x1c6   : > { %5336 = vmatprep.mubr.msk.f32.mxu0 %vm6043_vm0, %v6044_v7 }
 0x1c8   : > { %5024 = vmatmul.mubr.msk.f32.gmra.mrb[48].mxu1 %vm436_vm1, %v1627_v17 }
 0x1c9   : > { %5337 = vmatmul.mubr.msk.f32.gmra.mrb[46].mxu0 %vm436_vm1, %v2898_v18 }
 0x1ca   : > { %5339 = vmatprep.mubr.msk.f32.mxu0 %vm6043_vm0, %v6044_v7 }
 0x1cd   : > { %5340 = vmatmul.mubr.msk.f32.gmra.mrb[48].mxu0 %vm436_vm1, %v2899_v19 }
 0x20b   : > { %v1454_v20 = vpop.f32.mrb[0].mxu1 }
 0x20c   : > { %v4874_v21 = vpop.f32.mrb[1].mxu1 }
 0x20f   : > { %v1459_v22 = vpop.f32.mrb[2].mxu1 }
 0x210   : > { %v4877_v23 = vpop.f32.mrb[3].mxu1 }
 0x213   : > { %v1464_v24 = vpop.f32.mrb[4].mxu1 }
 0x214   : > { %v4880_v25 = vpop.f32.mrb[5].mxu1 }
 0x217   : > { %v1469_v26 = vpop.f32.mrb[6].mxu1 }
 0x218   : > { %v4883_v27 = vpop.f32.mrb[7].mxu1 }
 0x21b   : > { %v1474_v28 = vpop.f32.mrb[8].mxu1 }
 0x21c   : > { %v4886_v29 = vpop.f32.mrb[9].mxu1 }
 0x21f   : > { %v1479_v30 = vpop.f32.mrb[10].mxu1 }
 0x220   : > { %v4889_v31 = vpop.f32.mrb[11].mxu1 }
 0x223   : > { %v1484_v7 = vpop.f32.mrb[12].mxu1 }
 0x224   : > { %v4892_v32 = vpop.f32.mrb[13].mxu1 }
 0x227   : > { %v1489_v33 = vpop.f32.mrb[14].mxu1 }
 0x228   : > { %v4895_v34 = vpop.f32.mrb[15].mxu1 }
 0x22b   : > { %v1494_v6 = vpop.f32.mrb[16].mxu1 }
 0x22c   : > { %v4898_v35 = vpop.f32.mrb[17].mxu1 }
 0x22f   : > { %v1499_v36 = vpop.f32.mrb[18].mxu1 }
 0x230   : > { %v4901_v37 = vpop.f32.mrb[19].mxu1 }
 0x233   : > { %v1504_v38 = vpop.f32.mrb[20].mxu1 }
 0x234   : > { %v4904_v39 = vpop.f32.mrb[21].mxu1 }
 0x237   : > { %v1509_v40 = vpop.f32.mrb[22].mxu1 }
 0x238   : > { %v4907_v41 = vpop.f32.mrb[23].mxu1 }
 0x23b   : > { %v1514_v42 = vpop.f32.mrb[24].mxu1 }
 0x23c   : > { %v4910_v43 = vpop.f32.mrb[25].mxu1 }
 0x240   : > { %v3044_v44 = vpop.f32.mrb[0].mxu0 }
 0x241   : > { %v7577_v45 = vadd.f32 %v3044_v44, %v1454_v20  ;;  %v5269_v46 = vpop.f32.mrb[1].mxu0 }
 0x244   : > { %v3049_v47 = vpop.f32.mrb[2].mxu0 }
 0x245   : > { %v7579_v48 = vadd.f32 %v3049_v47, %v1459_v22  ;;  %v5272_v49 = vpop.f32.mrb[3].mxu0 }
 0x248   : > { %v3054_v50 = vpop.f32.mrb[4].mxu0 }
 0x249   : > { %v7581_v51 = vadd.f32 %v3054_v50, %v1464_v24  ;;  %v5275_v52 = vpop.f32.mrb[5].mxu0 }
 0x24c   : > { %v3059_v53 = vpop.f32.mrb[6].mxu0 }
 0x24d   : > { %v7583_v54 = vadd.f32 %v3059_v53, %v1469_v26  ;;  %v5278_v55 = vpop.f32.mrb[7].mxu0 }
 0x250   : > { %v3064_v3 = vpop.f32.mrb[8].mxu0 }
 0x251   : > { %v7585_v56 = vadd.f32 %v3064_v3, %v1474_v28  ;;  %v5281_v57 = vpop.f32.mrb[9].mxu0 }
 0x254   : > { %v3069_v58 = vpop.f32.mrb[10].mxu0 }
 0x255   : > { %v7587_v59 = vadd.f32 %v3069_v58, %v1479_v30  ;;  %v5284_v60 = vpop.f32.mrb[11].mxu0 }
 0x258   : > { %v3074_v61 = vpop.f32.mrb[12].mxu0 }
 0x259   : > { %v7589_v62 = vadd.f32 %v3074_v61, %v1484_v7  ;;  %v5287_v63 = vpop.f32.mrb[13].mxu0 }
 0x25c   : > { %v3079_v0 = vpop.f32.mrb[14].mxu0 }
 0x25d   : > { %v7591_v1 = vadd.f32 %v3079_v0, %v1489_v33  ;;  %v5290_v2 = vpop.f32.mrb[15].mxu0 }
 0x260   : > { %v3084_v4 = vpop.f32.mrb[16].mxu0 }
 0x261   : > { %v7593_v5 = vadd.f32 %v3084_v4, %v1494_v6  ;;  %v5293_v8 = vpop.f32.mrb[17].mxu0 }
 0x264   : > { %v3089_v9 = vpop.f32.mrb[18].mxu0 }
 0x265   : > { %v7595_v10 = vadd.f32 %v3089_v9, %v1499_v36  ;;  %v5296_v11 = vpop.f32.mrb[19].mxu0 }
 0x268   : > { %v3094_v12 = vpop.f32.mrb[20].mxu0 }
 0x269   : > { %v7597_v13 = vadd.f32 %v3094_v12, %v1504_v38  ;;  %v5299_v14 = vpop.f32.mrb[21].mxu0 }
 0x26c   : > { %v3099_v15 = vpop.f32.mrb[22].mxu0 }
 0x26d   : > { %v7599_v16 = vadd.f32 %v3099_v15, %v1509_v40  ;;  %v5302_v17 = vpop.f32.mrb[23].mxu0 }
 0x26f   : > { %v1837_v18 = vpop.f32.mrb[26].mxu1 }
 0x270   : > { %v3104_v19 = vpop.f32.mrb[24].mxu0  ;;  %v4992_v20 = vpop.f32.mrb[27].mxu1 }
 0x271   : > { %v7601_v21 = vadd.f32 %v3104_v19, %v1514_v42  ;;  %v5305_v22 = vpop.f32.mrb[25].mxu0 }
 0x273   : > { %v1842_v23 = vpop.f32.mrb[28].mxu1 }
 0x274   : > { %v3109_v24 = vpop.f32.mrb[26].mxu0  ;;  %v4995_v25 = vpop.f32.mrb[29].mxu1 }
 0x275   : > { %v7603_v26 = vadd.f32 %v3109_v24, %v1837_v18  ;;  %v5308_v27 = vpop.f32.mrb[27].mxu0 }
 0x277   : > { %v1847_v28 = vpop.f32.mrb[30].mxu1 }
 0x278   : > { %v3114_v29 = vpop.f32.mrb[28].mxu0  ;;  %v4998_v30 = vpop.f32.mrb[31].mxu1 }
 0x279   : > { %v7605_v31 = vadd.f32 %v3114_v29, %v1842_v23  ;;  %v5311_v7 = vpop.f32.mrb[29].mxu0 }
 0x27a   : > { %v6045_v7 = vmov (%p3193_p4), 0.0  }
 0x27b   : > { %v1852_v32 = vpop.f32.mrb[32].mxu1  ;;  %3199 = vst [vmem:[#allocation2] sm:$0x1] (%p3193_p4), %v6045_v7  ;;  %3200 = vst [vmem:[#allocation3] sm:$0x1] (%p3193_p4), %v6045_v7 }
 0x27c   : > { %v3119_v33 = vpop.f32.mrb[30].mxu0  ;;  %v5001_v34 = vpop.f32.mrb[33].mxu1 }
 0x27d   : > { %v7607_v6 = vadd.f32 %v3119_v33, %v1847_v28  ;;  %v5314_v35 = vpop.f32.mrb[31].mxu0 }
 0x27f   : > { %v1857_v36 = vpop.f32.mrb[34].mxu1 }
 0x280   : > { %v3124_v37 = vpop.f32.mrb[32].mxu0  ;;  %v5004_v38 = vpop.f32.mrb[35].mxu1 }
 0x281   : > { %v7609_v39 = vadd.f32 %v3124_v37, %v1852_v32  ;;  %v5317_v40 = vpop.f32.mrb[33].mxu0 }
 0x283   : > { %v1862_v41 = vpop.f32.mrb[36].mxu1 }
 0x284   : > { %v3129_v42 = vpop.f32.mrb[34].mxu0  ;;  %v5007_v43 = vpop.f32.mrb[37].mxu1 }
 0x285   : > { %v7611_v44 = vadd.f32 %v3129_v42, %v1857_v36  ;;  %v5320_v46 = vpop.f32.mrb[35].mxu0 }
 0x287   : > { %v1867_v47 = vpop.f32.mrb[38].mxu1 }
 0x288   : > { %v3134_v49 = vpop.f32.mrb[36].mxu0  ;;  %v5010_v50 = vpop.f32.mrb[39].mxu1 }
 0x289   : > { %v7613_v52 = vadd.f32 %v3134_v49, %v1862_v41  ;;  %v5323_v53 = vpop.f32.mrb[37].mxu0 }
 0x28b   : > { %v1872_v55 = vpop.f32.mrb[40].mxu1 }
 0x28c   : > { %v3139_v3 = vpop.f32.mrb[38].mxu0  ;;  %v5013_v57 = vpop.f32.mrb[41].mxu1 }
 0x28d   : > { %v7615_v58 = vadd.f32 %v3139_v3, %v1867_v47  ;;  %v5326_v60 = vpop.f32.mrb[39].mxu0 }
 0x28f   : > { %v1877_v61 = vpop.f32.mrb[42].mxu1 }
 0x290   : > { %v3144_v63 = vpop.f32.mrb[40].mxu0  ;;  %v5016_v0 = vpop.f32.mrb[43].mxu1 }
 0x291   : > { %v7617_v2 = vadd.f32 %v3144_v63, %v1872_v55  ;;  %v5329_v4 = vpop.f32.mrb[41].mxu0 }
 0x293   : > { %v1882_v8 = vpop.f32.mrb[44].mxu1 }
 0x294   : > { %v3149_v9 = vpop.f32.mrb[42].mxu0  ;;  %v5019_v11 = vpop.f32.mrb[45].mxu1 }
 0x295   : > { %v7619_v12 = vadd.f32 %v3149_v9, %v1877_v61  ;;  %v5332_v14 = vpop.f32.mrb[43].mxu0 }
 0x297   : > { %v1887_v15 = vpop.f32.mrb[46].mxu1 }
 0x298   : > { %v3154_v17 = vpop.f32.mrb[44].mxu0  ;;  %v5022_v18 = vpop.f32.mrb[47].mxu1 }
 0x299   : > { %v7621_v19 = vadd.f32 %v3154_v17, %v1882_v8  ;;  %v5335_v20 = vpop.f32.mrb[45].mxu0 }
 0x29b   : > { %v1892_v22 = vpop.f32.mrb[48].mxu1  ;;  %3198 = sbr.rel (!%p3193_p4) target bundleno = 674 (0x2a2), region = 52 }
 0x29c   : > { %v3159_v23 = vpop.f32.mrb[46].mxu0  ;;  %v5025_v24 = vpop.f32.mrb[49].mxu1 }
 0x29d   : > { %v7623_v25 = vadd.f32 %v3159_v23, %v1887_v15  ;;  %v5338_v27 = vpop.f32.mrb[47].mxu0 }
 0x2a0   : > { %v3164_v28 = vpop.f32.mrb[48].mxu0 }
 0x2a1   : > { %v7625_v29 = vadd.f32 %v3164_v28, %v1892_v22  ;;  %v5341_v30 = vpop.f32.mrb[49].mxu0 }
 0x2a2 PF: > { %p4309_p5 = scmp.ne.s32.totalorder %s6032_s24, 0 }
 0x2a3   : > { %v3206_v32 = vld [vmem:[%s8071_s6 + $0x10] sm:$0xff] (!%p4309_p5)  ;;  %v3204_v33 = vld [vmem:[%s8071_s6] sm:$0xff] (!%p4309_p5)  ;;  %v6046_v34 = vmov (!%p4309_p5), 0   ;;  %v3207_v35 = vld [vmem:[%s8071_s6 + $0x18] sm:$0xff] (!%p4309_p5) }
 0x2a4   : > { %3203 = sbr.rel (%p4309_p5) target bundleno = 876 (0x36c), region = 56  ;;  %6015 = vset.pattern.permute.xlu1 (!%p4309_p5), %v6046_v34  ;;  %6014 = vset.pattern.permute.xlu0 (!%p4309_p5), %v6046_v34  ;;  %v3205_v36 = vld [vmem:[%s8071_s6 + $0x8] sm:$0xff] (!%p4309_p5)  ;;  %v3208_v38 = vld [vmem:[%s8071_s6 + $0x20] sm:$0xff] (!%p4309_p5)  ;;  %v3211_v40 = vld [vmem:[%s8071_s6 + $0x38] sm:$0xff] (!%p4309_p5) }
 0x2a5   : > { %3241 = vperm.xlu1 (!%p4309_p5), %6015, %v3206_v32   ;;  %3231 = vperm.xlu0 (!%p4309_p5), %6014, %v3204_v33   ;;  %v3209_v37 = vld [vmem:[%s8071_s6 + $0x28] sm:$0xff] (!%p4309_p5)  ;;  %v3210_v41 = vld [vmem:[%s8071_s6 + $0x30] sm:$0xff] (!%p4309_p5)  ;;  %v3212_v43 = vld [vmem:[%s8071_s6 + $0x40] sm:$0xff] (!%p4309_p5) }
 0x2a6   : > { %v3213_v42 = vld [vmem:[%s8071_s6 + $0x48] sm:$0xff] (!%p4309_p5)  ;;  %v3215_v46 = vld [vmem:[%s8071_s6 + $0x58] sm:$0xff] (!%p4309_p5)  ;;  %v3214_v47 = vld [vmem:[%s8071_s6 + $0x50] sm:$0xff] (!%p4309_p5) }
 0x2a7   : > { %v3217_v49 = vld [vmem:[%s8071_s6 + $0x68] sm:$0xff] (!%p4309_p5)  ;;  %v3216_v50 = vld [vmem:[%s8071_s6 + $0x60] sm:$0xff] (!%p4309_p5)  ;;  %v3219_v53 = vld [vmem:[%s8071_s6 + $0x78] sm:$0xff] (!%p4309_p5) }
 0x2a8   : > { %v3218_v55 = vld [vmem:[%s8071_s6 + $0x70] sm:$0xff] (!%p4309_p5)  ;;  %v3221_v3 = vld [vmem:[%s8071_s6 + $0x88] sm:$0xff] (!%p4309_p5)  ;;  %v3220_v57 = vld [vmem:[%s8071_s6 + $0x80] sm:$0xff] (!%p4309_p5) }
 0x2a9   : > { %3246 = vperm.xlu1 (!%p4309_p5), %6015, %v3207_v35   ;;  %3236 = vperm.xlu0 (!%p4309_p5), %6014, %v3205_v36   ;;  %v3223_v60 = vld [vmem:[%s8071_s6 + $0x98] sm:$0xff] (!%p4309_p5)  ;;  %v3222_v61 = vld [vmem:[%s8071_s6 + $0x90] sm:$0xff] (!%p4309_p5)  ;;  %v3225_v63 = vld [vmem:[%s8071_s6 + $0xa8] sm:$0xff] (!%p4309_p5) }
 0x2aa   : > { %v3224_v0 = vld [vmem:[%s8071_s6 + $0xa0] sm:$0xff] (!%p4309_p5)  ;;  %v3227_v4 = vld [vmem:[%s8071_s6 + $0xb8] sm:$0xff] (!%p4309_p5)  ;;  %v3226_v8 = vld [vmem:[%s8071_s6 + $0xb0] sm:$0xff] (!%p4309_p5) }
 0x2ab   : > { %v3228_v9 = vld [vmem:[%s8071_s6 + $0xc0] sm:$0xff] }
 0x2ad   : > { %3256 = vperm.xlu1 %6015, %v3209_v37   ;;  %3251 = vperm.xlu0 %6014, %v3208_v38  }
 0x2b1   : > { %3266 = vperm.xlu1 %6015, %v3211_v40   ;;  %3261 = vperm.xlu0 %6014, %v3210_v41  }
 0x2b5   : > { %3276 = vperm.xlu1 %6015, %v3213_v42   ;;  %3271 = vperm.xlu0 %6014, %v3212_v43  }
 0x2b9   : > { %3286 = vperm.xlu1 %6015, %v3215_v46   ;;  %3281 = vperm.xlu0 %6014, %v3214_v47  }
 0x2bd   : > { %3296 = vperm.xlu1 %6015, %v3217_v49   ;;  %3291 = vperm.xlu0 %6014, %v3216_v50  }
 0x2c1   : > { %3306 = vperm.xlu1 %6015, %v3219_v53   ;;  %3301 = vperm.xlu0 %6014, %v3218_v55  }
 0x2c5   : > { %3316 = vperm.xlu1 %6015, %v3221_v3   ;;  %3311 = vperm.xlu0 %6014, %v3220_v57  }
 0x2c9   : > { %3326 = vperm.xlu1 %6015, %v3223_v60   ;;  %3321 = vperm.xlu0 %6014, %v3222_v61  }
 0x2cd   : > { %3336 = vperm.xlu1 %6015, %v3225_v63   ;;  %3331 = vperm.xlu0 %6014, %v3224_v0  }
 0x2d1   : > { %3346 = vperm.xlu1 %6015, %v3227_v4   ;;  %3341 = vperm.xlu0 %6014, %v3226_v8  }
 0x2d5   : > { %3351 = vperm.xlu0 %6014, %v3228_v9  }
 0x324   : > { %v3242_v11 = vpop.permute.xlu1 %3241  ;;  %v3232_v14 = vpop.permute.xlu0 %3231 }
 0x325   : > { %v3354_v15 = vmul.f32 %v7577_v45, %v3232_v14  ;;  %v3356_v20 = vmul.f32 %v7581_v51, %v3242_v11 }
 0x327   : > { %v3413_v23 = vmul.f32 %v7577_v45, %v3354_v15  ;;  %v3415_v32 = vmul.f32 %v7581_v51, %v3356_v20 }
 0x328   : > { %v3247_v17 = vpop.permute.xlu1 %3246  ;;  %v3237_v18 = vpop.permute.xlu0 %3236 }
 0x329   : > { %v3355_v22 = vmul.f32 %v7579_v48, %v3237_v18  ;;  %v3357_v24 = vmul.f32 %v7583_v54, %v3247_v17 }
 0x32b   : > { %v3380_v27 = vadd.f32 %v3355_v22, %v3354_v15  ;;  %v3414_v28 = vmul.f32 %v7579_v48, %v3355_v22  ;;  %v3416_v36 = vmul.f32 %v7583_v54, %v3357_v24 }
 0x32c   : > { %v3257_v30 = vpop.permute.xlu1 %3256  ;;  %v3252_v7 = vpop.permute.xlu0 %3251 }
 0x32d   : > { %v3381_v33 = vadd.f32 %v3380_v27, %v3356_v20  ;;  %v3438_v34 = vadd.f32 %v3414_v28, %v3413_v23  ;;  %v3358_v35 = vmul.f32 %v7585_v56, %v3252_v7  ;;  %v3359_v38 = vmul.f32 %v7587_v59, %v3257_v30 }
 0x32f   : > { %v3439_v37 = vadd.f32 %v3438_v34, %v3415_v32  ;;  %v3382_v40 = vadd.f32 %v3381_v33, %v3357_v24  ;;  %v3417_v47 = vmul.f32 %v7585_v56, %v3358_v35  ;;  %v3418_v50 = vmul.f32 %v7587_v59, %v3359_v38 }
 0x330   : > { %v3267_v41 = vpop.permute.xlu1 %3266  ;;  %v3262_v42 = vpop.permute.xlu0 %3261 }
 0x331   : > { %v3440_v43 = vadd.f32 %v3439_v37, %v3416_v36  ;;  %v3383_v46 = vadd.f32 %v3382_v40, %v3358_v35  ;;  %v3360_v49 = vmul.f32 %v7589_v62, %v3262_v42  ;;  %v3361_v55 = vmul.f32 %v7591_v1, %v3267_v41 }
 0x333   : > { %v3441_v53 = vadd.f32 %v3440_v43, %v3417_v47  ;;  %v3384_v3 = vadd.f32 %v3383_v46, %v3359_v38  ;;  %v3419_v0 = vmul.f32 %v7589_v62, %v3360_v49  ;;  %v3420_v8 = vmul.f32 %v7591_v1, %v3361_v55 }
 0x334   : > { %v3277_v57 = vpop.permute.xlu1 %3276  ;;  %v3272_v60 = vpop.permute.xlu0 %3271 }
 0x335   : > { %v3442_v61 = vadd.f32 %v3441_v53, %v3418_v50  ;;  %v3385_v63 = vadd.f32 %v3384_v3, %v3360_v49  ;;  %v3362_v4 = vmul.f32 %v7593_v5, %v3272_v60  ;;  %v3363_v11 = vmul.f32 %v7595_v10, %v3277_v57 }
 0x337   : > { %v3443_v9 = vadd.f32 %v3442_v61, %v3419_v0  ;;  %v3386_v14 = vadd.f32 %v3385_v63, %v3361_v55  ;;  %v3421_v22 = vmul.f32 %v7593_v5, %v3362_v4  ;;  %v3422_v24 = vmul.f32 %v7595_v10, %v3363_v11 }
 0x338   : > { %v3287_v15 = vpop.permute.xlu1 %3286  ;;  %v3282_v17 = vpop.permute.xlu0 %3281 }
 0x339   : > { %v3444_v18 = vadd.f32 %v3443_v9, %v3420_v8  ;;  %v3387_v20 = vadd.f32 %v3386_v14, %v3362_v4  ;;  %v3364_v23 = vmul.f32 %v7597_v13, %v3282_v17  ;;  %v3365_v28 = vmul.f32 %v7599_v16, %v3287_v15 }
 0x33b   : > { %v3445_v27 = vadd.f32 %v3444_v18, %v3421_v22  ;;  %v3388_v30 = vadd.f32 %v3387_v20, %v3363_v11  ;;  %v3423_v35 = vmul.f32 %v7597_v13, %v3364_v23  ;;  %v3424_v37 = vmul.f32 %v7599_v16, %v3365_v28 }
 0x33c   : > { %v3297_v7 = vpop.permute.xlu1 %3296  ;;  %v3292_v32 = vpop.permute.xlu0 %3291 }
 0x33d   : > { %v3446_v33 = vadd.f32 %v3445_v27, %v3422_v24  ;;  %v3389_v34 = vadd.f32 %v3388_v30, %v3364_v23  ;;  %v3366_v36 = vmul.f32 %v7601_v21, %v3292_v32  ;;  %v3367_v40 = vmul.f32 %v7603_v26, %v3297_v7 }
 0x33f   : > { %v3447_v38 = vadd.f32 %v3446_v33, %v3423_v35  ;;  %v3390_v41 = vadd.f32 %v3389_v34, %v3365_v28  ;;  %v3425_v49 = vmul.f32 %v7601_v21, %v3366_v36  ;;  %v3426_v53 = vmul.f32 %v7603_v26, %v3367_v40 }
 0x340   : > { %v3307_v42 = vpop.permute.xlu1 %3306  ;;  %v3302_v43 = vpop.permute.xlu0 %3301 }
 0x341   : > { %v3448_v46 = vadd.f32 %v3447_v38, %v3424_v37  ;;  %v3391_v47 = vadd.f32 %v3390_v41, %v3366_v36  ;;  %v3368_v50 = vmul.f32 %v7605_v31, %v3302_v43  ;;  %v3369_v3 = vmul.f32 %v7607_v6, %v3307_v42 }
 0x343   : > { %v3449_v55 = vadd.f32 %v3448_v46, %v3425_v49  ;;  %v3392_v57 = vadd.f32 %v3391_v47, %v3367_v40  ;;  %v3427_v4 = vmul.f32 %v7605_v31, %v3368_v50  ;;  %v3428_v9 = vmul.f32 %v7607_v6, %v3369_v3 }
 0x344   : > { %v3317_v60 = vpop.permute.xlu1 %3316  ;;  %v3312_v61 = vpop.permute.xlu0 %3311 }
 0x345   : > { %v3450_v63 = vadd.f32 %v3449_v55, %v3426_v53  ;;  %v3393_v0 = vadd.f32 %v3392_v57, %v3368_v50  ;;  %v3370_v8 = vmul.f32 %v7609_v39, %v3312_v61  ;;  %v3371_v14 = vmul.f32 %v7611_v44, %v3317_v60 }
 0x347   : > { %v3451_v11 = vadd.f32 %v3450_v63, %v3427_v4  ;;  %v3394_v15 = vadd.f32 %v3393_v0, %v3369_v3  ;;  %v3429_v23 = vmul.f32 %v7609_v39, %v3370_v8  ;;  %v3430_v27 = vmul.f32 %v7611_v44, %v3371_v14 }
 0x348   : > { %v3327_v17 = vpop.permute.xlu1 %3326  ;;  %v3322_v18 = vpop.permute.xlu0 %3321 }
 0x349   : > { %v3452_v20 = vadd.f32 %v3451_v11, %v3428_v9  ;;  %v3395_v22 = vadd.f32 %v3394_v15, %v3370_v8  ;;  %v3372_v24 = vmul.f32 %v7613_v52, %v3322_v18  ;;  %v3373_v30 = vmul.f32 %v7615_v58, %v3327_v17 }
 0x34b   : > { %v3453_v28 = vadd.f32 %v3452_v20, %v3429_v23  ;;  %v3396_v7 = vadd.f32 %v3395_v22, %v3371_v14  ;;  %v3431_v36 = vmul.f32 %v7613_v52, %v3372_v24  ;;  %v3432_v38 = vmul.f32 %v7615_v58, %v3373_v30 }
 0x34c   : > { %v3337_v32 = vpop.permute.xlu1 %3336  ;;  %v3332_v33 = vpop.permute.xlu0 %3331 }
 0x34d   : > { %v3454_v34 = vadd.f32 %v3453_v28, %v3430_v27  ;;  %v3397_v35 = vadd.f32 %v3396_v7, %v3372_v24  ;;  %v3374_v37 = vmul.f32 %v7617_v2, %v3332_v33  ;;  %v3375_v41 = vmul.f32 %v7619_v12, %v3337_v32 }
 0x34f   : > { %v3455_v40 = vadd.f32 %v3454_v34, %v3431_v36  ;;  %v3398_v42 = vadd.f32 %v3397_v35, %v3373_v30  ;;  %v3433_v50 = vmul.f32 %v7617_v2, %v3374_v37  ;;  %v3434_v55 = vmul.f32 %v7619_v12, %v3375_v41  ;;  %v3379_v34 = vld [vmem:[#allocation2] sm:$0x1] }
 0x350   : > { %v3347_v43 = vpop.permute.xlu1 %3346  ;;  %v3342_v46 = vpop.permute.xlu0 %3341 }
 0x351   : > { %v3456_v47 = vadd.f32 %v3455_v40, %v3432_v38  ;;  %v3399_v49 = vadd.f32 %v3398_v42, %v3374_v37  ;;  %v3376_v53 = vmul.f32 %v7621_v19, %v3342_v46  ;;  %v3377_v57 = vmul.f32 %v7623_v25, %v3347_v43  ;;  %v3412_v37 = vld [vmem:[#allocation3] sm:$0x1] }
 0x353   : > { %v3457_v3 = vadd.f32 %v3456_v47, %v3433_v50  ;;  %v3400_v60 = vadd.f32 %v3399_v49, %v3375_v41  ;;  %v3435_v4 = vmul.f32 %v7621_v19, %v3376_v53  ;;  %v3436_v9 = vmul.f32 %v7623_v25, %v3377_v57 }
 0x354   : > { %v3352_v61 = vpop.permute.xlu0 %3351 }
 0x355   : > { %v3458_v63 = vadd.f32 %v3457_v3, %v3434_v55  ;;  %v3401_v0 = vadd.f32 %v3400_v60, %v3376_v53  ;;  %v3378_v8 = vmul.f32 %v7625_v29, %v3352_v61 }
 0x357   : > { %v3459_v11 = vadd.f32 %v3458_v63, %v3435_v4  ;;  %v3402_v14 = vadd.f32 %v3401_v0, %v3377_v57  ;;  %v3437_v18 = vmul.f32 %v7625_v29, %v3378_v8 }
 0x359   : > { %v3460_v15 = vadd.f32 %v3459_v11, %v3436_v9  ;;  %v3403_v17 = vadd.f32 %v3402_v14, %v3378_v8 }
 0x35b   : > { %v3404_v20 = vrot.slane %v3403_v17, 4  ;;  %v3461_v22 = vadd.f32 %v3460_v15, %v3437_v18 }
 0x35d   : > { %v3405_v23 = vadd.f32 %v3404_v20, %v3403_v17  ;;  %v3462_v24 = vrot.slane %v3461_v22, 4 }
 0x35f   : > { %v3406_v27 = vrot.slane %v3405_v23, 2  ;;  %v3463_v28 = vadd.f32 %v3462_v24, %v3461_v22 }
 0x361   : > { %v3407_v30 = vadd.f32 %v3406_v27, %v3405_v23  ;;  %v3464_v7 = vrot.slane %v3463_v28, 2 }
 0x363   : > { %v3408_v32 = vrot.slane %v3407_v30, 1  ;;  %v3465_v33 = vadd.f32 %v3464_v7, %v3463_v28 }
 0x365   : > { %v3409_v35 = vadd.f32 %v3408_v32, %v3407_v30  ;;  %v3466_v36 = vrot.slane %v3465_v33, 1 }
 0x367   : > { %v3410_v38 = vadd.f32 %v3409_v35, %v3379_v34  ;;  %v3467_v40 = vadd.f32 %v3466_v36, %v3465_v33 }
 0x369   : > { %3411 = vst [vmem:[#allocation2] sm:$0x1] %v3410_v38  ;;  %v3468_v41 = vadd.f32 %v3467_v40, %v3412_v37 }
 0x36b   : > { %3469 = vst [vmem:[#allocation3] sm:$0x1] %v3468_v41 }
 0x36c PF: > { %p3470_p6 = scmp.eq.s32.totalorder %s6032_s24, 1 }
 0x36d   : > { %v3476_v42 = vld [vmem:[%s8069_s4] sm:$0xff] (%p3470_p6)  ;;  %v3477_v43 = vld [vmem:[%s8069_s4 + $0x8] sm:$0xff] (%p3470_p6)  ;;  %v3478_v46 = vld [vmem:[%s8069_s4 + $0x10] sm:$0xff] (%p3470_p6)  ;;  %v6047_v47 = vmov (%p3470_p6), 0.0|0.0   ;;  %vm6048_vm2 = vmmov (%p3470_p6), 0   ;;  %v6049_v53 = vmov (%p3470_p6), 0.0  }
 0x36e   : > { %3474 = sbr.rel (!%p3470_p6) target bundleno = 1361 (0x551), region = 60  ;;  %5509 = vmatprep.subr.bf16.mxu0 (%p3470_p6), %v6047_v47  ;;  %v5510_v49 = vpack.c.bf16 (%p3470_p6), %v3477_v43, %v3476_v42  ;;  %5533 = vmatprep.subr.bf16.mxu1 (%p3470_p6), %v6047_v47  ;;  %v3479_v50 = vld [vmem:[%s8069_s4 + $0x18] sm:$0xff] (%p3470_p6)  ;;  %v3480_v3 = vld [vmem:[%s8069_s4 + $0x20] sm:$0xff] (%p3470_p6)  ;;  %v3481_v57 = vld [vmem:[%s8069_s4 + $0x28] sm:$0xff] (%p3470_p6) }
 0x36f   : > { %5374 = vmatprep.mubr.msk.f32.mxu0 (%p3470_p6), %vm6048_vm2, %v6049_v53  ;;  %5409 = vmatprep.mubr.msk.f32.mxu1 (%p3470_p6), %vm6048_vm2, %v6049_v53  ;;  %v5513_v55 = vpack.c.bf16 (%p3470_p6), %v3479_v50, %v3478_v46  ;;  %v5516_v60 = vpack.c.bf16 (%p3470_p6), %v3481_v57, %v3480_v3  ;;  %v3482_v61 = vld [vmem:[%s8069_s4 + $0x30] sm:$0xff] (%p3470_p6)  ;;  %v3483_v63 = vld [vmem:[%s8069_s4 + $0x38] sm:$0xff] (%p3470_p6)  ;;  %v3484_v4 = vld [vmem:[%s8069_s4 + $0x40] sm:$0xff] (%p3470_p6) }
 0x370   : > { %5511 = vmatpush3.bf16.msra.mxu0 (%p3470_p6), %v5510_v49  ;;  %5535 = vmatpush3.bf16.msra.mxu1 (%p3470_p6), %v5510_v49  ;;  %v5519_v0 = vpack.c.bf16 (%p3470_p6), %v3483_v63, %v3482_v61  ;;  %v3485_v8 = vld [vmem:[%s8069_s4 + $0x48] sm:$0xff] (%p3470_p6)  ;;  %v3486_v11 = vld [vmem:[%s8069_s4 + $0x50] sm:$0xff] (%p3470_p6)  ;;  %v3487_v14 = vld [vmem:[%s8069_s4 + $0x58] sm:$0xff] (%p3470_p6) }
 0x371   : > { %5512 = vmatprep.subr.bf16.mxu0 (%p3470_p6), %v6047_v47  ;;  %5536 = vmatprep.subr.bf16.mxu1 (%p3470_p6), %v6047_v47  ;;  %v5522_v9 = vpack.c.bf16 (%p3470_p6), %v3485_v8, %v3484_v4  ;;  %v5525_v15 = vpack.c.bf16 (%p3470_p6), %v3487_v14, %v3486_v11  ;;  %v3488_v17 = vld [vmem:[%s8069_s4 + $0x60] sm:$0xff] (%p3470_p6)  ;;  %v3489_v18 = vld [vmem:[%s8069_s4 + $0x68] sm:$0xff] (%p3470_p6)  ;;  %v3490_v22 = vld [vmem:[%s8069_s4 + $0x70] sm:$0xff] (%p3470_p6) }
 0x372   : > { %v5528_v20 = vpack.c.bf16 (%p3470_p6), %v3489_v18, %v3488_v17  ;;  %v3491_v23 = vld [vmem:[%s8069_s4 + $0x78] sm:$0xff] (%p3470_p6)  ;;  %v3633_v27 = vld [vmem:[%s8070_s5] sm:$0xff] (%p3470_p6)  ;;  %v3634_v28 = vld [vmem:[%s8070_s5 + $0x8] sm:$0xff] (%p3470_p6) }
 0x373   : > { %v5531_v24 = vpack.c.bf16 (%p3470_p6), %v3491_v23, %v3490_v22  ;;  %v3475_v30 = vld [vmem:[#allocation2] sm:$0x1] (%p3470_p6)  ;;  %v3562_v7 = vld [vmem:[#allocation3] sm:$0x1] (%p3470_p6)  ;;  %v5558_v32 = vpack.c.bf16 (%p3470_p6), %v3634_v28, %v3633_v27  ;;  %v3635_v33 = vld [vmem:[%s8070_s5 + $0x10] sm:$0xff] (%p3470_p6) }
 0x374   : > { %5514 = vmatpush3.bf16.msra.mxu0 (%p3470_p6), %v5513_v55  ;;  %5538 = vmatpush3.bf16.msra.mxu1 (%p3470_p6), %v5513_v55  ;;  %v3636_v34 = vld [vmem:[%s8070_s5 + $0x18] sm:$0xff] (%p3470_p6)  ;;  %v3637_v36 = vld [vmem:[%s8070_s5 + $0x20] sm:$0xff] (%p3470_p6)  ;;  %v3638_v37 = vld [vmem:[%s8070_s5 + $0x28] sm:$0xff] (%p3470_p6) }
 0x375   : > { %5515 = vmatprep.subr.bf16.mxu0 %v6047_v47  ;;  %5539 = vmatprep.subr.bf16.mxu1 %v6047_v47  ;;  %v5561_v35 = vpack.c.bf16 %v3636_v34, %v3635_v33  ;;  %v5564_v38 = vpack.c.bf16 %v3638_v37, %v3637_v36  ;;  %v3639_v40 = vld [vmem:[%s8070_s5 + $0x30] sm:$0xff]  ;;  %v3640_v41 = vld [vmem:[%s8070_s5 + $0x38] sm:$0xff]  ;;  %v3641_v43 = vld [vmem:[%s8070_s5 + $0x40] sm:$0xff] }
 0x376   : > { %v5567_v42 = vpack.c.bf16 %v3640_v41, %v3639_v40  ;;  %v3642_v46 = vld [vmem:[%s8070_s5 + $0x48] sm:$0xff]  ;;  %v3643_v50 = vld [vmem:[%s8070_s5 + $0x50] sm:$0xff]  ;;  %v3645_v3 = vld [vmem:[%s8070_s5 + $0x60] sm:$0xff] }
 0x377   : > { %v5570_v49 = vpack.c.bf16 %v3642_v46, %v3641_v43  ;;  %v3646_v57 = vld [vmem:[%s8070_s5 + $0x68] sm:$0xff]  ;;  %v3647_v61 = vld [vmem:[%s8070_s5 + $0x70] sm:$0xff]  ;;  %v3648_v63 = vld [vmem:[%s8070_s5 + $0x78] sm:$0xff] }
 0x378   : > { %5517 = vmatpush3.bf16.msra.mxu0 %v5516_v60  ;;  %5541 = vmatpush3.bf16.msra.mxu1 %v5516_v60  ;;  %v5576_v60 = vpack.c.bf16 %v3646_v57, %v3645_v3  ;;  %v3799_v28 = vld [vmem:[%s8067_s2] sm:$0x1] }
 0x379   : > { %5518 = vmatprep.subr.bf16.mxu0 %v6047_v47  ;;  %5542 = vmatprep.subr.bf16.mxu1 %v6047_v47 }
 0x37c   : > { %5520 = vmatpush3.bf16.msra.mxu0 %v5519_v0  ;;  %5544 = vmatpush3.bf16.msra.mxu1 %v5519_v0  ;;  %v5579_v0 = vpack.c.bf16 %v3648_v63, %v3647_v61 }
 0x37d   : > { %5521 = vmatprep.subr.bf16.mxu0 %v6047_v47  ;;  %5545 = vmatprep.subr.bf16.mxu1 %v6047_v47 }
 0x380   : > { %5523 = vmatpush3.bf16.msra.mxu0 %v5522_v9  ;;  %5547 = vmatpush3.bf16.msra.mxu1 %v5522_v9 }
 0x381   : > { %5524 = vmatprep.subr.bf16.mxu0 %v6047_v47  ;;  %5548 = vmatprep.subr.bf16.mxu1 %v6047_v47 }
 0x384   : > { %5526 = vmatpush3.bf16.msra.mxu0 %v5525_v15  ;;  %5550 = vmatpush3.bf16.msra.mxu1 %v5525_v15 }
 0x385   : > { %5527 = vmatprep.subr.bf16.mxu0 %v6047_v47  ;;  %5551 = vmatprep.subr.bf16.mxu1 %v6047_v47 }
 0x388   : > { %5529 = vmatpush3.bf16.msra.mxu0 %v5528_v20  ;;  %5553 = vmatpush3.bf16.msra.mxu1 %v5528_v20 }
 0x389   : > { %5530 = vmatprep.subr.bf16.mxu0 %v6047_v47  ;;  %5554 = vmatprep.subr.bf16.mxu1 %v6047_v47 }
 0x38c   : > { %5532 = vmatpush3.bf16.msra.mxu0 %v5531_v24  ;;  %5556 = vmatpush3.bf16.msra.mxu1 %v5531_v24 }
 0x38d   : > { %5557 = vmatprep.subr.bf16.mxu0 %v6047_v47  ;;  %5581 = vmatprep.subr.bf16.mxu1 %v6047_v47 }
 0x38f   : > { %5375 = vmatmul.mubr.f32.vlgmr.msra.gmra.mrb[0].mxu0 %v3475_v30  ;;  %5410 = vmatmul.mubr.f32.vlgmr.msra.gmra.mrb[0].mxu1 %v3562_v7 }
 0x390   : > { %5559 = vmatpush3.bf16.msra.mxu0 %v5558_v32  ;;  %5583 = vmatpush3.bf16.msra.mxu1 %v5558_v32  ;;  %v3797_v32 = vld [vmem:[%s8068_s3] sm:$0x1] }
 0x391   : > { %5560 = vmatprep.subr.bf16.mxu0 %v6047_v47  ;;  %5584 = vmatprep.subr.bf16.mxu1 %v6047_v47 }
 0x392   : > { %5444 = vmatprep.mubr.msk.f32.mxu0 %vm6048_vm2, %v6049_v53  ;;  %5479 = vmatprep.mubr.msk.f32.mxu1 %vm6048_vm2, %v6049_v53  ;;  %v3644_v53 = vld [vmem:[%s8070_s5 + $0x58] sm:$0xff] }
 0x393   : > { %v5573_v55 = vpack.c.bf16 %v3644_v53, %v3643_v50 }
 0x394   : > { %5562 = vmatpush3.bf16.msra.mxu0 %v5561_v35  ;;  %5586 = vmatpush3.bf16.msra.mxu1 %v5561_v35 }
 0x395   : > { %5563 = vmatprep.subr.bf16.mxu0 %v6047_v47  ;;  %5587 = vmatprep.subr.bf16.mxu1 %v6047_v47 }
 0x398   : > { %5565 = vmatpush3.bf16.msra.mxu0 %v5564_v38  ;;  %5589 = vmatpush3.bf16.msra.mxu1 %v5564_v38 }
 0x399   : > { %5566 = vmatprep.subr.bf16.mxu0 %v6047_v47  ;;  %5590 = vmatprep.subr.bf16.mxu1 %v6047_v47 }
 0x39c   : > { %5568 = vmatpush3.bf16.msra.mxu0 %v5567_v42  ;;  %5592 = vmatpush3.bf16.msra.mxu1 %v5567_v42 }
 0x39d   : > { %5569 = vmatprep.subr.bf16.mxu0 %v6047_v47  ;;  %5593 = vmatprep.subr.bf16.mxu1 %v6047_v47 }
 0x3a0   : > { %5571 = vmatpush3.bf16.msra.mxu0 %v5570_v49  ;;  %5595 = vmatpush3.bf16.msra.mxu1 %v5570_v49 }
 0x3a1   : > { %5572 = vmatprep.subr.bf16.mxu0 %v6047_v47  ;;  %5596 = vmatprep.subr.bf16.mxu1 %v6047_v47 }
 0x3a4   : > { %5574 = vmatpush3.bf16.msra.mxu0 %v5573_v55  ;;  %5598 = vmatpush3.bf16.msra.mxu1 %v5573_v55 }
 0x3a5   : > { %5575 = vmatprep.subr.bf16.mxu0 %v6047_v47  ;;  %5599 = vmatprep.subr.bf16.mxu1 %v6047_v47 }
 0x3a8   : > { %5577 = vmatpush3.bf16.msra.mxu0 %v5576_v60  ;;  %5601 = vmatpush3.bf16.msra.mxu1 %v5576_v60 }
 0x3a9   : > { %5578 = vmatprep.subr.bf16.mxu0 %v6047_v47  ;;  %5602 = vmatprep.subr.bf16.mxu1 %v6047_v47  ;;  %v3794_v47 = vld [vmem:[%s8067_s2] sm:$0x1] }
 0x3ac   : > { %5580 = vmatpush3.bf16.msra.mxu0 %v5579_v0  ;;  %5604 = vmatpush3.bf16.msra.mxu1 %v5579_v0 }
 0x462   : > { %v3558_v4 = vpop.f32.mrb[0].mxu0  ;;  %v3629_v8 = vpop.f32.mrb[0].mxu1 }
 0x463   : > { %v5376_v9 = vpop.f32.mrb[1].mxu0  ;;  %5445 = vmatmul.mubr.f32.vlgmr.msra.gmra.mrb[2].mxu0 %v3558_v4  ;;  %v5411_v11 = vpop.f32.mrb[1].mxu1  ;;  %5480 = vmatmul.mubr.f32.vlgmr.msra.gmra.mrb[2].mxu1 %v3629_v8 }
 0x536   : > { %v3715_v14 = vpop.f32.mrb[2].mxu0  ;;  %v3785_v15 = vpop.f32.mrb[2].mxu1 }
 0x537   : > { %v3789_v17 = vmul.f32 %v3715_v14, %v3715_v14  ;;  %v5446_v18 = vpop.f32.mrb[3].mxu0  ;;  %v5481_v20 = vpop.f32.mrb[3].mxu1 }
 0x539   : > { %v3790_v22 = vsub.f32 %v3785_v15, %v3789_v17 }
 0x53b   : > { %v3791_v23 = vmax.f32 %v3790_v22, 0.0 }
 0x53d   : > { %v3792_v24 = vadd.f32 1e-05, %v3791_v23 }
 0x53f   : > { %6016 = vrsqrt.f32 %v3792_v24 }
 0x549   : > { %v6017_v27 = vpop.eup %6016 }
 0x54a   : > { %v3795_v30 = vmul.f32 %v6017_v27, %v3794_v47  ;;  %v3798_v7 = vmul.f32 %v6017_v27, %v3715_v14 }
 0x54c   : > { %3796 = vst [vmem:[#allocation4] sm:$0x1] %v3795_v30  ;;  %v3800_v33 = vmul.f32 %v3799_v28, %v3798_v7 }
 0x54e   : > { %v3801_v34 = vsub.f32 %v3797_v32, %v3800_v33 }
 0x550   : > { %3802 = vst [vmem:[#allocation5] sm:$0x1] %v3801_v34 }
 0x551 PF: > { %p4311_p7 = scmp.ne.s32.totalorder %s6032_s24, 1 }
 0x553   : > { %3805 = sbr.rel (%p4311_p7) target bundleno = 1390 (0x56e), region = 64  ;;  %v7902_v35 = vld [vmem:[#allocation4] ss:$0 sm:$0xff] (!%p4311_p7) }
 0x554   : > { %v3813_v37 = vmul.f32 (!%p4311_p7), %v7577_v45, %v7902_v35  ;;  %v3814_v38 = vmul.f32 (!%p4311_p7), %v7579_v48, %v7902_v35  ;;  %v3815_v40 = vmul.f32 (!%p4311_p7), %v7581_v51, %v7902_v35  ;;  %v3816_v41 = vmul.f32 (!%p4311_p7), %v7583_v54, %v7902_v35 }
 0x555   : > { %v3817_v42 = vmul.f32 (!%p4311_p7), %v7585_v56, %v7902_v35  ;;  %v3818_v43 = vmul.f32 (!%p4311_p7), %v7587_v59, %v7902_v35  ;;  %v3819_v46 = vmul.f32 (!%p4311_p7), %v7589_v62, %v7902_v35  ;;  %v3820_v45 = vmul.f32 (!%p4311_p7), %v7591_v1, %v7902_v35 }
 0x556   : > { %v3821_v0 = vmul.f32 (!%p4311_p7), %v7593_v5, %v7902_v35  ;;  %v3822_v4 = vmul.f32 (!%p4311_p7), %v7595_v10, %v7902_v35  ;;  %v3823_v8 = vmul.f32 (!%p4311_p7), %v7597_v13, %v7902_v35  ;;  %v3824_v9 = vmul.f32 (!%p4311_p7), %v7599_v16, %v7902_v35 }
 0x557   : > { %v7904_v36 = vld [vmem:[#allocation5] ss:$0 sm:$0xff] (!%p4311_p7)  ;;  %v3825_v5 = vmul.f32 (!%p4311_p7), %v7601_v21, %v7902_v35  ;;  %v3826_v10 = vmul.f32 (!%p4311_p7), %v7603_v26, %v7902_v35  ;;  %v3827_v13 = vmul.f32 (!%p4311_p7), %v7605_v31, %v7902_v35  ;;  %v3828_v16 = vmul.f32 (!%p4311_p7), %v7607_v6, %v7902_v35 }
 0x558   : > { %v3845_v48 = vadd.f32 (!%p4311_p7), %v7904_v36, %v3813_v37  ;;  %v3846_v49 = vadd.f32 (!%p4311_p7), %v7904_v36, %v3814_v38  ;;  %v3847_v51 = vadd.f32 (!%p4311_p7), %v7904_v36, %v3815_v40  ;;  %v3848_v54 = vadd.f32 (!%p4311_p7), %v7904_v36, %v3816_v41 }
 0x559   : > { %v3849_v50 = vadd.f32 (!%p4311_p7), %v7904_v36, %v3817_v42  ;;  %v3850_v56 = vadd.f32 (!%p4311_p7), %v7904_v36, %v3818_v43  ;;  %v3851_v59 = vadd.f32 (!%p4311_p7), %v7904_v36, %v3819_v46  ;;  %v3852_v53 = vadd.f32 (!%p4311_p7), %v7904_v36, %v3820_v45 }
 0x55a   : > { %v3870_v62 = vmax.f32 %v3845_v48, 0.0  ;;  %v3871_v55 = vmax.f32 %v3846_v49, 0.0  ;;  %v3872_v3 = vmax.f32 %v3847_v51, 0.0  ;;  %v3873_v1 = vmax.f32 %v3848_v54, 0.0 }
 0x55b   : > { %v3874_v57 = vmax.f32 %v3849_v50, 0.0  ;;  %v3875_v60 = vmax.f32 %v3850_v56, 0.0  ;;  %v3876_v61 = vmax.f32 %v3851_v59, 0.0  ;;  %v3877_v63 = vmax.f32 %v3852_v53, 0.0 }
 0x55c   : > { %3895 = vst [vmem:[%s8072_s7] sm:$0xff] %v3870_v62  ;;  %3896 = vst [vmem:[%s8072_s7 + $0x8] sm:$0xff] %v3871_v55  ;;  %v3853_v11 = vadd.f32 %v7904_v36, %v3821_v0  ;;  %v3854_v14 = vadd.f32 %v7904_v36, %v3822_v4  ;;  %v3855_v15 = vadd.f32 %v7904_v36, %v3823_v8 }
 0x55d   : > { %3897 = vst [vmem:[%s8072_s7 + $0x10] sm:$0xff] %v3872_v3  ;;  %3898 = vst [vmem:[%s8072_s7 + $0x18] sm:$0xff] %v3873_v1  ;;  %v3856_v17 = vadd.f32 %v7904_v36, %v3824_v9  ;;  %v3857_v18 = vadd.f32 %v7904_v36, %v3825_v5  ;;  %v3858_v21 = vadd.f32 %v7904_v36, %v3826_v10 }
 0x55e   : > { %3899 = vst [vmem:[%s8072_s7 + $0x20] sm:$0xff] %v3874_v57  ;;  %3900 = vst [vmem:[%s8072_s7 + $0x28] sm:$0xff] %v3875_v60  ;;  %v3859_v26 = vadd.f32 %v7904_v36, %v3827_v13  ;;  %v3860_v20 = vadd.f32 %v7904_v36, %v3828_v16  ;;  %v3878_v31 = vmax.f32 %v3853_v11, 0.0  ;;  %v3879_v22 = vmax.f32 %v3854_v14, 0.0 }
 0x55f   : > { %3901 = vst [vmem:[%s8072_s7 + $0x30] sm:$0xff] %v3876_v61  ;;  %3902 = vst [vmem:[%s8072_s7 + $0x38] sm:$0xff] %v3877_v63  ;;  %v3880_v23 = vmax.f32 %v3855_v15, 0.0  ;;  %v3881_v6 = vmax.f32 %v3856_v17, 0.0  ;;  %v3882_v24 = vmax.f32 %v3857_v18, 0.0  ;;  %v3883_v47 = vmax.f32 %v3858_v21, 0.0 }
 0x560   : > { %v3884_v27 = vmax.f32 %v3859_v26, 0.0  ;;  %v3885_v28 = vmax.f32 %v3860_v20, 0.0  ;;  %3903 = vst [vmem:[%s8072_s7 + $0x40] sm:$0xff] %v3878_v31  ;;  %3904 = vst [vmem:[%s8072_s7 + $0x48] sm:$0xff] %v3879_v22  ;;  %v3829_v30 = vmul.f32 %v7609_v39, %v7902_v35  ;;  %v3830_v7 = vmul.f32 %v7611_v44, %v7902_v35 }
 0x561   : > { %3905 = vst [vmem:[%s8072_s7 + $0x50] sm:$0xff] %v3880_v23  ;;  %3906 = vst [vmem:[%s8072_s7 + $0x58] sm:$0xff] %v3881_v6  ;;  %v3831_v32 = vmul.f32 %v7613_v52, %v7902_v35  ;;  %v3832_v33 = vmul.f32 %v7615_v58, %v7902_v35  ;;  %v3833_v39 = vmul.f32 %v7617_v2, %v7902_v35 }
 0x562   : > { %3907 = vst [vmem:[%s8072_s7 + $0x60] sm:$0xff] %v3882_v24  ;;  %3908 = vst [vmem:[%s8072_s7 + $0x68] sm:$0xff] %v3883_v47  ;;  %v3834_v44 = vmul.f32 %v7619_v12, %v7902_v35  ;;  %v3835_v52 = vmul.f32 %v7621_v19, %v7902_v35  ;;  %v3836_v58 = vmul.f32 %v7623_v25, %v7902_v35 }
 0x563   : > { %3909 = vst [vmem:[%s8072_s7 + $0x70] sm:$0xff] %v3884_v27  ;;  %3910 = vst [vmem:[%s8072_s7 + $0x78] sm:$0xff] %v3885_v28  ;;  %v3861_v34 = vadd.f32 %v7904_v36, %v3829_v30  ;;  %v3862_v37 = vadd.f32 %v7904_v36, %v3830_v7  ;;  %v3863_v38 = vadd.f32 %v7904_v36, %v3831_v32 }
 0x564   : > { %v3864_v40 = vadd.f32 %v7904_v36, %v3832_v33  ;;  %v3865_v41 = vadd.f32 %v7904_v36, %v3833_v39  ;;  %v3866_v2 = vadd.f32 %v7904_v36, %v3834_v44  ;;  %v3867_v12 = vadd.f32 %v7904_v36, %v3835_v52 }
 0x565   : > { %v3868_v42 = vadd.f32 %v7904_v36, %v3836_v58  ;;  %v3886_v19 = vmax.f32 %v3861_v34, 0.0  ;;  %v3887_v43 = vmax.f32 %v3862_v37, 0.0  ;;  %v3888_v46 = vmax.f32 %v3863_v38, 0.0 }
 0x566   : > { %v3889_v25 = vmax.f32 %v3864_v40, 0.0  ;;  %v3890_v45 = vmax.f32 %v3865_v41, 0.0  ;;  %v3891_v48 = vmax.f32 %v3866_v2, 0.0  ;;  %v3892_v49 = vmax.f32 %v3867_v12, 0.0 }
 0x567   : > { %v3893_v51 = vmax.f32 %v3868_v42, 0.0  ;;  %3911 = vst [vmem:[%s8072_s7 + $0x80] sm:$0xff] %v3886_v19  ;;  %3912 = vst [vmem:[%s8072_s7 + $0x88] sm:$0xff] %v3887_v43  ;;  %v3837_v54 = vmul.f32 %v7625_v29, %v7902_v35 }
 0x568   : > { %3913 = vst [vmem:[%s8072_s7 + $0x90] sm:$0xff] %v3888_v46  ;;  %3914 = vst [vmem:[%s8072_s7 + $0x98] sm:$0xff] %v3889_v25 }
 0x569   : > { %3915 = vst [vmem:[%s8072_s7 + $0xa0] sm:$0xff] %v3890_v45  ;;  %3916 = vst [vmem:[%s8072_s7 + $0xa8] sm:$0xff] %v3891_v48  ;;  %v3869_v50 = vadd.f32 %v7904_v36, %v3837_v54 }
 0x56a   : > { %3917 = vst [vmem:[%s8072_s7 + $0xb0] sm:$0xff] %v3892_v49  ;;  %3918 = vst [vmem:[%s8072_s7 + $0xb8] sm:$0xff] %v3893_v51 }
 0x56b   : > { %v3894_v56 = vmax.f32 %v3869_v50, 0.0 }
 0x56d   : > { %3919 = vst [vmem:[%s8072_s7 + $0xc0] sm:$0xff] %v3894_v56 }
 0x56e PF: > { %s17_s26 = sadd.s32 1, %s6040_s26   ;;  %s8073_s24 = smov %s6036_s25 }
 0x56f   : > { %p14_p8 = scmp.ge.s32.totalorder %s17_s26, 4   ;;  %s8074_s25 = smov %s8076_s27 }
 0x571   :  { %16 = sbr.rel (!%p14_p8) target bundleno = 2 (0x2), region = 114 }

// kernel: dcgan_g_forward.5
= control target key start
LH: loop header
LB: loop body
LE: loop exit
PB: predicated region body
PF: predicated region fallthrough
CT: control target
= control target key end

     0   :  { %vm142_vm0 = vcmask 64512   ;;  %s5441_s1 = inlined_call_operand.vmem [shape: f32[4,8,128], index: 1, kind: input, shape index: {}]   ;;  %s5442_s0 = inlined_call_operand.vmem [shape: f32[536,8], index: 0, kind: input, shape index: {}]   ;;  %s5443_s2 = inlined_call_operand.vmem [shape: f32[512,128], index: 2, kind: output, shape index: {}]  }
   0x1   :  { %v2843_v0 = vld [vmem:[%s5441_s1 + $0x8] sm:$0xff]  ;;  %v2972_v1 = vld [vmem:[%s5441_s1 + $0x10] sm:$0xff]  ;;  %v75_v5 = vld [vmem:[%s5441_s1] sm:$0xff] }
   0x2   :  { %v76_v2 = vld [vmem:[%s5442_s0 + $0x1] sm:$0xff]  ;;  %3362 = vmatprep.subr.mxu1 %v2843_v0  ;;  %3558 = vmatprep.subr.mxu0 %v2972_v1  ;;  %v4101_v3 = vld [vmem:[%s5442_s0 + $0x10] sm:$0xff]  ;;  %v4113_v6 = vld [vmem:[%s5442_s0 + $0x18] sm:$0xff] }
   0x3   :  { %v77_v4 = vld [vmem:[%s5442_s0 + $0x9] sm:$0xff]  ;;  %3363 = vmatpush3.msra.mxu1 %v2843_v0  ;;  %3364 = vmatprep.mubr.msk.f32.mxu1 %vm142_vm0, %v76_v2  ;;  %v3037_v7 = vld [vmem:[%s5441_s1 + $0x18] sm:$0xff]  ;;  %v4129_v9 = vld [vmem:[%s5442_s0 + $0x20] sm:$0xff] }
   0x4   :  { %3559 = vmatpush3.msra.mxu0 %v2972_v1  ;;  %3560 = vmatprep.mubr.msk.f32.mxu0 %vm142_vm0, %v4101_v3  ;;  %v4124_v8 = vld [vmem:[%s5442_s0 + $0x11] sm:$0xff]  ;;  %v4136_v10 = vld [vmem:[%s5442_s0 + $0x19] sm:$0xff]  ;;  %v4141_v11 = vld [vmem:[%s5442_s0 + $0x28] sm:$0xff] }
   0x5   :  { %3365 = vmatmul.mubr.msk.f32.vlgmr.msra.gmra.mrb[0].mxu1 %vm142_vm0, %v77_v4  ;;  %3460 = vmatprep.subr.mxu1 %v75_v5  ;;  %v4146_v12 = vld [vmem:[%s5442_s0 + $0x21] sm:$0xff]  ;;  %v4155_v13 = vld [vmem:[%s5442_s0 + $0x30] sm:$0xff]  ;;  %v4173_v15 = vld [vmem:[%s5442_s0 + $0x38] sm:$0xff] }
   0x6   :  { %3561 = vmatmul.mubr.msk.f32.vlgmr.msra.gmra.mrb[0].mxu0 %vm142_vm0, %v4113_v6  ;;  %3656 = vmatprep.subr.mxu0 %v3037_v7  ;;  %v4166_v14 = vld [vmem:[%s5442_s0 + $0x29] sm:$0xff]  ;;  %v4178_v16 = vld [vmem:[%s5442_s0 + $0x31] sm:$0xff]  ;;  %v4183_v17 = vld [vmem:[%s5442_s0 + $0x40] sm:$0xff] }
   0x7   :  { %3461 = vmatpush3.msra.mxu1 %v75_v5  ;;  %3657 = vmatpush3.msra.mxu0 %v3037_v7  ;;  %v4194_v18 = vld [vmem:[%s5442_s0 + $0x39] sm:$0xff]  ;;  %v4201_v19 = vld [vmem:[%s5442_s0 + $0x48] sm:$0xff]  ;;  %v4211_v21 = vld [vmem:[%s5442_s0 + $0x50] sm:$0xff] }
   0x8   :  { %3367 = vmatprep.mubr.msk.f32.mxu1 %vm142_vm0, %v4124_v8  ;;  %3563 = vmatprep.mubr.msk.f32.mxu0 %vm142_vm0, %v4129_v9  ;;  %v4206_v20 = vld [vmem:[%s5442_s0 + $0x41] sm:$0xff]  ;;  %v4222_v22 = vld [vmem:[%s5442_s0 + $0x49] sm:$0xff]  ;;  %v4229_v23 = vld [vmem:[%s5442_s0 + $0x58] sm:$0xff] }
   0x9   :  { %3368 = vmatmul.mubr.msk.f32.gmra.mrb[2].mxu1 %vm142_vm0, %v4136_v10  ;;  %v4234_v24 = vld [vmem:[%s5442_s0 + $0x51] sm:$0xff]  ;;  %v4239_v25 = vld [vmem:[%s5442_s0 + $0x60] sm:$0xff]  ;;  %v4257_v27 = vld [vmem:[%s5442_s0 + $0x68] sm:$0xff] }
   0xa   :  { %3564 = vmatmul.mubr.msk.f32.gmra.mrb[2].mxu0 %vm142_vm0, %v4141_v11  ;;  %3370 = vmatprep.mubr.msk.f32.mxu1 %vm142_vm0, %v4146_v12  ;;  %v4250_v26 = vld [vmem:[%s5442_s0 + $0x59] sm:$0xff]  ;;  %v4262_v28 = vld [vmem:[%s5442_s0 + $0x61] sm:$0xff]  ;;  %v4267_v29 = vld [vmem:[%s5442_s0 + $0x70] sm:$0xff] }
   0xb   :  { %3566 = vmatprep.mubr.msk.f32.mxu0 %vm142_vm0, %v4155_v13  ;;  %v4278_v30 = vld [vmem:[%s5442_s0 + $0x69] sm:$0xff]  ;;  %v4285_v31 = vld [vmem:[%s5442_s0 + $0x78] sm:$0xff]  ;;  %v4295_v33 = vld [vmem:[%s5442_s0 + $0x80] sm:$0xff] }
   0xc   :  { %v4290_v32 = vld [vmem:[%s5442_s0 + $0x71] sm:$0xff]  ;;  %v4306_v34 = vld [vmem:[%s5442_s0 + $0x79] sm:$0xff]  ;;  %v4313_v35 = vld [vmem:[%s5442_s0 + $0x88] sm:$0xff] }
   0xd   :  { %3371 = vmatmul.mubr.msk.f32.gmra.mrb[4].mxu1 %vm142_vm0, %v4166_v14  ;;  %v4318_v36 = vld [vmem:[%s5442_s0 + $0x81] sm:$0xff]  ;;  %v4323_v37 = vld [vmem:[%s5442_s0 + $0x90] sm:$0xff]  ;;  %v4341_v39 = vld [vmem:[%s5442_s0 + $0x98] sm:$0xff] }
   0xe   :  { %3567 = vmatmul.mubr.msk.f32.gmra.mrb[4].mxu0 %vm142_vm0, %v4173_v15  ;;  %3373 = vmatprep.mubr.msk.f32.mxu1 %vm142_vm0, %v4178_v16  ;;  %v4334_v38 = vld [vmem:[%s5442_s0 + $0x89] sm:$0xff]  ;;  %v4346_v40 = vld [vmem:[%s5442_s0 + $0x91] sm:$0xff]  ;;  %v4351_v41 = vld [vmem:[%s5442_s0 + $0xa0] sm:$0xff] }
   0xf   :  { %3569 = vmatprep.mubr.msk.f32.mxu0 %vm142_vm0, %v4183_v17  ;;  %v4362_v42 = vld [vmem:[%s5442_s0 + $0x99] sm:$0xff]  ;;  %v4369_v43 = vld [vmem:[%s5442_s0 + $0xa8] sm:$0xff]  ;;  %v4379_v45 = vld [vmem:[%s5442_s0 + $0xb0] sm:$0xff] }
  0x10   :  { %v4374_v44 = vld [vmem:[%s5442_s0 + $0xa1] sm:$0xff]  ;;  %v4390_v46 = vld [vmem:[%s5442_s0 + $0xa9] sm:$0xff]  ;;  %v4397_v47 = vld [vmem:[%s5442_s0 + $0xb8] sm:$0xff] }
  0x11   :  { %3374 = vmatmul.mubr.msk.f32.gmra.mrb[6].mxu1 %vm142_vm0, %v4194_v18  ;;  %v4402_v48 = vld [vmem:[%s5442_s0 + $0xb1] sm:$0xff]  ;;  %v4407_v49 = vld [vmem:[%s5442_s0 + $0xc0] sm:$0xff]  ;;  %v4425_v51 = vld [vmem:[%s5442_s0 + $0xc8] sm:$0xff] }
  0x12   :  { %3570 = vmatmul.mubr.msk.f32.gmra.mrb[6].mxu0 %vm142_vm0, %v4201_v19  ;;  %3376 = vmatprep.mubr.msk.f32.mxu1 %vm142_vm0, %v4206_v20  ;;  %v4418_v50 = vld [vmem:[%s5442_s0 + $0xb9] sm:$0xff]  ;;  %v4430_v52 = vld [vmem:[%s5442_s0 + $0xc1] sm:$0xff]  ;;  %v4435_v53 = vld [vmem:[%s5442_s0 + $0xd0] sm:$0xff] }
  0x13   :  { %3572 = vmatprep.mubr.msk.f32.mxu0 %vm142_vm0, %v4211_v21  ;;  %v4446_v54 = vld [vmem:[%s5442_s0 + $0xc9] sm:$0xff]  ;;  %v4453_v55 = vld [vmem:[%s5442_s0 + $0xd8] sm:$0xff]  ;;  %v4463_v57 = vld [vmem:[%s5442_s0 + $0xe0] sm:$0xff] }
  0x14   :  { %v4458_v56 = vld [vmem:[%s5442_s0 + $0xd1] sm:$0xff]  ;;  %v4474_v58 = vld [vmem:[%s5442_s0 + $0xd9] sm:$0xff]  ;;  %v4481_v59 = vld [vmem:[%s5442_s0 + $0xe8] sm:$0xff] }
  0x15   :  { %3377 = vmatmul.mubr.msk.f32.gmra.mrb[8].mxu1 %vm142_vm0, %v4222_v22  ;;  %v4486_v60 = vld [vmem:[%s5442_s0 + $0xe1] sm:$0xff]  ;;  %v4491_v61 = vld [vmem:[%s5442_s0 + $0xf0] sm:$0xff]  ;;  %v4509_v63 = vld [vmem:[%s5442_s0 + $0xf8] sm:$0xff] }
  0x16   :  { %3573 = vmatmul.mubr.msk.f32.gmra.mrb[8].mxu0 %vm142_vm0, %v4229_v23  ;;  %3379 = vmatprep.mubr.msk.f32.mxu1 %vm142_vm0, %v4234_v24  ;;  %5508 = vst [vmem:[#allocation2_spill] sm:$0xff] %v4491_v61  ;;  %v4502_v62 = vld [vmem:[%s5442_s0 + $0xe9] sm:$0xff]  ;;  %5509 = vst [vmem:[#allocation3_spill] sm:$0xff] %v4509_v63  ;;  %v4514_v0 = vld [vmem:[%s5442_s0 + $0xf1] sm:$0xff] }
  0x17   :  { %3575 = vmatprep.mubr.msk.f32.mxu0 %vm142_vm0, %v4239_v25  ;;  %v4519_v1 = vld [vmem:[%s5442_s0 + $0x100] sm:$0xff]  ;;  %v4537_v4 = vld [vmem:[%s5442_s0 + $0x108] sm:$0xff]  ;;  %v4547_v7 = vld [vmem:[%s5442_s0 + $0x110] sm:$0xff] }
  0x18   :  { %5510 = vst [vmem:[#allocation4_spill] sm:$0xff] %v4519_v1  ;;  %v4530_v2 = vld [vmem:[%s5442_s0 + $0xf9] sm:$0xff]  ;;  %5511 = vst [vmem:[#allocation5_spill] sm:$0xff] %v4537_v4  ;;  %v4542_v5 = vld [vmem:[%s5442_s0 + $0x101] sm:$0xff] }
  0x19   :  { %3380 = vmatmul.mubr.msk.f32.gmra.mrb[10].mxu1 %vm142_vm0, %v4250_v26  ;;  %5512 = vst [vmem:[#allocation6_spill] sm:$0xff] %v4542_v5  ;;  %5513 = vst [vmem:[#allocation7_spill] sm:$0xff] %v4547_v7 }
  0x1a   :  { %3576 = vmatmul.mubr.msk.f32.gmra.mrb[10].mxu0 %vm142_vm0, %v4257_v27  ;;  %3382 = vmatprep.mubr.msk.f32.mxu1 %vm142_vm0, %v4262_v28 }
  0x1b   :  { %3578 = vmatprep.mubr.msk.f32.mxu0 %vm142_vm0, %v4267_v29 }
  0x1d   :  { %3383 = vmatmul.mubr.msk.f32.gmra.mrb[12].mxu1 %vm142_vm0, %v4278_v30 }
  0x1e   :  { %3579 = vmatmul.mubr.msk.f32.gmra.mrb[12].mxu0 %vm142_vm0, %v4285_v31  ;;  %3385 = vmatprep.mubr.msk.f32.mxu1 %vm142_vm0, %v4290_v32 }
  0x1f   :  { %3581 = vmatprep.mubr.msk.f32.mxu0 %vm142_vm0, %v4295_v33 }
  0x21   :  { %3386 = vmatmul.mubr.msk.f32.gmra.mrb[14].mxu1 %vm142_vm0, %v4306_v34 }
  0x22   :  { %3582 = vmatmul.mubr.msk.f32.gmra.mrb[14].mxu0 %vm142_vm0, %v4313_v35  ;;  %3388 = vmatprep.mubr.msk.f32.mxu1 %vm142_vm0, %v4318_v36 }
  0x23   :  { %3584 = vmatprep.mubr.msk.f32.mxu0 %vm142_vm0, %v4323_v37 }
  0x25   :  { %3389 = vmatmul.mubr.msk.f32.gmra.mrb[16].mxu1 %vm142_vm0, %v4334_v38 }
  0x26   :  { %3585 = vmatmul.mubr.msk.f32.gmra.mrb[16].mxu0 %vm142_vm0, %v4341_v39  ;;  %3391 = vmatprep.mubr.msk.f32.mxu1 %vm142_vm0, %v4346_v40 }
  0x27   :  { %3587 = vmatprep.mubr.msk.f32.mxu0 %vm142_vm0, %v4351_v41 }
  0x29   :  { %3392 = vmatmul.mubr.msk.f32.gmra.mrb[18].mxu1 %vm142_vm0, %v4362_v42 }
  0x2a   :  { %3588 = vmatmul.mubr.msk.f32.gmra.mrb[18].mxu0 %vm142_vm0, %v4369_v43  ;;  %3394 = vmatprep.mubr.msk.f32.mxu1 %vm142_vm0, %v4374_v44 }
  0x2b   :  { %3590 = vmatprep.mubr.msk.f32.mxu0 %vm142_vm0, %v4379_v45 }
  0x2d   :  { %3395 = vmatmul.mubr.msk.f32.gmra.mrb[20].mxu1 %vm142_vm0, %v4390_v46 }
  0x2e   :  { %3591 = vmatmul.mubr.msk.f32.gmra.mrb[20].mxu0 %vm142_vm0, %v4397_v47  ;;  %3397 = vmatprep.mubr.msk.f32.mxu1 %vm142_vm0, %v4402_v48 }
  0x2f   :  { %3593 = vmatprep.mubr.msk.f32.mxu0 %vm142_vm0, %v4407_v49 }
  0x31   :  { %3398 = vmatmul.mubr.msk.f32.gmra.mrb[22].mxu1 %vm142_vm0, %v4418_v50 }
  0x32   :  { %3594 = vmatmul.mubr.msk.f32.gmra.mrb[22].mxu0 %vm142_vm0, %v4425_v51  ;;  %3400 = vmatprep.mubr.msk.f32.mxu1 %vm142_vm0, %v4430_v52 }
  0x33   :  { %3596 = vmatprep.mubr.msk.f32.mxu0 %vm142_vm0, %v4435_v53 }
  0x35   :  { %3401 = vmatmul.mubr.msk.f32.gmra.mrb[24].mxu1 %vm142_vm0, %v4446_v54 }
  0x36   :  { %3597 = vmatmul.mubr.msk.f32.gmra.mrb[24].mxu0 %vm142_vm0, %v4453_v55  ;;  %3403 = vmatprep.mubr.msk.f32.mxu1 %vm142_vm0, %v4458_v56 }
  0x37   :  { %3599 = vmatprep.mubr.msk.f32.mxu0 %vm142_vm0, %v4463_v57 }
  0x39   :  { %3404 = vmatmul.mubr.msk.f32.gmra.mrb[26].mxu1 %vm142_vm0, %v4474_v58 }
  0x3a   :  { %3600 = vmatmul.mubr.msk.f32.gmra.mrb[26].mxu0 %vm142_vm0, %v4481_v59  ;;  %3406 = vmatprep.mubr.msk.f32.mxu1 %vm142_vm0, %v4486_v60 }
  0x3b   :  { %3602 = vmatprep.mubr.msk.f32.mxu0 %vm142_vm0, %v4491_v61  ;;  %v4593_v61 = vld [vmem:[%s5442_s0 + $0x128] sm:$0xff] }
  0x3c   :  { %5519 = vst [vmem:[#allocation13_spill] sm:$0xff] %v4593_v61 }
  0x3d   :  { %3407 = vmatmul.mubr.msk.f32.gmra.mrb[28].mxu1 %vm142_vm0, %v4502_v62 }
  0x3e   :  { %3603 = vmatmul.mubr.msk.f32.gmra.mrb[28].mxu0 %vm142_vm0, %v4509_v63  ;;  %3409 = vmatprep.mubr.msk.f32.mxu1 %vm142_vm0, %v4514_v0  ;;  %v4565_v63 = vld [vmem:[%s5442_s0 + $0x118] sm:$0xff] }
  0x3f   :  { %3605 = vmatprep.mubr.msk.f32.mxu0 %vm142_vm0, %v4519_v1  ;;  %v4558_v1 = vld [vmem:[%s5442_s0 + $0x109] sm:$0xff]  ;;  %5515 = vst [vmem:[#allocation9_spill] sm:$0xff] %v4565_v63 }
  0x40   :  { %5514 = vst [vmem:[#allocation8_spill] sm:$0xff] %v4558_v1 }
  0x41   :  { %3410 = vmatmul.mubr.msk.f32.gmra.mrb[30].mxu1 %vm142_vm0, %v4530_v2 }
  0x42   :  { %3606 = vmatmul.mubr.msk.f32.gmra.mrb[30].mxu0 %vm142_vm0, %v4537_v4  ;;  %3412 = vmatprep.mubr.msk.f32.mxu1 %vm142_vm0, %v4542_v5  ;;  %v4570_v4 = vld [vmem:[%s5442_s0 + $0x111] sm:$0xff]  ;;  %v4575_v5 = vld [vmem:[%s5442_s0 + $0x120] sm:$0xff] }
  0x43   :  { %3608 = vmatprep.mubr.msk.f32.mxu0 %vm142_vm0, %v4547_v7  ;;  %5516 = vst [vmem:[#allocation10_spill] sm:$0xff] %v4570_v4  ;;  %5517 = vst [vmem:[#allocation11_spill] sm:$0xff] %v4575_v5  ;;  %v4586_v7 = vld [vmem:[%s5442_s0 + $0x119] sm:$0xff] }
  0x44   :  { %5518 = vst [vmem:[#allocation12_spill] sm:$0xff] %v4586_v7 }
  0x45   :  { %3413 = vmatmul.mubr.msk.f32.gmra.mrb[32].mxu1 %vm142_vm0, %v4558_v1  ;;  %v4621_v1 = vld [vmem:[%s5442_s0 + $0x138] sm:$0xff] }
  0x46   :  { %3609 = vmatmul.mubr.msk.f32.gmra.mrb[32].mxu0 %vm142_vm0, %v4565_v63  ;;  %3415 = vmatprep.mubr.msk.f32.mxu1 %vm142_vm0, %v4570_v4  ;;  %v4598_v63 = vld [vmem:[%s5442_s0 + $0x121] sm:$0xff]  ;;  %v4603_v4 = vld [vmem:[%s5442_s0 + $0x130] sm:$0xff]  ;;  %5523 = vst [vmem:[#allocation17_spill] sm:$0xff] %v4621_v1 }
  0x47   :  { %3611 = vmatprep.mubr.msk.f32.mxu0 %vm142_vm0, %v4575_v5  ;;  %5520 = vst [vmem:[#allocation14_spill] sm:$0xff] %v4598_v63  ;;  %5521 = vst [vmem:[#allocation15_spill] sm:$0xff] %v4603_v4  ;;  %v4614_v5 = vld [vmem:[%s5442_s0 + $0x129] sm:$0xff] }
  0x48   :  { %5522 = vst [vmem:[#allocation16_spill] sm:$0xff] %v4614_v5 }
  0x49   :  { %3416 = vmatmul.mubr.msk.f32.gmra.mrb[34].mxu1 %vm142_vm0, %v4586_v7  ;;  %v4649_v7 = vld [vmem:[%s5442_s0 + $0x148] sm:$0xff] }
  0x4a   :  { %3612 = vmatmul.mubr.msk.f32.gmra.mrb[34].mxu0 %vm142_vm0, %v4593_v61  ;;  %3418 = vmatprep.mubr.msk.f32.mxu1 %vm142_vm0, %v4598_v63  ;;  %v4626_v61 = vld [vmem:[%s5442_s0 + $0x131] sm:$0xff]  ;;  %v4631_v63 = vld [vmem:[%s5442_s0 + $0x140] sm:$0xff]  ;;  %5527 = vst [vmem:[#allocation21_spill] sm:$0xff] %v4649_v7 }
  0x4b   :  { %3614 = vmatprep.mubr.msk.f32.mxu0 %vm142_vm0, %v4603_v4  ;;  %5524 = vst [vmem:[#allocation18_spill] sm:$0xff] %v4626_v61  ;;  %5525 = vst [vmem:[#allocation19_spill] sm:$0xff] %v4631_v63  ;;  %v4642_v4 = vld [vmem:[%s5442_s0 + $0x139] sm:$0xff] }
  0x4c   :  { %5526 = vst [vmem:[#allocation20_spill] sm:$0xff] %v4642_v4 }
  0x4d   :  { %3419 = vmatmul.mubr.msk.f32.gmra.mrb[36].mxu1 %vm142_vm0, %v4614_v5  ;;  %v4677_v5 = vld [vmem:[%s5442_s0 + $0x158] sm:$0xff] }
  0x4e   :  { %3615 = vmatmul.mubr.msk.f32.gmra.mrb[36].mxu0 %vm142_vm0, %v4621_v1  ;;  %3421 = vmatprep.mubr.msk.f32.mxu1 %vm142_vm0, %v4626_v61  ;;  %v4654_v1 = vld [vmem:[%s5442_s0 + $0x141] sm:$0xff]  ;;  %v4659_v61 = vld [vmem:[%s5442_s0 + $0x150] sm:$0xff]  ;;  %5531 = vst [vmem:[#allocation25_spill] sm:$0xff] %v4677_v5 }
  0x4f   :  { %3617 = vmatprep.mubr.msk.f32.mxu0 %vm142_vm0, %v4631_v63  ;;  %5528 = vst [vmem:[#allocation22_spill] sm:$0xff] %v4654_v1  ;;  %5529 = vst [vmem:[#allocation23_spill] sm:$0xff] %v4659_v61  ;;  %v4670_v63 = vld [vmem:[%s5442_s0 + $0x149] sm:$0xff] }
  0x50   :  { %5530 = vst [vmem:[#allocation24_spill] sm:$0xff] %v4670_v63 }
  0x51   :  { %3422 = vmatmul.mubr.msk.f32.gmra.mrb[38].mxu1 %vm142_vm0, %v4642_v4  ;;  %v4705_v4 = vld [vmem:[%s5442_s0 + $0x168] sm:$0xff] }
  0x52   :  { %3618 = vmatmul.mubr.msk.f32.gmra.mrb[38].mxu0 %vm142_vm0, %v4649_v7  ;;  %3424 = vmatprep.mubr.msk.f32.mxu1 %vm142_vm0, %v4654_v1  ;;  %v4682_v7 = vld [vmem:[%s5442_s0 + $0x151] sm:$0xff]  ;;  %v4687_v1 = vld [vmem:[%s5442_s0 + $0x160] sm:$0xff]  ;;  %5535 = vst [vmem:[#allocation29_spill] sm:$0xff] %v4705_v4 }
  0x53   :  { %3620 = vmatprep.mubr.msk.f32.mxu0 %vm142_vm0, %v4659_v61  ;;  %5532 = vst [vmem:[#allocation26_spill] sm:$0xff] %v4682_v7  ;;  %5533 = vst [vmem:[#allocation27_spill] sm:$0xff] %v4687_v1  ;;  %v4698_v61 = vld [vmem:[%s5442_s0 + $0x159] sm:$0xff] }
  0x54   :  { %5534 = vst [vmem:[#allocation28_spill] sm:$0xff] %v4698_v61 }
  0x55   :  { %3425 = vmatmul.mubr.msk.f32.gmra.mrb[40].mxu1 %vm142_vm0, %v4670_v63  ;;  %v4733_v63 = vld [vmem:[%s5442_s0 + $0x178] sm:$0xff] }
  0x56   :  { %3621 = vmatmul.mubr.msk.f32.gmra.mrb[40].mxu0 %vm142_vm0, %v4677_v5  ;;  %3427 = vmatprep.mubr.msk.f32.mxu1 %vm142_vm0, %v4682_v7  ;;  %v4710_v5 = vld [vmem:[%s5442_s0 + $0x161] sm:$0xff]  ;;  %v4715_v7 = vld [vmem:[%s5442_s0 + $0x170] sm:$0xff]  ;;  %5539 = vst [vmem:[#allocation33_spill] sm:$0xff] %v4733_v63 }
  0x57   :  { %3623 = vmatprep.mubr.msk.f32.mxu0 %vm142_vm0, %v4687_v1  ;;  %5536 = vst [vmem:[#allocation30_spill] sm:$0xff] %v4710_v5  ;;  %5537 = vst [vmem:[#allocation31_spill] sm:$0xff] %v4715_v7  ;;  %v4726_v1 = vld [vmem:[%s5442_s0 + $0x169] sm:$0xff] }
  0x58   :  { %5538 = vst [vmem:[#allocation32_spill] sm:$0xff] %v4726_v1 }
  0x59   :  { %3428 = vmatmul.mubr.msk.f32.gmra.mrb[42].mxu1 %vm142_vm0, %v4698_v61  ;;  %v4761_v61 = vld [vmem:[%s5442_s0 + $0x188] sm:$0xff] }
  0x5a   :  { %3624 = vmatmul.mubr.msk.f32.gmra.mrb[42].mxu0 %vm142_vm0, %v4705_v4  ;;  %3430 = vmatprep.mubr.msk.f32.mxu1 %vm142_vm0, %v4710_v5  ;;  %v4738_v4 = vld [vmem:[%s5442_s0 + $0x171] sm:$0xff]  ;;  %v4743_v5 = vld [vmem:[%s5442_s0 + $0x180] sm:$0xff]  ;;  %5543 = vst [vmem:[#allocation37_spill] sm:$0xff] %v4761_v61 }
  0x5b   :  { %3626 = vmatprep.mubr.msk.f32.mxu0 %vm142_vm0, %v4715_v7  ;;  %5540 = vst [vmem:[#allocation34_spill] sm:$0xff] %v4738_v4  ;;  %5541 = vst [vmem:[#allocation35_spill] sm:$0xff] %v4743_v5  ;;  %v4754_v7 = vld [vmem:[%s5442_s0 + $0x179] sm:$0xff] }
  0x5c   :  { %5542 = vst [vmem:[#allocation36_spill] sm:$0xff] %v4754_v7 }
  0x5d   :  { %3431 = vmatmul.mubr.msk.f32.gmra.mrb[44].mxu1 %vm142_vm0, %v4726_v1  ;;  %v4789_v1 = vld [vmem:[%s5442_s0 + $0x198] sm:$0xff] }
  0x5e   :  { %3627 = vmatmul.mubr.msk.f32.gmra.mrb[44].mxu0 %vm142_vm0, %v4733_v63  ;;  %3433 = vmatprep.mubr.msk.f32.mxu1 %vm142_vm0, %v4738_v4  ;;  %v4766_v63 = vld [vmem:[%s5442_s0 + $0x181] sm:$0xff]  ;;  %v4771_v4 = vld [vmem:[%s5442_s0 + $0x190] sm:$0xff]  ;;  %5547 = vst [vmem:[#allocation41_spill] sm:$0xff] %v4789_v1 }
  0x5f   :  { %3629 = vmatprep.mubr.msk.f32.mxu0 %vm142_vm0, %v4743_v5  ;;  %5544 = vst [vmem:[#allocation38_spill] sm:$0xff] %v4766_v63  ;;  %5545 = vst [vmem:[#allocation39_spill] sm:$0xff] %v4771_v4  ;;  %v4782_v5 = vld [vmem:[%s5442_s0 + $0x189] sm:$0xff] }
  0x60   :  { %5546 = vst [vmem:[#allocation40_spill] sm:$0xff] %v4782_v5 }
  0x61   :  { %3434 = vmatmul.mubr.msk.f32.gmra.mrb[46].mxu1 %vm142_vm0, %v4754_v7  ;;  %v4817_v7 = vld [vmem:[%s5442_s0 + $0x1a8] sm:$0xff] }
  0x62   :  { %3630 = vmatmul.mubr.msk.f32.gmra.mrb[46].mxu0 %vm142_vm0, %v4761_v61  ;;  %3436 = vmatprep.mubr.msk.f32.mxu1 %vm142_vm0, %v4766_v63  ;;  %v4794_v61 = vld [vmem:[%s5442_s0 + $0x191] sm:$0xff]  ;;  %v4799_v63 = vld [vmem:[%s5442_s0 + $0x1a0] sm:$0xff]  ;;  %5551 = vst [vmem:[#allocation45_spill] sm:$0xff] %v4817_v7 }
  0x63   :  { %3632 = vmatprep.mubr.msk.f32.mxu0 %vm142_vm0, %v4771_v4  ;;  %5548 = vst [vmem:[#allocation42_spill] sm:$0xff] %v4794_v61  ;;  %5549 = vst [vmem:[#allocation43_spill] sm:$0xff] %v4799_v63  ;;  %v4810_v4 = vld [vmem:[%s5442_s0 + $0x199] sm:$0xff] }
  0x64   :  { %5550 = vst [vmem:[#allocation44_spill] sm:$0xff] %v4810_v4 }
  0x65   :  { %3437 = vmatmul.mubr.msk.f32.gmra.mrb[48].mxu1 %vm142_vm0, %v4782_v5  ;;  %v4845_v5 = vld [vmem:[%s5442_s0 + $0x1b8] sm:$0xff] }
  0x66   :  { %3633 = vmatmul.mubr.msk.f32.gmra.mrb[48].mxu0 %vm142_vm0, %v4789_v1  ;;  %3439 = vmatprep.mubr.msk.f32.mxu1 %vm142_vm0, %v4794_v61  ;;  %v4822_v1 = vld [vmem:[%s5442_s0 + $0x1a1] sm:$0xff]  ;;  %v4827_v61 = vld [vmem:[%s5442_s0 + $0x1b0] sm:$0xff]  ;;  %5555 = vst [vmem:[#allocation49_spill] sm:$0xff] %v4845_v5 }
  0x67   :  { %3635 = vmatprep.mubr.msk.f32.mxu0 %vm142_vm0, %v4799_v63  ;;  %5552 = vst [vmem:[#allocation46_spill] sm:$0xff] %v4822_v1  ;;  %5553 = vst [vmem:[#allocation47_spill] sm:$0xff] %v4827_v61  ;;  %v4838_v63 = vld [vmem:[%s5442_s0 + $0x1a9] sm:$0xff] }
  0x68   :  { %5554 = vst [vmem:[#allocation48_spill] sm:$0xff] %v4838_v63 }
  0x69   :  { %3440 = vmatmul.mubr.msk.f32.gmra.mrb[50].mxu1 %vm142_vm0, %v4810_v4  ;;  %v4873_v4 = vld [vmem:[%s5442_s0 + $0x1c8] sm:$0xff] }
  0x6a   :  { %3636 = vmatmul.mubr.msk.f32.gmra.mrb[50].mxu0 %vm142_vm0, %v4817_v7  ;;  %3442 = vmatprep.mubr.msk.f32.mxu1 %vm142_vm0, %v4822_v1  ;;  %v4850_v7 = vld [vmem:[%s5442_s0 + $0x1b1] sm:$0xff]  ;;  %v4855_v1 = vld [vmem:[%s5442_s0 + $0x1c0] sm:$0xff]  ;;  %5559 = vst [vmem:[#allocation53_spill] sm:$0xff] %v4873_v4 }
  0x6b   :  { %3638 = vmatprep.mubr.msk.f32.mxu0 %vm142_vm0, %v4827_v61  ;;  %5556 = vst [vmem:[#allocation50_spill] sm:$0xff] %v4850_v7  ;;  %5557 = vst [vmem:[#allocation51_spill] sm:$0xff] %v4855_v1  ;;  %v4866_v61 = vld [vmem:[%s5442_s0 + $0x1b9] sm:$0xff] }
  0x6c   :  { %5558 = vst [vmem:[#allocation52_spill] sm:$0xff] %v4866_v61 }
  0x6d   :  { %3443 = vmatmul.mubr.msk.f32.gmra.mrb[52].mxu1 %vm142_vm0, %v4838_v63  ;;  %v4901_v63 = vld [vmem:[%s5442_s0 + $0x1d8] sm:$0xff] }
  0x6e   :  { %3639 = vmatmul.mubr.msk.f32.gmra.mrb[52].mxu0 %vm142_vm0, %v4845_v5  ;;  %3445 = vmatprep.mubr.msk.f32.mxu1 %vm142_vm0, %v4850_v7  ;;  %v4878_v5 = vld [vmem:[%s5442_s0 + $0x1c1] sm:$0xff]  ;;  %v4883_v7 = vld [vmem:[%s5442_s0 + $0x1d0] sm:$0xff]  ;;  %5563 = vst [vmem:[#allocation57_spill] sm:$0xff] %v4901_v63 }
  0x6f   :  { %3641 = vmatprep.mubr.msk.f32.mxu0 %vm142_vm0, %v4855_v1  ;;  %5560 = vst [vmem:[#allocation54_spill] sm:$0xff] %v4878_v5  ;;  %5561 = vst [vmem:[#allocation55_spill] sm:$0xff] %v4883_v7  ;;  %v4894_v1 = vld [vmem:[%s5442_s0 + $0x1c9] sm:$0xff] }
  0x70   :  { %5562 = vst [vmem:[#allocation56_spill] sm:$0xff] %v4894_v1 }
  0x71   :  { %3446 = vmatmul.mubr.msk.f32.gmra.mrb[54].mxu1 %vm142_vm0, %v4866_v61  ;;  %v4929_v61 = vld [vmem:[%s5442_s0 + $0x1e8] sm:$0xff] }
  0x72   :  { %3642 = vmatmul.mubr.msk.f32.gmra.mrb[54].mxu0 %vm142_vm0, %v4873_v4  ;;  %3448 = vmatprep.mubr.msk.f32.mxu1 %vm142_vm0, %v4878_v5  ;;  %v4906_v4 = vld [vmem:[%s5442_s0 + $0x1d1] sm:$0xff]  ;;  %v4911_v5 = vld [vmem:[%s5442_s0 + $0x1e0] sm:$0xff]  ;;  %5567 = vst [vmem:[#allocation61_spill] sm:$0xff] %v4929_v61 }
  0x73   :  { %3644 = vmatprep.mubr.msk.f32.mxu0 %vm142_vm0, %v4883_v7  ;;  %5564 = vst [vmem:[#allocation58_spill] sm:$0xff] %v4906_v4  ;;  %5565 = vst [vmem:[#allocation59_spill] sm:$0xff] %v4911_v5  ;;  %v4922_v7 = vld [vmem:[%s5442_s0 + $0x1d9] sm:$0xff] }
  0x74   :  { %5566 = vst [vmem:[#allocation60_spill] sm:$0xff] %v4922_v7 }
  0x75   :  { %3449 = vmatmul.mubr.msk.f32.gmra.mrb[56].mxu1 %vm142_vm0, %v4894_v1  ;;  %v4957_v1 = vld [vmem:[%s5442_s0 + $0x1f8] sm:$0xff] }
  0x76   :  { %3645 = vmatmul.mubr.msk.f32.gmra.mrb[56].mxu0 %vm142_vm0, %v4901_v63  ;;  %3451 = vmatprep.mubr.msk.f32.mxu1 %vm142_vm0, %v4906_v4  ;;  %v4934_v63 = vld [vmem:[%s5442_s0 + $0x1e1] sm:$0xff]  ;;  %v4939_v4 = vld [vmem:[%s5442_s0 + $0x1f0] sm:$0xff]  ;;  %5571 = vst [vmem:[#allocation65_spill] sm:$0xff] %v4957_v1 }
  0x77   :  { %3647 = vmatprep.mubr.msk.f32.mxu0 %vm142_vm0, %v4911_v5  ;;  %5568 = vst [vmem:[#allocation62_spill] sm:$0xff] %v4934_v63  ;;  %5569 = vst [vmem:[#allocation63_spill] sm:$0xff] %v4939_v4  ;;  %v4950_v5 = vld [vmem:[%s5442_s0 + $0x1e9] sm:$0xff] }
  0x78   :  { %5570 = vst [vmem:[#allocation64_spill] sm:$0xff] %v4950_v5 }
  0x79   :  { %3452 = vmatmul.mubr.msk.f32.gmra.mrb[58].mxu1 %vm142_vm0, %v4922_v7  ;;  %v1360_v7 = vld [vmem:[%s5442_s0 + $0x208] sm:$0xff] }
  0x7a   :  { %3648 = vmatmul.mubr.msk.f32.gmra.mrb[58].mxu0 %vm142_vm0, %v4929_v61  ;;  %3454 = vmatprep.mubr.msk.f32.mxu1 %vm142_vm0, %v4934_v63  ;;  %v4962_v61 = vld [vmem:[%s5442_s0 + $0x1f1] sm:$0xff]  ;;  %v1359_v63 = vld [vmem:[%s5442_s0 + $0x200] sm:$0xff] }
  0x7b   :  { %3650 = vmatprep.mubr.msk.f32.mxu0 %vm142_vm0, %v4939_v4  ;;  %v4976_v4 = vld [vmem:[%s5442_s0 + $0x1f9] sm:$0xff] }
  0x7d   :  { %3455 = vmatmul.mubr.msk.f32.gmra.mrb[60].mxu1 %vm142_vm0, %v4950_v5  ;;  %v11_v5 = vld [vmem:[%s5442_s0] sm:$0xff] }
  0x7e   :  { %3651 = vmatmul.mubr.msk.f32.gmra.mrb[60].mxu0 %vm142_vm0, %v4957_v1  ;;  %3457 = vmatprep.mubr.msk.f32.mxu1 %vm142_vm0, %v4962_v61  ;;  %v12_v1 = vld [vmem:[%s5442_s0 + $0x8] sm:$0xff] }
  0x7f   :  { %3653 = vmatprep.mubr.msk.f32.mxu0 %vm142_vm0, %v1359_v63  ;;  %v5628_v63 = vld [vmem:[#allocation55_spill] sm:$0xff] }
  0x81   :  { %3458 = vmatmul.mubr.msk.f32.gmra.mrb[62].mxu1 %vm142_vm0, %v4976_v4 }
  0x82   :  { %3654 = vmatmul.mubr.msk.f32.gmra.mrb[62].mxu0 %vm142_vm0, %v1360_v7  ;;  %3462 = vmatprep.mubr.msk.f32.mxu1 %vm142_vm0, %v11_v5  ;;  %v5632_v5 = vld [vmem:[#allocation59_spill] sm:$0xff] }
  0x83   :  { %3658 = vmatprep.mubr.msk.f32.mxu0 %vm142_vm0, %v4124_v8  ;;  %v5574_v8 = vld [vmem:[#allocation3_spill] sm:$0xff] }
  0x84   :  { %v2066_v7 = vld [vmem:[%s5442_s0 + $0x201] sm:$0xff] }
  0x85   :  { %3463 = vmatmul.mubr.msk.f32.vlgmr.msra.gmra.mrb[0].mxu1 %vm142_vm0, %v12_v1  ;;  %v5630_v1 = vld [vmem:[#allocation57_spill] sm:$0xff] }
  0x86   :  { %3659 = vmatmul.mubr.msk.f32.vlgmr.msra.gmra.mrb[0].mxu0 %vm142_vm0, %v4136_v10  ;;  %3465 = vmatprep.mubr.msk.f32.mxu1 %vm142_vm0, %v4101_v3  ;;  %v5572_v3 = vld [vmem:[#allocation2_spill] sm:$0xff]  ;;  %v5576_v10 = vld [vmem:[#allocation4_spill] sm:$0xff] }
  0x87   :  { %3661 = vmatprep.mubr.msk.f32.mxu0 %vm142_vm0, %v4146_v12  ;;  %v5578_v12 = vld [vmem:[#allocation5_spill] sm:$0xff] }
  0x89   :  { %3466 = vmatmul.mubr.msk.f32.gmra.mrb[2].mxu1 %vm142_vm0, %v4113_v6  ;;  %v5573_v6 = vld [vmem:[#allocation6_spill] sm:$0xff] }
  0x8a   :  { %3662 = vmatmul.mubr.msk.f32.gmra.mrb[2].mxu0 %vm142_vm0, %v4166_v14  ;;  %3468 = vmatprep.mubr.msk.f32.mxu1 %vm142_vm0, %v4129_v9  ;;  %v5575_v9 = vld [vmem:[#allocation8_spill] sm:$0xff]  ;;  %v5580_v14 = vld [vmem:[#allocation7_spill] sm:$0xff] }
  0x8b   :  { %3664 = vmatprep.mubr.msk.f32.mxu0 %vm142_vm0, %v4178_v16  ;;  %v5582_v16 = vld [vmem:[#allocation9_spill] sm:$0xff] }
  0x8d   :  { %3469 = vmatmul.mubr.msk.f32.gmra.mrb[4].mxu1 %vm142_vm0, %v4141_v11  ;;  %v5577_v11 = vld [vmem:[#allocation10_spill] sm:$0xff] }
  0x8e   :  { %3665 = vmatmul.mubr.msk.f32.gmra.mrb[4].mxu0 %vm142_vm0, %v4194_v18  ;;  %3471 = vmatprep.mubr.msk.f32.mxu1 %vm142_vm0, %v4155_v13  ;;  %v5579_v13 = vld [vmem:[#allocation12_spill] sm:$0xff]  ;;  %v5584_v18 = vld [vmem:[#allocation11_spill] sm:$0xff] }
  0x8f   :  { %3667 = vmatprep.mubr.msk.f32.mxu0 %vm142_vm0, %v4206_v20  ;;  %v5586_v20 = vld [vmem:[#allocation13_spill] sm:$0xff] }
  0x91   :  { %3472 = vmatmul.mubr.msk.f32.gmra.mrb[6].mxu1 %vm142_vm0, %v4173_v15  ;;  %v5581_v15 = vld [vmem:[#allocation14_spill] sm:$0xff] }
  0x92   :  { %3668 = vmatmul.mubr.msk.f32.gmra.mrb[6].mxu0 %vm142_vm0, %v4222_v22  ;;  %3474 = vmatprep.mubr.msk.f32.mxu1 %vm142_vm0, %v4183_v17  ;;  %v5583_v17 = vld [vmem:[#allocation16_spill] sm:$0xff]  ;;  %v5588_v22 = vld [vmem:[#allocation15_spill] sm:$0xff] }
  0x93   :  { %3670 = vmatprep.mubr.msk.f32.mxu0 %vm142_vm0, %v4234_v24  ;;  %v5590_v24 = vld [vmem:[#allocation17_spill] sm:$0xff] }
  0x95   :  { %3475 = vmatmul.mubr.msk.f32.gmra.mrb[8].mxu1 %vm142_vm0, %v4201_v19  ;;  %v5585_v19 = vld [vmem:[#allocation18_spill] sm:$0xff] }
  0x96   :  { %3671 = vmatmul.mubr.msk.f32.gmra.mrb[8].mxu0 %vm142_vm0, %v4250_v26  ;;  %3477 = vmatprep.mubr.msk.f32.mxu1 %vm142_vm0, %v4211_v21  ;;  %v5587_v21 = vld [vmem:[#allocation20_spill] sm:$0xff]  ;;  %v5592_v26 = vld [vmem:[#allocation19_spill] sm:$0xff] }
  0x97   :  { %3673 = vmatprep.mubr.msk.f32.mxu0 %vm142_vm0, %v4262_v28  ;;  %v5594_v28 = vld [vmem:[#allocation21_spill] sm:$0xff] }
  0x99   :  { %3478 = vmatmul.mubr.msk.f32.gmra.mrb[10].mxu1 %vm142_vm0, %v4229_v23  ;;  %v5589_v23 = vld [vmem:[#allocation22_spill] sm:$0xff] }
  0x9a   :  { %3674 = vmatmul.mubr.msk.f32.gmra.mrb[10].mxu0 %vm142_vm0, %v4278_v30  ;;  %3480 = vmatprep.mubr.msk.f32.mxu1 %vm142_vm0, %v4239_v25  ;;  %v5591_v25 = vld [vmem:[#allocation24_spill] sm:$0xff]  ;;  %v5596_v30 = vld [vmem:[#allocation23_spill] sm:$0xff] }
  0x9b   :  { %3676 = vmatprep.mubr.msk.f32.mxu0 %vm142_vm0, %v4290_v32  ;;  %v5598_v32 = vld [vmem:[#allocation25_spill] sm:$0xff] }
  0x9d   :  { %3481 = vmatmul.mubr.msk.f32.gmra.mrb[12].mxu1 %vm142_vm0, %v4257_v27  ;;  %v5593_v27 = vld [vmem:[#allocation26_spill] sm:$0xff] }
  0x9e   :  { %3677 = vmatmul.mubr.msk.f32.gmra.mrb[12].mxu0 %vm142_vm0, %v4306_v34  ;;  %3483 = vmatprep.mubr.msk.f32.mxu1 %vm142_vm0, %v4267_v29  ;;  %v5595_v29 = vld [vmem:[#allocation28_spill] sm:$0xff]  ;;  %v5600_v34 = vld [vmem:[#allocation27_spill] sm:$0xff] }
  0x9f   :  { %3679 = vmatprep.mubr.msk.f32.mxu0 %vm142_vm0, %v4318_v36  ;;  %v5602_v36 = vld [vmem:[#allocation29_spill] sm:$0xff] }
  0xa1   :  { %3484 = vmatmul.mubr.msk.f32.gmra.mrb[14].mxu1 %vm142_vm0, %v4285_v31  ;;  %v5597_v31 = vld [vmem:[#allocation30_spill] sm:$0xff] }
  0xa2   :  { %3680 = vmatmul.mubr.msk.f32.gmra.mrb[14].mxu0 %vm142_vm0, %v4334_v38  ;;  %3486 = vmatprep.mubr.msk.f32.mxu1 %vm142_vm0, %v4295_v33  ;;  %v5599_v33 = vld [vmem:[#allocation32_spill] sm:$0xff]  ;;  %v5604_v38 = vld [vmem:[#allocation31_spill] sm:$0xff] }
  0xa3   :  { %3682 = vmatprep.mubr.msk.f32.mxu0 %vm142_vm0, %v4346_v40  ;;  %v5606_v40 = vld [vmem:[#allocation33_spill] sm:$0xff] }
  0xa5   :  { %3487 = vmatmul.mubr.msk.f32.gmra.mrb[16].mxu1 %vm142_vm0, %v4313_v35  ;;  %v5601_v35 = vld [vmem:[#allocation34_spill] sm:$0xff] }
  0xa6   :  { %3683 = vmatmul.mubr.msk.f32.gmra.mrb[16].mxu0 %vm142_vm0, %v4362_v42  ;;  %3489 = vmatprep.mubr.msk.f32.mxu1 %vm142_vm0, %v4323_v37  ;;  %v5603_v37 = vld [vmem:[#allocation36_spill] sm:$0xff]  ;;  %v5608_v42 = vld [vmem:[#allocation35_spill] sm:$0xff] }
  0xa7   :  { %3685 = vmatprep.mubr.msk.f32.mxu0 %vm142_vm0, %v4374_v44  ;;  %v5610_v44 = vld [vmem:[#allocation37_spill] sm:$0xff] }
  0xa9   :  { %3490 = vmatmul.mubr.msk.f32.gmra.mrb[18].mxu1 %vm142_vm0, %v4341_v39  ;;  %v5605_v39 = vld [vmem:[#allocation38_spill] sm:$0xff] }
  0xaa   :  { %3686 = vmatmul.mubr.msk.f32.gmra.mrb[18].mxu0 %vm142_vm0, %v4390_v46  ;;  %3492 = vmatprep.mubr.msk.f32.mxu1 %vm142_vm0, %v4351_v41  ;;  %v5607_v41 = vld [vmem:[#allocation40_spill] sm:$0xff]  ;;  %v5612_v46 = vld [vmem:[#allocation39_spill] sm:$0xff] }
  0xab   :  { %3688 = vmatprep.mubr.msk.f32.mxu0 %vm142_vm0, %v4402_v48  ;;  %v5614_v48 = vld [vmem:[#allocation41_spill] sm:$0xff] }
  0xad   :  { %3493 = vmatmul.mubr.msk.f32.gmra.mrb[20].mxu1 %vm142_vm0, %v4369_v43  ;;  %v5609_v43 = vld [vmem:[#allocation42_spill] sm:$0xff] }
  0xae   :  { %3689 = vmatmul.mubr.msk.f32.gmra.mrb[20].mxu0 %vm142_vm0, %v4418_v50  ;;  %3495 = vmatprep.mubr.msk.f32.mxu1 %vm142_vm0, %v4379_v45  ;;  %v5611_v45 = vld [vmem:[#allocation44_spill] sm:$0xff]  ;;  %v5616_v50 = vld [vmem:[#allocation43_spill] sm:$0xff] }
  0xaf   :  { %3691 = vmatprep.mubr.msk.f32.mxu0 %vm142_vm0, %v4430_v52  ;;  %v5618_v52 = vld [vmem:[#allocation45_spill] sm:$0xff] }
  0xb1   :  { %3496 = vmatmul.mubr.msk.f32.gmra.mrb[22].mxu1 %vm142_vm0, %v4397_v47  ;;  %v5613_v47 = vld [vmem:[#allocation46_spill] sm:$0xff] }
  0xb2   :  { %3692 = vmatmul.mubr.msk.f32.gmra.mrb[22].mxu0 %vm142_vm0, %v4446_v54  ;;  %3498 = vmatprep.mubr.msk.f32.mxu1 %vm142_vm0, %v4407_v49  ;;  %v5615_v49 = vld [vmem:[#allocation48_spill] sm:$0xff]  ;;  %v5620_v54 = vld [vmem:[#allocation47_spill] sm:$0xff] }
  0xb3   :  { %3694 = vmatprep.mubr.msk.f32.mxu0 %vm142_vm0, %v4458_v56  ;;  %v5622_v56 = vld [vmem:[#allocation49_spill] sm:$0xff] }
  0xb5   :  { %3499 = vmatmul.mubr.msk.f32.gmra.mrb[24].mxu1 %vm142_vm0, %v4425_v51  ;;  %v5617_v51 = vld [vmem:[#allocation50_spill] sm:$0xff] }
  0xb6   :  { %3695 = vmatmul.mubr.msk.f32.gmra.mrb[24].mxu0 %vm142_vm0, %v4474_v58  ;;  %3501 = vmatprep.mubr.msk.f32.mxu1 %vm142_vm0, %v4435_v53  ;;  %v5619_v53 = vld [vmem:[#allocation52_spill] sm:$0xff]  ;;  %v5624_v58 = vld [vmem:[#allocation51_spill] sm:$0xff] }
  0xb7   :  { %3697 = vmatprep.mubr.msk.f32.mxu0 %vm142_vm0, %v4486_v60  ;;  %v5626_v60 = vld [vmem:[#allocation53_spill] sm:$0xff] }
  0xb9   :  { %3502 = vmatmul.mubr.msk.f32.gmra.mrb[26].mxu1 %vm142_vm0, %v4453_v55  ;;  %v5621_v55 = vld [vmem:[#allocation54_spill] sm:$0xff] }
  0xba   :  { %3698 = vmatmul.mubr.msk.f32.gmra.mrb[26].mxu0 %vm142_vm0, %v4502_v62  ;;  %3504 = vmatprep.mubr.msk.f32.mxu1 %vm142_vm0, %v4463_v57  ;;  %v5623_v57 = vld [vmem:[#allocation56_spill] sm:$0xff] }
  0xbb   :  { %3700 = vmatprep.mubr.msk.f32.mxu0 %vm142_vm0, %v4514_v0  ;;  %v5627_v62 = vld [vmem:[#allocation60_spill] sm:$0xff]  ;;  %v5629_v0 = vld [vmem:[#allocation62_spill] sm:$0xff] }
  0xbd   :  { %3505 = vmatmul.mubr.msk.f32.gmra.mrb[28].mxu1 %vm142_vm0, %v4481_v59  ;;  %v5625_v59 = vld [vmem:[#allocation58_spill] sm:$0xff] }
  0xbe   :  { %3701 = vmatmul.mubr.msk.f32.gmra.mrb[28].mxu0 %vm142_vm0, %v4530_v2  ;;  %3507 = vmatprep.mubr.msk.f32.mxu1 %vm142_vm0, %v5572_v3  ;;  %v5631_v2 = vld [vmem:[#allocation64_spill] sm:$0xff]  ;;  %v5633_v3 = vld [vmem:[#allocation61_spill] sm:$0xff] }
  0xbf   :  { %3703 = vmatprep.mubr.msk.f32.mxu0 %vm142_vm0, %v5573_v6  ;;  %v5634_v6 = vld [vmem:[#allocation63_spill] sm:$0xff] }
  0xc1   :  { %3508 = vmatmul.mubr.msk.f32.gmra.mrb[30].mxu1 %vm142_vm0, %v5574_v8  ;;  %v2067_v8 = vld [vmem:[%s5442_s0 + $0x209] sm:$0xff] }
  0xc2   :  { %3704 = vmatmul.mubr.msk.f32.gmra.mrb[30].mxu0 %vm142_vm0, %v5575_v9  ;;  %3510 = vmatprep.mubr.msk.f32.mxu1 %vm142_vm0, %v5576_v10 }
  0xc3   :  { %3706 = vmatprep.mubr.msk.f32.mxu0 %vm142_vm0, %v5577_v11 }
  0xc5   :  { %3511 = vmatmul.mubr.msk.f32.gmra.mrb[32].mxu1 %vm142_vm0, %v5578_v12 }
  0xc6   :  { %3707 = vmatmul.mubr.msk.f32.gmra.mrb[32].mxu0 %vm142_vm0, %v5579_v13  ;;  %3513 = vmatprep.mubr.msk.f32.mxu1 %vm142_vm0, %v5580_v14 }
  0xc7   :  { %3709 = vmatprep.mubr.msk.f32.mxu0 %vm142_vm0, %v5581_v15 }
  0xc9   :  { %3514 = vmatmul.mubr.msk.f32.gmra.mrb[34].mxu1 %vm142_vm0, %v5582_v16 }
  0xca   :  { %3710 = vmatmul.mubr.msk.f32.gmra.mrb[34].mxu0 %vm142_vm0, %v5583_v17  ;;  %3516 = vmatprep.mubr.msk.f32.mxu1 %vm142_vm0, %v5584_v18 }
  0xcb   :  { %3712 = vmatprep.mubr.msk.f32.mxu0 %vm142_vm0, %v5585_v19 }
  0xcd   :  { %3517 = vmatmul.mubr.msk.f32.gmra.mrb[36].mxu1 %vm142_vm0, %v5586_v20 }
  0xce   :  { %3713 = vmatmul.mubr.msk.f32.gmra.mrb[36].mxu0 %vm142_vm0, %v5587_v21  ;;  %3519 = vmatprep.mubr.msk.f32.mxu1 %vm142_vm0, %v5588_v22 }
  0xcf   :  { %3715 = vmatprep.mubr.msk.f32.mxu0 %vm142_vm0, %v5589_v23 }
  0xd1   :  { %3520 = vmatmul.mubr.msk.f32.gmra.mrb[38].mxu1 %vm142_vm0, %v5590_v24 }
  0xd2   :  { %3716 = vmatmul.mubr.msk.f32.gmra.mrb[38].mxu0 %vm142_vm0, %v5591_v25  ;;  %3522 = vmatprep.mubr.msk.f32.mxu1 %vm142_vm0, %v5592_v26 }
  0xd3   :  { %3718 = vmatprep.mubr.msk.f32.mxu0 %vm142_vm0, %v5593_v27 }
  0xd5   :  { %3523 = vmatmul.mubr.msk.f32.gmra.mrb[40].mxu1 %vm142_vm0, %v5594_v28 }
  0xd6   :  { %3719 = vmatmul.mubr.msk.f32.gmra.mrb[40].mxu0 %vm142_vm0, %v5595_v29  ;;  %3525 = vmatprep.mubr.msk.f32.mxu1 %vm142_vm0, %v5596_v30 }
  0xd7   :  { %3721 = vmatprep.mubr.msk.f32.mxu0 %vm142_vm0, %v5597_v31 }
  0xd9   :  { %3526 = vmatmul.mubr.msk.f32.gmra.mrb[42].mxu1 %vm142_vm0, %v5598_v32 }
  0xda   :  { %3722 = vmatmul.mubr.msk.f32.gmra.mrb[42].mxu0 %vm142_vm0, %v5599_v33  ;;  %3528 = vmatprep.mubr.msk.f32.mxu1 %vm142_vm0, %v5600_v34 }
  0xdb   :  { %3724 = vmatprep.mubr.msk.f32.mxu0 %vm142_vm0, %v5601_v35 }
  0xdd   :  { %3529 = vmatmul.mubr.msk.f32.gmra.mrb[44].mxu1 %vm142_vm0, %v5602_v36 }
  0xde   :  { %3725 = vmatmul.mubr.msk.f32.gmra.mrb[44].mxu0 %vm142_vm0, %v5603_v37  ;;  %3531 = vmatprep.mubr.msk.f32.mxu1 %vm142_vm0, %v5604_v38 }
  0xdf   :  { %3727 = vmatprep.mubr.msk.f32.mxu0 %vm142_vm0, %v5605_v39 }
  0xe1   :  { %3532 = vmatmul.mubr.msk.f32.gmra.mrb[46].mxu1 %vm142_vm0, %v5606_v40 }
  0xe2   :  { %3728 = vmatmul.mubr.msk.f32.gmra.mrb[46].mxu0 %vm142_vm0, %v5607_v41  ;;  %3534 = vmatprep.mubr.msk.f32.mxu1 %vm142_vm0, %v5608_v42 }
  0xe3   :  { %3730 = vmatprep.mubr.msk.f32.mxu0 %vm142_vm0, %v5609_v43 }
  0xe5   :  { %3535 = vmatmul.mubr.msk.f32.gmra.mrb[48].mxu1 %vm142_vm0, %v5610_v44 }
  0xe6   :  { %3731 = vmatmul.mubr.msk.f32.gmra.mrb[48].mxu0 %vm142_vm0, %v5611_v45  ;;  %3537 = vmatprep.mubr.msk.f32.mxu1 %vm142_vm0, %v5612_v46 }
  0xe7   :  { %3733 = vmatprep.mubr.msk.f32.mxu0 %vm142_vm0, %v5613_v47 }
  0xe9   :  { %3538 = vmatmul.mubr.msk.f32.gmra.mrb[50].mxu1 %vm142_vm0, %v5614_v48 }
  0xea   :  { %3734 = vmatmul.mubr.msk.f32.gmra.mrb[50].mxu0 %vm142_vm0, %v5615_v49  ;;  %3540 = vmatprep.mubr.msk.f32.mxu1 %vm142_vm0, %v5616_v50 }
  0xeb   :  { %3736 = vmatprep.mubr.msk.f32.mxu0 %vm142_vm0, %v5617_v51 }
  0xed   :  { %3541 = vmatmul.mubr.msk.f32.gmra.mrb[52].mxu1 %vm142_vm0, %v5618_v52 }
  0xee   :  { %3737 = vmatmul.mubr.msk.f32.gmra.mrb[52].mxu0 %vm142_vm0, %v5619_v53  ;;  %3543 = vmatprep.mubr.msk.f32.mxu1 %vm142_vm0, %v5620_v54 }
  0xef   :  { %3739 = vmatprep.mubr.msk.f32.mxu0 %vm142_vm0, %v5621_v55 }
  0xf1   :  { %3544 = vmatmul.mubr.msk.f32.gmra.mrb[54].mxu1 %vm142_vm0, %v5622_v56 }
  0xf2   :  { %3740 = vmatmul.mubr.msk.f32.gmra.mrb[54].mxu0 %vm142_vm0, %v5623_v57  ;;  %3546 = vmatprep.mubr.msk.f32.mxu1 %vm142_vm0, %v5624_v58 }
  0xf3   :  { %3742 = vmatprep.mubr.msk.f32.mxu0 %vm142_vm0, %v5625_v59 }
  0xf5   :  { %3547 = vmatmul.mubr.msk.f32.gmra.mrb[56].mxu1 %vm142_vm0, %v5626_v60 }
  0xf6   :  { %3743 = vmatmul.mubr.msk.f32.gmra.mrb[56].mxu0 %vm142_vm0, %v5627_v62  ;;  %3549 = vmatprep.mubr.msk.f32.mxu1 %vm142_vm0, %v5628_v63 }
  0xf7   :  { %3745 = vmatprep.mubr.msk.f32.mxu0 %vm142_vm0, %v5629_v0 }
  0xf9   :  { %3550 = vmatmul.mubr.msk.f32.gmra.mrb[58].mxu1 %vm142_vm0, %v5630_v1 }
  0xfa   :  { %3746 = vmatmul.mubr.msk.f32.gmra.mrb[58].mxu0 %vm142_vm0, %v5631_v2  ;;  %3552 = vmatprep.mubr.msk.f32.mxu1 %vm142_vm0, %v5632_v5 }
  0xfb   :  { %3748 = vmatprep.mubr.msk.f32.mxu0 %vm142_vm0, %v4962_v61  ;;  %v5635_v61 = vld [vmem:[#allocation65_spill] sm:$0xff] }
  0xfd   :  { %3553 = vmatmul.mubr.msk.f32.gmra.mrb[60].mxu1 %vm142_vm0, %v5633_v3 }
  0xfe   :  { %3749 = vmatmul.mubr.msk.f32.gmra.mrb[60].mxu0 %vm142_vm0, %v4976_v4  ;;  %3555 = vmatprep.mubr.msk.f32.mxu1 %vm142_vm0, %v5634_v6 }
  0xff   :  { %3751 = vmatprep.mubr.msk.f32.mxu0 %vm142_vm0, %v2066_v7 }
 0x101   :  { %3556 = vmatmul.mubr.msk.f32.gmra.mrb[62].mxu1 %vm142_vm0, %v5635_v61 }
 0x102   :  { %3752 = vmatmul.mubr.msk.f32.gmra.mrb[62].mxu0 %vm142_vm0, %v2067_v8 }
 0x158   :  { %v3464_v9 = vpop.f32.mrb[0].mxu1 }
 0x159   :  { %v3660_v10 = vpop.f32.mrb[0].mxu0  ;;  %v978_v11 = vpop.f32.mrb[1].mxu1 }
 0x15a   :  { %v3754_v12 = vadd.f32 %v3660_v10, %v3464_v9  ;;  %v2328_v13 = vpop.f32.mrb[1].mxu0 }
 0x15b   :  { %v3755_v4 = vadd.f32 %v2328_v13, %v978_v11 }
 0x15c   :  { %3946 = vtanh.f32 %v3754_v12  ;;  %v3467_v14 = vpop.f32.mrb[2].mxu1 }
 0x15d   :  { %3948 = vtanh.f32 %v3755_v4  ;;  %v3663_v15 = vpop.f32.mrb[2].mxu0  ;;  %v988_v16 = vpop.f32.mrb[3].mxu1 }
 0x15e   :  { %v3756_v17 = vadd.f32 %v3663_v15, %v3467_v14  ;;  %v2338_v18 = vpop.f32.mrb[3].mxu0 }
 0x15f   :  { %v3757_v19 = vadd.f32 %v2338_v18, %v988_v16 }
 0x160   :  { %3950 = vtanh.f32 %v3756_v17  ;;  %v3470_v20 = vpop.f32.mrb[4].mxu1 }
 0x161   :  { %3952 = vtanh.f32 %v3757_v19  ;;  %v3666_v21 = vpop.f32.mrb[4].mxu0  ;;  %v998_v22 = vpop.f32.mrb[5].mxu1 }
 0x162   :  { %v3758_v23 = vadd.f32 %v3666_v21, %v3470_v20  ;;  %v2348_v24 = vpop.f32.mrb[5].mxu0 }
 0x163   :  { %v3759_v25 = vadd.f32 %v2348_v24, %v998_v22 }
 0x164   :  { %3954 = vtanh.f32 %v3758_v23  ;;  %v3473_v26 = vpop.f32.mrb[6].mxu1 }
 0x165   :  { %3956 = vtanh.f32 %v3759_v25  ;;  %v3669_v27 = vpop.f32.mrb[6].mxu0  ;;  %v1008_v28 = vpop.f32.mrb[7].mxu1 }
 0x166   :  { %v3947_v29 = vpop.eup %3946  ;;  %v3760_v30 = vadd.f32 %v3669_v27, %v3473_v26  ;;  %v2358_v31 = vpop.f32.mrb[7].mxu0 }
 0x167   :  { %v3949_v32 = vpop.eup %3948  ;;  %2776 = vst [vmem:[%s5443_s2 + $0x8] sm:$0xff] %v3947_v29  ;;  %v3761_v33 = vadd.f32 %v2358_v31, %v1008_v28 }
 0x168   :  { %2775 = vst [vmem:[%s5443_s2] sm:$0xff] %v3949_v32  ;;  %3958 = vtanh.f32 %v3760_v30  ;;  %v3476_v34 = vpop.f32.mrb[8].mxu1 }
 0x169   :  { %3960 = vtanh.f32 %v3761_v33  ;;  %v3672_v35 = vpop.f32.mrb[8].mxu0  ;;  %v1018_v36 = vpop.f32.mrb[9].mxu1 }
 0x16a   :  { %v3951_v37 = vpop.eup %3950  ;;  %v3762_v38 = vadd.f32 %v3672_v35, %v3476_v34  ;;  %v2368_v39 = vpop.f32.mrb[9].mxu0 }
 0x16b   :  { %v3953_v40 = vpop.eup %3952  ;;  %2778 = vst [vmem:[%s5443_s2 + $0x18] sm:$0xff] %v3951_v37  ;;  %v3763_v41 = vadd.f32 %v2368_v39, %v1018_v36 }
 0x16c   :  { %2777 = vst [vmem:[%s5443_s2 + $0x10] sm:$0xff] %v3953_v40  ;;  %3962 = vtanh.f32 %v3762_v38  ;;  %v3479_v42 = vpop.f32.mrb[10].mxu1 }
 0x16d   :  { %3964 = vtanh.f32 %v3763_v41  ;;  %v3675_v43 = vpop.f32.mrb[10].mxu0  ;;  %v1028_v44 = vpop.f32.mrb[11].mxu1 }
 0x16e   :  { %v3955_v45 = vpop.eup %3954  ;;  %v3764_v46 = vadd.f32 %v3675_v43, %v3479_v42  ;;  %v2378_v47 = vpop.f32.mrb[11].mxu0 }
 0x16f   :  { %v3957_v48 = vpop.eup %3956  ;;  %2780 = vst [vmem:[%s5443_s2 + $0x28] sm:$0xff] %v3955_v45  ;;  %v3765_v49 = vadd.f32 %v2378_v47, %v1028_v44 }
 0x170   :  { %2779 = vst [vmem:[%s5443_s2 + $0x20] sm:$0xff] %v3957_v48  ;;  %3966 = vtanh.f32 %v3764_v46  ;;  %v3482_v50 = vpop.f32.mrb[12].mxu1 }
 0x171   :  { %3968 = vtanh.f32 %v3765_v49  ;;  %v3678_v51 = vpop.f32.mrb[12].mxu0  ;;  %v1038_v52 = vpop.f32.mrb[13].mxu1 }
 0x172   :  { %v3959_v53 = vpop.eup %3958  ;;  %v3766_v54 = vadd.f32 %v3678_v51, %v3482_v50  ;;  %v2388_v55 = vpop.f32.mrb[13].mxu0 }
 0x173   :  { %v3961_v56 = vpop.eup %3960  ;;  %2782 = vst [vmem:[%s5443_s2 + $0x38] sm:$0xff] %v3959_v53  ;;  %v3767_v57 = vadd.f32 %v2388_v55, %v1038_v52 }
 0x174   :  { %2781 = vst [vmem:[%s5443_s2 + $0x30] sm:$0xff] %v3961_v56  ;;  %3970 = vtanh.f32 %v3766_v54  ;;  %v3485_v58 = vpop.f32.mrb[14].mxu1 }
 0x175   :  { %3972 = vtanh.f32 %v3767_v57  ;;  %v3681_v59 = vpop.f32.mrb[14].mxu0  ;;  %v1048_v60 = vpop.f32.mrb[15].mxu1 }
 0x176   :  { %v3963_v62 = vpop.eup %3962  ;;  %v3768_v63 = vadd.f32 %v3681_v59, %v3485_v58  ;;  %v2398_v0 = vpop.f32.mrb[15].mxu0 }
 0x177   :  { %v3965_v1 = vpop.eup %3964  ;;  %2784 = vst [vmem:[%s5443_s2 + $0x48] sm:$0xff] %v3963_v62  ;;  %v3769_v2 = vadd.f32 %v2398_v0, %v1048_v60 }
 0x178   :  { %2783 = vst [vmem:[%s5443_s2 + $0x40] sm:$0xff] %v3965_v1  ;;  %3974 = vtanh.f32 %v3768_v63  ;;  %v3488_v5 = vpop.f32.mrb[16].mxu1 }
 0x179   :  { %3976 = vtanh.f32 %v3769_v2  ;;  %v3684_v7 = vpop.f32.mrb[16].mxu0  ;;  %v1058_v3 = vpop.f32.mrb[17].mxu1 }
 0x17a   :  { %v3967_v6 = vpop.eup %3966  ;;  %v3770_v8 = vadd.f32 %v3684_v7, %v3488_v5  ;;  %v2408_v61 = vpop.f32.mrb[17].mxu0 }
 0x17b   :  { %v3969_v9 = vpop.eup %3968  ;;  %2786 = vst [vmem:[%s5443_s2 + $0x58] sm:$0xff] %v3967_v6  ;;  %v3771_v10 = vadd.f32 %v2408_v61, %v1058_v3 }
 0x17c   :  { %2785 = vst [vmem:[%s5443_s2 + $0x50] sm:$0xff] %v3969_v9  ;;  %3978 = vtanh.f32 %v3770_v8  ;;  %v3491_v11 = vpop.f32.mrb[18].mxu1 }
 0x17d   :  { %3980 = vtanh.f32 %v3771_v10  ;;  %v3687_v12 = vpop.f32.mrb[18].mxu0  ;;  %v1068_v13 = vpop.f32.mrb[19].mxu1 }
 0x17e   :  { %v3971_v4 = vpop.eup %3970  ;;  %v3772_v14 = vadd.f32 %v3687_v12, %v3491_v11  ;;  %v2418_v15 = vpop.f32.mrb[19].mxu0 }
 0x17f   :  { %v3973_v16 = vpop.eup %3972  ;;  %2788 = vst [vmem:[%s5443_s2 + $0x68] sm:$0xff] %v3971_v4  ;;  %v3773_v17 = vadd.f32 %v2418_v15, %v1068_v13 }
 0x180   :  { %2787 = vst [vmem:[%s5443_s2 + $0x60] sm:$0xff] %v3973_v16  ;;  %3982 = vtanh.f32 %v3772_v14  ;;  %v3494_v18 = vpop.f32.mrb[20].mxu1 }
 0x181   :  { %3984 = vtanh.f32 %v3773_v17  ;;  %v3690_v19 = vpop.f32.mrb[20].mxu0  ;;  %v1078_v20 = vpop.f32.mrb[21].mxu1 }
 0x182   :  { %v3975_v21 = vpop.eup %3974  ;;  %v3774_v22 = vadd.f32 %v3690_v19, %v3494_v18  ;;  %v2428_v23 = vpop.f32.mrb[21].mxu0 }
 0x183   :  { %v3977_v24 = vpop.eup %3976  ;;  %2790 = vst [vmem:[%s5443_s2 + $0x78] sm:$0xff] %v3975_v21  ;;  %v3775_v25 = vadd.f32 %v2428_v23, %v1078_v20 }
 0x184   :  { %2789 = vst [vmem:[%s5443_s2 + $0x70] sm:$0xff] %v3977_v24  ;;  %3986 = vtanh.f32 %v3774_v22  ;;  %v3497_v26 = vpop.f32.mrb[22].mxu1 }
 0x185   :  { %3988 = vtanh.f32 %v3775_v25  ;;  %v3693_v27 = vpop.f32.mrb[22].mxu0  ;;  %v1088_v28 = vpop.f32.mrb[23].mxu1 }
 0x186   :  { %v3979_v29 = vpop.eup %3978  ;;  %v3776_v30 = vadd.f32 %v3693_v27, %v3497_v26  ;;  %v2438_v31 = vpop.f32.mrb[23].mxu0 }
 0x187   :  { %v3981_v32 = vpop.eup %3980  ;;  %2792 = vst [vmem:[%s5443_s2 + $0x88] sm:$0xff] %v3979_v29  ;;  %v3777_v33 = vadd.f32 %v2438_v31, %v1088_v28 }
 0x188   :  { %2791 = vst [vmem:[%s5443_s2 + $0x80] sm:$0xff] %v3981_v32  ;;  %3990 = vtanh.f32 %v3776_v30  ;;  %v3500_v34 = vpop.f32.mrb[24].mxu1 }
 0x189   :  { %3992 = vtanh.f32 %v3777_v33  ;;  %v3696_v35 = vpop.f32.mrb[24].mxu0  ;;  %v1098_v36 = vpop.f32.mrb[25].mxu1 }
 0x18a   :  { %v3983_v37 = vpop.eup %3982  ;;  %v3778_v38 = vadd.f32 %v3696_v35, %v3500_v34  ;;  %v2448_v39 = vpop.f32.mrb[25].mxu0 }
 0x18b   :  { %v3985_v40 = vpop.eup %3984  ;;  %2794 = vst [vmem:[%s5443_s2 + $0x98] sm:$0xff] %v3983_v37  ;;  %v3779_v41 = vadd.f32 %v2448_v39, %v1098_v36 }
 0x18c   :  { %2793 = vst [vmem:[%s5443_s2 + $0x90] sm:$0xff] %v3985_v40  ;;  %3994 = vtanh.f32 %v3778_v38  ;;  %v3503_v42 = vpop.f32.mrb[26].mxu1 }
 0x18d   :  { %3996 = vtanh.f32 %v3779_v41  ;;  %v3699_v43 = vpop.f32.mrb[26].mxu0  ;;  %v1108_v44 = vpop.f32.mrb[27].mxu1 }
 0x18e   :  { %v3987_v45 = vpop.eup %3986  ;;  %v3780_v46 = vadd.f32 %v3699_v43, %v3503_v42  ;;  %v2458_v47 = vpop.f32.mrb[27].mxu0 }
 0x18f   :  { %v3989_v48 = vpop.eup %3988  ;;  %2796 = vst [vmem:[%s5443_s2 + $0xa8] sm:$0xff] %v3987_v45  ;;  %v3781_v49 = vadd.f32 %v2458_v47, %v1108_v44 }
 0x190   :  { %2795 = vst [vmem:[%s5443_s2 + $0xa0] sm:$0xff] %v3989_v48  ;;  %3998 = vtanh.f32 %v3780_v46  ;;  %v3506_v50 = vpop.f32.mrb[28].mxu1 }
 0x191   :  { %4000 = vtanh.f32 %v3781_v49  ;;  %v3702_v51 = vpop.f32.mrb[28].mxu0  ;;  %v1118_v52 = vpop.f32.mrb[29].mxu1 }
 0x192   :  { %v3991_v53 = vpop.eup %3990  ;;  %v3782_v54 = vadd.f32 %v3702_v51, %v3506_v50  ;;  %v2468_v55 = vpop.f32.mrb[29].mxu0 }
 0x193   :  { %v3993_v56 = vpop.eup %3992  ;;  %2798 = vst [vmem:[%s5443_s2 + $0xb8] sm:$0xff] %v3991_v53  ;;  %v3783_v57 = vadd.f32 %v2468_v55, %v1118_v52 }
 0x194   :  { %2797 = vst [vmem:[%s5443_s2 + $0xb0] sm:$0xff] %v3993_v56  ;;  %4002 = vtanh.f32 %v3782_v54  ;;  %v3509_v58 = vpop.f32.mrb[30].mxu1 }
 0x195   :  { %4004 = vtanh.f32 %v3783_v57  ;;  %v3705_v59 = vpop.f32.mrb[30].mxu0  ;;  %v1128_v60 = vpop.f32.mrb[31].mxu1 }
 0x196   :  { %v3995_v62 = vpop.eup %3994  ;;  %v3784_v63 = vadd.f32 %v3705_v59, %v3509_v58  ;;  %v2478_v0 = vpop.f32.mrb[31].mxu0 }
 0x197   :  { %v3997_v1 = vpop.eup %3996  ;;  %2800 = vst [vmem:[%s5443_s2 + $0xc8] sm:$0xff] %v3995_v62  ;;  %v3785_v2 = vadd.f32 %v2478_v0, %v1128_v60 }
 0x198   :  { %2799 = vst [vmem:[%s5443_s2 + $0xc0] sm:$0xff] %v3997_v1  ;;  %4006 = vtanh.f32 %v3784_v63  ;;  %v3512_v5 = vpop.f32.mrb[32].mxu1 }
 0x199   :  { %4008 = vtanh.f32 %v3785_v2  ;;  %v3708_v7 = vpop.f32.mrb[32].mxu0  ;;  %v1138_v3 = vpop.f32.mrb[33].mxu1 }
 0x19a   :  { %v3999_v6 = vpop.eup %3998  ;;  %v3786_v8 = vadd.f32 %v3708_v7, %v3512_v5  ;;  %v2488_v61 = vpop.f32.mrb[33].mxu0 }
 0x19b   :  { %v4001_v9 = vpop.eup %4000  ;;  %2802 = vst [vmem:[%s5443_s2 + $0xd8] sm:$0xff] %v3999_v6  ;;  %v3787_v10 = vadd.f32 %v2488_v61, %v1138_v3 }
 0x19c   :  { %2801 = vst [vmem:[%s5443_s2 + $0xd0] sm:$0xff] %v4001_v9  ;;  %4010 = vtanh.f32 %v3786_v8  ;;  %v3515_v11 = vpop.f32.mrb[34].mxu1 }
 0x19d   :  { %4012 = vtanh.f32 %v3787_v10  ;;  %v3711_v12 = vpop.f32.mrb[34].mxu0  ;;  %v1148_v13 = vpop.f32.mrb[35].mxu1 }
 0x19e   :  { %v4003_v4 = vpop.eup %4002  ;;  %v3788_v14 = vadd.f32 %v3711_v12, %v3515_v11  ;;  %v2498_v15 = vpop.f32.mrb[35].mxu0 }
 0x19f   :  { %v4005_v16 = vpop.eup %4004  ;;  %2804 = vst [vmem:[%s5443_s2 + $0xe8] sm:$0xff] %v4003_v4  ;;  %v3789_v17 = vadd.f32 %v2498_v15, %v1148_v13 }
 0x1a0   :  { %2803 = vst [vmem:[%s5443_s2 + $0xe0] sm:$0xff] %v4005_v16  ;;  %4014 = vtanh.f32 %v3788_v14  ;;  %v3518_v18 = vpop.f32.mrb[36].mxu1 }
 0x1a1   :  { %4016 = vtanh.f32 %v3789_v17  ;;  %v3714_v19 = vpop.f32.mrb[36].mxu0  ;;  %v1158_v20 = vpop.f32.mrb[37].mxu1 }
 0x1a2   :  { %v4007_v21 = vpop.eup %4006  ;;  %v3790_v22 = vadd.f32 %v3714_v19, %v3518_v18  ;;  %v2508_v23 = vpop.f32.mrb[37].mxu0 }
 0x1a3   :  { %v4009_v24 = vpop.eup %4008  ;;  %2806 = vst [vmem:[%s5443_s2 + $0xf8] sm:$0xff] %v4007_v21  ;;  %v3791_v25 = vadd.f32 %v2508_v23, %v1158_v20 }
 0x1a4   :  { %2805 = vst [vmem:[%s5443_s2 + $0xf0] sm:$0xff] %v4009_v24  ;;  %4018 = vtanh.f32 %v3790_v22  ;;  %v3521_v26 = vpop.f32.mrb[38].mxu1 }
 0x1a5   :  { %4020 = vtanh.f32 %v3791_v25  ;;  %v3717_v27 = vpop.f32.mrb[38].mxu0  ;;  %v1168_v28 = vpop.f32.mrb[39].mxu1 }
 0x1a6   :  { %v4011_v29 = vpop.eup %4010  ;;  %v3792_v30 = vadd.f32 %v3717_v27, %v3521_v26  ;;  %v2518_v31 = vpop.f32.mrb[39].mxu0 }
 0x1a7   :  { %v4013_v32 = vpop.eup %4012  ;;  %2808 = vst [vmem:[%s5443_s2 + $0x108] sm:$0xff] %v4011_v29  ;;  %v3793_v33 = vadd.f32 %v2518_v31, %v1168_v28 }
 0x1a8   :  { %2807 = vst [vmem:[%s5443_s2 + $0x100] sm:$0xff] %v4013_v32  ;;  %4022 = vtanh.f32 %v3792_v30  ;;  %v3524_v34 = vpop.f32.mrb[40].mxu1 }
 0x1a9   :  { %4024 = vtanh.f32 %v3793_v33  ;;  %v3720_v35 = vpop.f32.mrb[40].mxu0  ;;  %v1178_v36 = vpop.f32.mrb[41].mxu1 }
 0x1aa   :  { %v4015_v37 = vpop.eup %4014  ;;  %v3794_v38 = vadd.f32 %v3720_v35, %v3524_v34  ;;  %v2528_v39 = vpop.f32.mrb[41].mxu0 }
 0x1ab   :  { %v4017_v40 = vpop.eup %4016  ;;  %2810 = vst [vmem:[%s5443_s2 + $0x118] sm:$0xff] %v4015_v37  ;;  %v3795_v41 = vadd.f32 %v2528_v39, %v1178_v36 }
 0x1ac   :  { %2809 = vst [vmem:[%s5443_s2 + $0x110] sm:$0xff] %v4017_v40  ;;  %4026 = vtanh.f32 %v3794_v38  ;;  %v3527_v42 = vpop.f32.mrb[42].mxu1 }
 0x1ad   :  { %4028 = vtanh.f32 %v3795_v41  ;;  %v3723_v43 = vpop.f32.mrb[42].mxu0  ;;  %v1188_v44 = vpop.f32.mrb[43].mxu1 }
 0x1ae   :  { %v4019_v45 = vpop.eup %4018  ;;  %v3796_v46 = vadd.f32 %v3723_v43, %v3527_v42  ;;  %v2538_v47 = vpop.f32.mrb[43].mxu0 }
 0x1af   :  { %v4021_v48 = vpop.eup %4020  ;;  %2812 = vst [vmem:[%s5443_s2 + $0x128] sm:$0xff] %v4019_v45  ;;  %v3797_v49 = vadd.f32 %v2538_v47, %v1188_v44 }
 0x1b0   :  { %2811 = vst [vmem:[%s5443_s2 + $0x120] sm:$0xff] %v4021_v48  ;;  %4030 = vtanh.f32 %v3796_v46  ;;  %v3530_v50 = vpop.f32.mrb[44].mxu1 }
 0x1b1   :  { %4032 = vtanh.f32 %v3797_v49  ;;  %v3726_v51 = vpop.f32.mrb[44].mxu0  ;;  %v1198_v52 = vpop.f32.mrb[45].mxu1 }
 0x1b2   :  { %v4023_v53 = vpop.eup %4022  ;;  %v3798_v54 = vadd.f32 %v3726_v51, %v3530_v50  ;;  %v2548_v55 = vpop.f32.mrb[45].mxu0 }
 0x1b3   :  { %v4025_v56 = vpop.eup %4024  ;;  %2814 = vst [vmem:[%s5443_s2 + $0x138] sm:$0xff] %v4023_v53  ;;  %v3799_v57 = vadd.f32 %v2548_v55, %v1198_v52 }
 0x1b4   :  { %2813 = vst [vmem:[%s5443_s2 + $0x130] sm:$0xff] %v4025_v56  ;;  %4034 = vtanh.f32 %v3798_v54  ;;  %v3533_v58 = vpop.f32.mrb[46].mxu1 }
 0x1b5   :  { %4036 = vtanh.f32 %v3799_v57  ;;  %v3729_v59 = vpop.f32.mrb[46].mxu0  ;;  %v1208_v60 = vpop.f32.mrb[47].mxu1 }
 0x1b6   :  { %v4027_v62 = vpop.eup %4026  ;;  %v3800_v63 = vadd.f32 %v3729_v59, %v3533_v58  ;;  %v2558_v0 = vpop.f32.mrb[47].mxu0 }
 0x1b7   :  { %v4029_v1 = vpop.eup %4028  ;;  %2816 = vst [vmem:[%s5443_s2 + $0x148] sm:$0xff] %v4027_v62  ;;  %v3801_v2 = vadd.f32 %v2558_v0, %v1208_v60 }
 0x1b8   :  { %2815 = vst [vmem:[%s5443_s2 + $0x140] sm:$0xff] %v4029_v1  ;;  %4038 = vtanh.f32 %v3800_v63  ;;  %v3536_v5 = vpop.f32.mrb[48].mxu1 }
 0x1b9   :  { %4040 = vtanh.f32 %v3801_v2  ;;  %v3732_v7 = vpop.f32.mrb[48].mxu0  ;;  %v1218_v3 = vpop.f32.mrb[49].mxu1 }
 0x1ba   :  { %v4031_v6 = vpop.eup %4030  ;;  %v3802_v8 = vadd.f32 %v3732_v7, %v3536_v5  ;;  %v2568_v61 = vpop.f32.mrb[49].mxu0 }
 0x1bb   :  { %v4033_v9 = vpop.eup %4032  ;;  %2818 = vst [vmem:[%s5443_s2 + $0x158] sm:$0xff] %v4031_v6  ;;  %v3803_v10 = vadd.f32 %v2568_v61, %v1218_v3 }
 0x1bc   :  { %2817 = vst [vmem:[%s5443_s2 + $0x150] sm:$0xff] %v4033_v9  ;;  %4042 = vtanh.f32 %v3802_v8  ;;  %v3539_v11 = vpop.f32.mrb[50].mxu1 }
 0x1bd   :  { %4044 = vtanh.f32 %v3803_v10  ;;  %v3735_v12 = vpop.f32.mrb[50].mxu0  ;;  %v1228_v13 = vpop.f32.mrb[51].mxu1 }
 0x1be   :  { %v4035_v4 = vpop.eup %4034  ;;  %v3804_v14 = vadd.f32 %v3735_v12, %v3539_v11  ;;  %v2578_v15 = vpop.f32.mrb[51].mxu0 }
 0x1bf   :  { %v4037_v16 = vpop.eup %4036  ;;  %2820 = vst [vmem:[%s5443_s2 + $0x168] sm:$0xff] %v4035_v4  ;;  %v3805_v17 = vadd.f32 %v2578_v15, %v1228_v13 }
 0x1c0   :  { %2819 = vst [vmem:[%s5443_s2 + $0x160] sm:$0xff] %v4037_v16  ;;  %4046 = vtanh.f32 %v3804_v14  ;;  %v3542_v18 = vpop.f32.mrb[52].mxu1 }
 0x1c1   :  { %4048 = vtanh.f32 %v3805_v17  ;;  %v3738_v19 = vpop.f32.mrb[52].mxu0  ;;  %v1238_v20 = vpop.f32.mrb[53].mxu1 }
 0x1c2   :  { %v4039_v21 = vpop.eup %4038  ;;  %v3806_v22 = vadd.f32 %v3738_v19, %v3542_v18  ;;  %v2588_v23 = vpop.f32.mrb[53].mxu0 }
 0x1c3   :  { %v4041_v24 = vpop.eup %4040  ;;  %2822 = vst [vmem:[%s5443_s2 + $0x178] sm:$0xff] %v4039_v21  ;;  %v3807_v25 = vadd.f32 %v2588_v23, %v1238_v20 }
 0x1c4   :  { %2821 = vst [vmem:[%s5443_s2 + $0x170] sm:$0xff] %v4041_v24  ;;  %4050 = vtanh.f32 %v3806_v22  ;;  %v3545_v26 = vpop.f32.mrb[54].mxu1 }
 0x1c5   :  { %4052 = vtanh.f32 %v3807_v25  ;;  %v3741_v27 = vpop.f32.mrb[54].mxu0  ;;  %v1248_v28 = vpop.f32.mrb[55].mxu1 }
 0x1c6   :  { %v4043_v29 = vpop.eup %4042  ;;  %v3808_v30 = vadd.f32 %v3741_v27, %v3545_v26  ;;  %v2598_v31 = vpop.f32.mrb[55].mxu0 }
 0x1c7   :  { %v4045_v32 = vpop.eup %4044  ;;  %2824 = vst [vmem:[%s5443_s2 + $0x188] sm:$0xff] %v4043_v29  ;;  %v3809_v33 = vadd.f32 %v2598_v31, %v1248_v28 }
 0x1c8   :  { %2823 = vst [vmem:[%s5443_s2 + $0x180] sm:$0xff] %v4045_v32  ;;  %4054 = vtanh.f32 %v3808_v30  ;;  %v3548_v34 = vpop.f32.mrb[56].mxu1 }
 0x1c9   :  { %4056 = vtanh.f32 %v3809_v33  ;;  %v3744_v35 = vpop.f32.mrb[56].mxu0  ;;  %v1258_v36 = vpop.f32.mrb[57].mxu1 }
 0x1ca   :  { %v4047_v37 = vpop.eup %4046  ;;  %v3810_v38 = vadd.f32 %v3744_v35, %v3548_v34  ;;  %v2608_v39 = vpop.f32.mrb[57].mxu0 }
 0x1cb   :  { %v4049_v40 = vpop.eup %4048  ;;  %2826 = vst [vmem:[%s5443_s2 + $0x198] sm:$0xff] %v4047_v37  ;;  %v3811_v41 = vadd.f32 %v2608_v39, %v1258_v36 }
 0x1cc   :  { %2825 = vst [vmem:[%s5443_s2 + $0x190] sm:$0xff] %v4049_v40  ;;  %4058 = vtanh.f32 %v3810_v38  ;;  %v3551_v42 = vpop.f32.mrb[58].mxu1 }
 0x1cd   :  { %4060 = vtanh.f32 %v3811_v41  ;;  %v3747_v43 = vpop.f32.mrb[58].mxu0  ;;  %v1268_v44 = vpop.f32.mrb[59].mxu1 }
 0x1ce   :  { %v4051_v45 = vpop.eup %4050  ;;  %v3812_v46 = vadd.f32 %v3747_v43, %v3551_v42  ;;  %v2618_v47 = vpop.f32.mrb[59].mxu0 }
 0x1cf   :  { %v4053_v48 = vpop.eup %4052  ;;  %2828 = vst [vmem:[%s5443_s2 + $0x1a8] sm:$0xff] %v4051_v45  ;;  %v3813_v49 = vadd.f32 %v2618_v47, %v1268_v44 }
 0x1d0   :  { %2827 = vst [vmem:[%s5443_s2 + $0x1a0] sm:$0xff] %v4053_v48  ;;  %4062 = vtanh.f32 %v3812_v46  ;;  %v3554_v50 = vpop.f32.mrb[60].mxu1 }
 0x1d1   :  { %4064 = vtanh.f32 %v3813_v49  ;;  %v3750_v51 = vpop.f32.mrb[60].mxu0  ;;  %v1278_v52 = vpop.f32.mrb[61].mxu1 }
 0x1d2   :  { %v4055_v53 = vpop.eup %4054  ;;  %v3814_v54 = vadd.f32 %v3750_v51, %v3554_v50  ;;  %v2628_v55 = vpop.f32.mrb[61].mxu0 }
 0x1d3   :  { %v4057_v56 = vpop.eup %4056  ;;  %2830 = vst [vmem:[%s5443_s2 + $0x1b8] sm:$0xff] %v4055_v53  ;;  %v3815_v57 = vadd.f32 %v2628_v55, %v1278_v52 }
 0x1d4   :  { %2829 = vst [vmem:[%s5443_s2 + $0x1b0] sm:$0xff] %v4057_v56  ;;  %4066 = vtanh.f32 %v3814_v54  ;;  %v3557_v58 = vpop.f32.mrb[62].mxu1 }
 0x1d5   :  { %4068 = vtanh.f32 %v3815_v57  ;;  %v3753_v59 = vpop.f32.mrb[62].mxu0  ;;  %v1288_v60 = vpop.f32.mrb[63].mxu1 }
 0x1d6   :  { %v4059_v62 = vpop.eup %4058  ;;  %v3816_v63 = vadd.f32 %v3753_v59, %v3557_v58  ;;  %v2638_v0 = vpop.f32.mrb[63].mxu0 }
 0x1d7   :  { %v4061_v1 = vpop.eup %4060  ;;  %2832 = vst [vmem:[%s5443_s2 + $0x1c8] sm:$0xff] %v4059_v62  ;;  %v3817_v2 = vadd.f32 %v2638_v0, %v1288_v60 }
 0x1d8   :  { %2831 = vst [vmem:[%s5443_s2 + $0x1c0] sm:$0xff] %v4061_v1  ;;  %4070 = vtanh.f32 %v3816_v63 }
 0x1d9   :  { %4072 = vtanh.f32 %v3817_v2 }
 0x1da   :  { %v4063_v5 = vpop.eup %4062 }
 0x1db   :  { %v4065_v7 = vpop.eup %4064  ;;  %2834 = vst [vmem:[%s5443_s2 + $0x1d8] sm:$0xff] %v4063_v5 }
 0x1dc   :  { %2833 = vst [vmem:[%s5443_s2 + $0x1d0] sm:$0xff] %v4065_v7 }
 0x1de   :  { %v4067_v3 = vpop.eup %4066 }
 0x1df   :  { %v4069_v6 = vpop.eup %4068  ;;  %2836 = vst [vmem:[%s5443_s2 + $0x1e8] sm:$0xff] %v4067_v3 }
 0x1e0   :  { %2835 = vst [vmem:[%s5443_s2 + $0x1e0] sm:$0xff] %v4069_v6 }
 0x1e2   :  { %v4071_v8 = vpop.eup %4070 }
 0x1e3   :  { %v4073_v61 = vpop.eup %4072  ;;  %2838 = vst [vmem:[%s5443_s2 + $0x1f8] sm:$0xff] %v4071_v8 }
 0x1e4   :  { %2837 = vst [vmem:[%s5443_s2 + $0x1f0] sm:$0xff] %v4073_v61 }

</bundles_post_ra>
